<compile_context>
chip_gen: v7x
topology: tpu7x:2x2x1
jax: 0.10.0
libtpu: 0.0.40
codegen_flags: <defaults>
</compile_context>

<pallas_src>
import functools
import math

import jax
import jax.numpy as jnp
from jax.experimental import pallas as pl
from jax.experimental.pallas import tpu as pltpu

# MXU operand dtype (f32 accumulation via preferred_element_type).  Set to
# jnp.float32 to recover full-precision matmuls.
MATMUL_DTYPE = jnp.bfloat16
_LN_EPS = 1e-5
_NEG_INF = -1e9


def _const_spec(shape):
    """BlockSpec for an operand whose block never changes across the grid.

    Uses pl.Buffered(1) so the constant block is not double-buffered (halves
    resident weight footprint); falls back gracefully if the installed JAX
    BlockSpec does not accept pipeline_mode.
    """
    idx_map = lambda b, _n=len(shape): (0,) * _n
    try:
        return pl.BlockSpec(shape, idx_map, pipeline_mode=pl.Buffered(1))
    except TypeError:  # older BlockSpec without pipeline_mode kwarg
        return pl.BlockSpec(shape, idx_map)


def _layernorm(y, g, b, eps):
    mean = jnp.mean(y, axis=-1, keepdims=True)
    var = jnp.mean((y - mean) ** 2, axis=-1, keepdims=True)
    return (y - mean) * jax.lax.rsqrt(var + eps) * g + b


# ----------------------------- Pallas kernels ------------------------------

def _encoder_block_kernel(x_ref, kv_ref, wqkv_ref, bqkv_ref, wo_ref, bo_ref,
                          ln1g_ref, ln1b_ref, w1_ref, fb1_ref, w2_ref, fb2_ref,
                          ln2g_ref, ln2b_ref, fing_ref, finb_ref,
                          o_ref, ctx_ref, *, num_heads, eps, apply_final_ln):
    """One full post-norm encoder block (optionally + final module LayerNorm).

    Block shapes: x/o (1,S,D), kv (1,1,S), wqkv (D,3D), wo (D,D),
    w1 (D,Dff), w2 (Dff,D); ctx_ref is a VMEM (S,D) f32 scratch.
    """
    S, D = x_ref.shape[1], x_ref.shape[2]
    dk = D // num_heads

    x = x_ref[0].astype(jnp.float32)                     # (S, D) residual, f32
    xm = x.astype(MATMUL_DTYPE)

    # Additive mask bias built in-kernel from (1,S) key validity (head- and
    # query-invariant): 0 for valid keys, -1e9 for padded keys.
    bias = jnp.where(kv_ref[0] > 0.5, 0.0, _NEG_INF)     # (1, S) f32

    # Fused QKV projection (Q scale already folded into wqkv/bqkv at setup).
    qkv = jnp.dot(xm, wqkv_ref[...], preferred_element_type=jnp.float32)
    qkv = qkv + bqkv_ref[...].astype(jnp.float32)        # (S, 3D) f32
    qkv_m = qkv.astype(MATMUL_DTYPE)                     # single cast

    # Per-head attention; context written into VMEM scratch at lane offsets
    # (no lane-dim concat / relayout).
    for h in range(num_heads):
        q_h = qkv_m[:, h * dk:(h + 1) * dk]
        k_h = qkv_m[:, D + h * dk:D + (h + 1) * dk]
        v_h = qkv_m[:, 2 * D + h * dk:2 * D + (h + 1) * dk]
        # Contract on the last dim of both q and k -> no explicit K transpose.
        s = jax.lax.dot_general(q_h, k_h, (((1,), (1,)), ((), ())),
                                preferred_element_type=jnp.float32)   # (S, S)
        s = s + bias
        smax = jnp.max(s, axis=-1, keepdims=True)
        p = jnp.exp(s - smax)
        p = p / jnp.sum(p, axis=-1, keepdims=True)
        ctx_ref[:, h * dk:(h + 1) * dk] = jnp.dot(
            p.astype(MATMUL_DTYPE), v_h, preferred_element_type=jnp.float32)

    # Output projection + residual + LayerNorm 1.
    attn = jnp.dot(ctx_ref[...].astype(MATMUL_DTYPE), wo_ref[...],
                   preferred_element_type=jnp.float32)
    attn = attn + bo_ref[...].astype(jnp.float32)
    y = _layernorm(x + attn, ln1g_ref[...].astype(jnp.float32),
                   ln1b_ref[...].astype(jnp.float32), eps)

    # FFN: up-proj + ReLU + down-proj + residual + LayerNorm 2.
    h1 = jnp.dot(y.astype(MATMUL_DTYPE), w1_ref[...],
                 preferred_element_type=jnp.float32)
    h1 = jnp.maximum(h1 + fb1_ref[...].astype(jnp.float32), 0.0)
    ff = jnp.dot(h1.astype(MATMUL_DTYPE), w2_ref[...],
                 preferred_element_type=jnp.float32)
    ff = ff + fb2_ref[...].astype(jnp.float32)
    y = _layernorm(y + ff, ln2g_ref[...].astype(jnp.float32),
                   ln2b_ref[...].astype(jnp.float32), eps)

    # Final module LayerNorm fused into the last block (static flag).
    if apply_final_ln:
        y = _layernorm(y, fing_ref[...].astype(jnp.float32),
                       finb_ref[...].astype(jnp.float32), eps)

    o_ref[0] = y.astype(o_ref.dtype)


def _layernorm_kernel(x_ref, g_ref, b_ref, o_ref, *, eps):
    """Norm-only kernel (only used if the encoder has zero blocks)."""
    o_ref[0] = _layernorm(x_ref[0].astype(jnp.float32),
                          g_ref[...].astype(jnp.float32),
                          b_ref[...].astype(jnp.float32), eps).astype(o_ref.dtype)


# ------------------------------ Pallas wrappers ----------------------------

def pallas_encoder_block(x, key_valid, p, num_heads, apply_final_ln,
                         fin_g, fin_b, eps=_LN_EPS):
    B, S, D = x.shape
    Dff = p["w1"].shape[1]
    kv3 = key_valid.reshape(B, 1, S).astype(jnp.float32)

    kernel = functools.partial(_encoder_block_kernel, num_heads=num_heads,
                               eps=eps, apply_final_ln=apply_final_ln)
    # NOTE(v7x): the 'parallel' batch grid shards across the 2 TensorCores;
    # keep B even (or add a query-tile axis) so neither core idles.
    return pl.pallas_call(
        kernel,
        out_shape=jax.ShapeDtypeStruct((B, S, D), x.dtype),
        grid=(B,),
        in_specs=[
            pl.BlockSpec((1, S, D), lambda b: (b, 0, 0)),      # x
            pl.BlockSpec((1, 1, S), lambda b: (b, 0, 0)),      # key validity
            _const_spec((D, 3 * D)),                           # wqkv (bf16)
            _const_spec((1, 3 * D)),                           # bqkv
            _const_spec((D, D)),                               # wo (bf16)
            _const_spec((1, D)),                               # bo
            _const_spec((1, D)),                               # ln1 gamma
            _const_spec((1, D)),                               # ln1 beta
            _const_spec((D, Dff)),                             # w1 (bf16)
            _const_spec((1, Dff)),                             # b1
            _const_spec((Dff, D)),                             # w2 (bf16)
            _const_spec((1, D)),                               # b2
            _const_spec((1, D)),                               # ln2 gamma
            _const_spec((1, D)),                               # ln2 beta
            _const_spec((1, D)),                               # final ln gamma
            _const_spec((1, D)),                               # final ln beta
        ],
        out_specs=pl.BlockSpec((1, S, D), lambda b: (b, 0, 0)),
        scratch_shapes=[pltpu.VMEM((S, D), jnp.float32)],      # ctx slab
        compiler_params=pltpu.CompilerParams(
            dimension_semantics=("parallel",)),
    )(x, kv3,
      p["wqkv"], p["bqkv"], p["wo"], p["bo"],
      p["ln1_g"], p["ln1_b"], p["w1"], p["b1"], p["w2"], p["b2"],
      p["ln2_g"], p["ln2_b"], fin_g, fin_b)


def pallas_layernorm(x, gamma, beta, eps=_LN_EPS):
    B, S, D = x.shape
    return pl.pallas_call(
        functools.partial(_layernorm_kernel, eps=eps),
        out_shape=jax.ShapeDtypeStruct((B, S, D), x.dtype),
        grid=(B,),
        in_specs=[pl.BlockSpec((1, S, D), lambda b: (b, 0, 0)),
                  _const_spec((1, D)), _const_spec((1, D))],
        out_specs=pl.BlockSpec((1, S, D), lambda b: (b, 0, 0)),
        compiler_params=pltpu.CompilerParams(
            dimension_semantics=("parallel",)),
    )(x, gamma, beta)


# ------------------------------ Encoder model ------------------------------

def encoder_forward(encoder_input, key_valid, prepared_blocks, final_ln,
                    num_heads):
    """Mirror of Encoder.forward: loop over blocks, final LayerNorm fused
    into the last block's kernel."""
    x = encoder_input
    n = len(prepared_blocks)
    if n == 0:
        return pallas_layernorm(x, final_ln["g"], final_ln["b"])
    for i, p in enumerate(prepared_blocks):
        x = pallas_encoder_block(x, key_valid, p, num_heads,
                                 apply_final_ln=(i == n - 1),
                                 fin_g=final_ln["g"], fin_b=final_ln["b"])
    return x


# ------------------------------ Param init / prep --------------------------

def init_block_params(key, d_model, d_ff):
    ks = jax.random.split(key, 6)
    s = 0.05
    return {
        "wq": jax.random.normal(ks[0], (d_model, d_model), jnp.float32) * s,
        "wk": jax.random.normal(ks[1], (d_model, d_model), jnp.float32) * s,
        "wv": jax.random.normal(ks[2], (d_model, d_model), jnp.float32) * s,
        "wo": jax.random.normal(ks[3], (d_model, d_model), jnp.float32) * s,
        "bq": jnp.zeros((d_model,), jnp.float32),
        "bk": jnp.zeros((d_model,), jnp.float32),
        "bv": jnp.zeros((d_model,), jnp.float32),
        "bo": jnp.zeros((d_model,), jnp.float32),
        "w1": jax.random.normal(ks[4], (d_model, d_ff), jnp.float32) * s,
        "b1": jnp.zeros((d_ff,), jnp.float32),
        "w2": jax.random.normal(ks[5], (d_ff, d_model), jnp.float32) * s,
        "b2": jnp.zeros((d_model,), jnp.float32),
        "ln1_g": jnp.ones((d_model,), jnp.float32),
        "ln1_b": jnp.zeros((d_model,), jnp.float32),
        "ln2_g": jnp.ones((d_model,), jnp.float32),
        "ln2_b": jnp.zeros((d_model,), jnp.float32),
    }


def prepare_block_params(p, num_heads):
    """One-time weight prep: fuse QKV, fold Q scale into the weight, cast
    matmul weights to MATMUL_DTYPE, reshape vectors to (1, N)."""
    d_model = p["wq"].shape[0]
    dk = d_model // num_heads
    scale = 1.0 / math.sqrt(dk)
    wqkv = jnp.concatenate([p["wq"] * scale, p["wk"], p["wv"]], axis=1)
    bqkv = jnp.concatenate([p["bq"] * scale, p["bk"], p["bv"]])
    return {
        "wqkv": wqkv.astype(MATMUL_DTYPE),
        "bqkv": bqkv.reshape(1, -1).astype(jnp.float32),
        "wo": p["wo"].astype(MATMUL_DTYPE),
        "bo": p["bo"].reshape(1, -1),
        "ln1_g": p["ln1_g"].reshape(1, -1),
        "ln1_b": p["ln1_b"].reshape(1, -1),
        "w1": p["w1"].astype(MATMUL_DTYPE),
        "b1": p["b1"].reshape(1, -1),
        "w2": p["w2"].astype(MATMUL_DTYPE),
        "b2": p["b2"].reshape(1, -1),
        "ln2_g": p["ln2_g"].reshape(1, -1),
        "ln2_b": p["ln2_b"].reshape(1, -1),
    }


if __name__ == "__main__":
    # Lane-dense small shapes: d_model = 128 (multiple of 128 lanes).
    B, S, D, H, D_FF, N_BLOCKS = 2, 16, 128, 4, 256, 2

    root = jax.random.PRNGKey(0)
    k_in, k_p = jax.random.split(root)
    encoder_input = jax.random.normal(k_in, (B, S, D), jnp.float32)

    # Padding mask as key validity: batch 0 attends to all 16 positions,
    # batch 1 to the first 11.  (Dense (B,1,S,S) mask is never materialized.)
    lengths = jnp.array([16, 11], jnp.int32)
    key_valid = (jnp.arange(S)[None, :] < lengths[:, None]).astype(jnp.float32)

    block_keys = jax.random.split(k_p, N_BLOCKS)
    raw_blocks = [init_block_params(k, D, D_FF) for k in block_keys]
    prepared_blocks = [prepare_block_params(p, H) for p in raw_blocks]
    final_ln = {"g": jnp.ones((1, D), jnp.float32),
                "b": jnp.zeros((1, D), jnp.float32)}

    fwd = jax.jit(functools.partial(encoder_forward, num_heads=H))
    out = fwd(encoder_input, key_valid, prepared_blocks, final_ln)
    out = jax.block_until_ready(out)

    assert out.shape == (B, S, D) and out.dtype == jnp.float32
    assert bool(jnp.all(jnp.isfinite(out)))
    print("KERNEL_OK")
</pallas_src>

<mosaic_0001>
module attributes {stable_mosaic.version = 11 : i64} {
  func.func @_encoder_block_kernel(%arg0: i32, %arg1: memref<1x16x128xf32, #tpu.memory_space<vmem>>, %arg2: memref<1x1x16xf32, #tpu.memory_space<vmem>>, %arg3: memref<128x384xbf16, #tpu.memory_space<vmem>>, %arg4: memref<1x384xf32, #tpu.memory_space<vmem>>, %arg5: memref<128x128xbf16, #tpu.memory_space<vmem>>, %arg6: memref<1x128xf32, #tpu.memory_space<vmem>>, %arg7: memref<1x128xf32, #tpu.memory_space<vmem>>, %arg8: memref<1x128xf32, #tpu.memory_space<vmem>>, %arg9: memref<128x256xbf16, #tpu.memory_space<vmem>>, %arg10: memref<1x256xf32, #tpu.memory_space<vmem>>, %arg11: memref<256x128xbf16, #tpu.memory_space<vmem>>, %arg12: memref<1x128xf32, #tpu.memory_space<vmem>>, %arg13: memref<1x128xf32, #tpu.memory_space<vmem>>, %arg14: memref<1x128xf32, #tpu.memory_space<vmem>>, %arg15: memref<1x128xf32, #tpu.memory_space<vmem>>, %arg16: memref<1x128xf32, #tpu.memory_space<vmem>>, %arg17: memref<1x16x128xf32, #tpu.memory_space<vmem>>, %arg18: memref<16x128xf32, #tpu.memory_space<vmem>>) attributes {dimension_semantics = [#tpu.dimension_semantics<parallel>], iteration_bounds = array<i64: 2>, scalar_prefetch = 0 : i64, scratch_operands = 1 : i64, tpu.core_type = #tpu.core_type<tc>, window_params = [{transform_indices = @transform_0, window_bounds = array<i64: 1, 16, 128>}, {transform_indices = @transform_1, window_bounds = array<i64: 1, 1, 16>}, {pipeline_mode = #tpu.pipeline_mode<synchronous>, transform_indices = @transform_2, window_bounds = array<i64: 128, 384>}, {pipeline_mode = #tpu.pipeline_mode<synchronous>, transform_indices = @transform_3, window_bounds = array<i64: 1, 384>}, {pipeline_mode = #tpu.pipeline_mode<synchronous>, transform_indices = @transform_4, window_bounds = array<i64: 128, 128>}, {pipeline_mode = #tpu.pipeline_mode<synchronous>, transform_indices = @transform_5, window_bounds = array<i64: 1, 128>}, {pipeline_mode = #tpu.pipeline_mode<synchronous>, transform_indices = @transform_6, window_bounds = array<i64: 1, 128>}, {pipeline_mode = #tpu.pipeline_mode<synchronous>, transform_indices = @transform_7, window_bounds = array<i64: 1, 128>}, {pipeline_mode = #tpu.pipeline_mode<synchronous>, transform_indices = @transform_8, window_bounds = array<i64: 128, 256>}, {pipeline_mode = #tpu.pipeline_mode<synchronous>, transform_indices = @transform_9, window_bounds = array<i64: 1, 256>}, {pipeline_mode = #tpu.pipeline_mode<synchronous>, transform_indices = @transform_10, window_bounds = array<i64: 256, 128>}, {pipeline_mode = #tpu.pipeline_mode<synchronous>, transform_indices = @transform_11, window_bounds = array<i64: 1, 128>}, {pipeline_mode = #tpu.pipeline_mode<synchronous>, transform_indices = @transform_12, window_bounds = array<i64: 1, 128>}, {pipeline_mode = #tpu.pipeline_mode<synchronous>, transform_indices = @transform_13, window_bounds = array<i64: 1, 128>}, {pipeline_mode = #tpu.pipeline_mode<synchronous>, transform_indices = @transform_14, window_bounds = array<i64: 1, 128>}, {pipeline_mode = #tpu.pipeline_mode<synchronous>, transform_indices = @transform_15, window_bounds = array<i64: 1, 128>}, {transform_indices = @transform_16, window_bounds = array<i64: 1, 16, 128>}]} {
    %c0 = arith.constant 0 : index
    %c0_0 = arith.constant 0 : index
    %c0_1 = arith.constant 0 : index
    %0 = vector.load %arg1[%c0, %c0_0, %c0_1] : memref<1x16x128xf32, #tpu.memory_space<vmem>>, vector<1x16x128xf32>
    %1 = vector.shape_cast %0 : vector<1x16x128xf32> to vector<16x128xf32>
    %2 = arith.truncf %1 : vector<16x128xf32> to vector<16x128xbf16>
    %c0_2 = arith.constant 0 : index
    %c0_3 = arith.constant 0 : index
    %c0_4 = arith.constant 0 : index
    %3 = vector.load %arg2[%c0_2, %c0_3, %c0_4] : memref<1x1x16xf32, #tpu.memory_space<vmem>>, vector<1x1x16xf32>
    %4 = vector.shape_cast %3 : vector<1x1x16xf32> to vector<1x16xf32>
    %cst = arith.constant 5.000000e-01 : f32
    %5 = vector.broadcast %cst : f32 to vector<1x16xf32>
    %6 = arith.cmpf ogt, %4, %5 : vector<1x16xf32>
    %cst_5 = arith.constant 0.000000e+00 : f32
    %cst_6 = arith.constant -1.000000e+09 : f32
    %7 = vector.broadcast %cst_5 : f32 to vector<1x16xf32>
    %8 = vector.broadcast %cst_6 : f32 to vector<1x16xf32>
    %9 = arith.select %6, %7, %8 : vector<1x16xi1>, vector<1x16xf32>
    %c0_7 = arith.constant 0 : index
    %c0_8 = arith.constant 0 : index
    %10 = vector.load %arg3[%c0_7, %c0_8] : memref<128x384xbf16, #tpu.memory_space<vmem>>, vector<128x384xbf16>
    %cst_9 = arith.constant dense<0.000000e+00> : vector<16x384xf32>
    %11 = tpu.matmul %2, %10, %cst_9 {dimension_numbers = #tpu.dot_dimension_numbers<[1], [0], [0], [1], [0, 0, 1, 1], [], []>} : vector<16x128xbf16>, vector<128x384xbf16>, vector<16x384xf32> -> vector<16x384xf32>
    %c0_10 = arith.constant 0 : index
    %c0_11 = arith.constant 0 : index
    %12 = vector.load %arg4[%c0_10, %c0_11] : memref<1x384xf32, #tpu.memory_space<vmem>>, vector<1x384xf32>
    %13 = vector.broadcast %12 : vector<1x384xf32> to vector<16x384xf32>
    %14 = arith.addf %11, %13 : vector<16x384xf32>
    %15 = arith.truncf %14 : vector<16x384xf32> to vector<16x384xbf16>
    %16 = vector.extract_strided_slice %15 {offsets = [0, 0], sizes = [16, 32], strides = [1, 1]} : vector<16x384xbf16> to vector<16x32xbf16>
    %17 = vector.extract_strided_slice %15 {offsets = [0, 128], sizes = [16, 32], strides = [1, 1]} : vector<16x384xbf16> to vector<16x32xbf16>
    %18 = vector.extract_strided_slice %15 {offsets = [0, 256], sizes = [16, 32], strides = [1, 1]} : vector<16x384xbf16> to vector<16x32xbf16>
    %cst_12 = arith.constant dense<0.000000e+00> : vector<16x16xf32>
    %19 = tpu.matmul %16, %17, %cst_12 {dimension_numbers = #tpu.dot_dimension_numbers<[1], [1], [0], [0], [0, 0, 1, 0], [], []>} : vector<16x32xbf16>, vector<16x32xbf16>, vector<16x16xf32> -> vector<16x16xf32>
    %20 = vector.broadcast %9 : vector<1x16xf32> to vector<16x16xf32>
    %21 = arith.addf %19, %20 : vector<16x16xf32>
    %cst_13 = arith.constant dense<0xFF800000> : vector<16xf32>
    %22 = vector.multi_reduction <maximumf>, %21, %cst_13 [1] : vector<16x16xf32> to vector<16xf32>
    %23 = vector.shape_cast %22 : vector<16xf32> to vector<16x1xf32>
    %24 = vector.broadcast %23 : vector<16x1xf32> to vector<16x16xf32>
    %25 = arith.subf %21, %24 : vector<16x16xf32>
    %26 = math.exp %25 : vector<16x16xf32>
    %cst_14 = arith.constant dense<0.000000e+00> : vector<16xf32>
    %27 = vector.multi_reduction <add>, %26, %cst_14 [1] : vector<16x16xf32> to vector<16xf32>
    %28 = vector.shape_cast %27 : vector<16xf32> to vector<16x1xf32>
    %29 = vector.broadcast %28 : vector<16x1xf32> to vector<16x16xf32>
    %30 = arith.divf %26, %29 : vector<16x16xf32>
    %31 = arith.truncf %30 : vector<16x16xf32> to vector<16x16xbf16>
    %cst_15 = arith.constant dense<0.000000e+00> : vector<16x32xf32>
    %32 = tpu.matmul %31, %18, %cst_15 {dimension_numbers = #tpu.dot_dimension_numbers<[1], [0], [0], [1], [0, 0, 1, 1], [], []>} : vector<16x16xbf16>, vector<16x32xbf16>, vector<16x32xf32> -> vector<16x32xf32>
    %c0_16 = arith.constant 0 : index
    %c0_17 = arith.constant 0 : index
    %33 = vector.load %arg18[%c0_16, %c0_17] : memref<16x128xf32, #tpu.memory_space<vmem>>, vector<16x32xf32>
    tpu.vector_store %arg18[%c0_16, %c0_17], %32 {strides = array<i32>} : memref<16x128xf32, #tpu.memory_space<vmem>>, vector<16x32xf32>,
    %34 = vector.extract_strided_slice %15 {offsets = [0, 32], sizes = [16, 32], strides = [1, 1]} : vector<16x384xbf16> to vector<16x32xbf16>
    %35 = vector.extract_strided_slice %15 {offsets = [0, 160], sizes = [16, 32], strides = [1, 1]} : vector<16x384xbf16> to vector<16x32xbf16>
    %36 = vector.extract_strided_slice %15 {offsets = [0, 288], sizes = [16, 32], strides = [1, 1]} : vector<16x384xbf16> to vector<16x32xbf16>
    %cst_18 = arith.constant dense<0.000000e+00> : vector<16x16xf32>
    %37 = tpu.matmul %34, %35, %cst_18 {dimension_numbers = #tpu.dot_dimension_numbers<[1], [1], [0], [0], [0, 0, 1, 0], [], []>} : vector<16x32xbf16>, vector<16x32xbf16>, vector<16x16xf32> -> vector<16x16xf32>
    %38 = vector.broadcast %9 : vector<1x16xf32> to vector<16x16xf32>
    %39 = arith.addf %37, %38 : vector<16x16xf32>
    %cst_19 = arith.constant dense<0xFF800000> : vector<16xf32>
    %40 = vector.multi_reduction <maximumf>, %39, %cst_19 [1] : vector<16x16xf32> to vector<16xf32>
    %41 = vector.shape_cast %40 : vector<16xf32> to vector<16x1xf32>
    %42 = vector.broadcast %41 : vector<16x1xf32> to vector<16x16xf32>
    %43 = arith.subf %39, %42 : vector<16x16xf32>
    %44 = math.exp %43 : vector<16x16xf32>
    %cst_20 = arith.constant dense<0.000000e+00> : vector<16xf32>
    %45 = vector.multi_reduction <add>, %44, %cst_20 [1] : vector<16x16xf32> to vector<16xf32>
    %46 = vector.shape_cast %45 : vector<16xf32> to vector<16x1xf32>
    %47 = vector.broadcast %46 : vector<16x1xf32> to vector<16x16xf32>
    %48 = arith.divf %44, %47 : vector<16x16xf32>
    %49 = arith.truncf %48 : vector<16x16xf32> to vector<16x16xbf16>
    %cst_21 = arith.constant dense<0.000000e+00> : vector<16x32xf32>
    %50 = tpu.matmul %49, %36, %cst_21 {dimension_numbers = #tpu.dot_dimension_numbers<[1], [0], [0], [1], [0, 0, 1, 1], [], []>} : vector<16x16xbf16>, vector<16x32xbf16>, vector<16x32xf32> -> vector<16x32xf32>
    %c0_22 = arith.constant 0 : index
    %c32 = arith.constant 32 : index
    %51 = vector.load %arg18[%c0_22, %c32] : memref<16x128xf32, #tpu.memory_space<vmem>>, vector<16x32xf32>
    tpu.vector_store %arg18[%c0_22, %c32], %50 {strides = array<i32>} : memref<16x128xf32, #tpu.memory_space<vmem>>, vector<16x32xf32>,
    %52 = vector.extract_strided_slice %15 {offsets = [0, 64], sizes = [16, 32], strides = [1, 1]} : vector<16x384xbf16> to vector<16x32xbf16>
    %53 = vector.extract_strided_slice %15 {offsets = [0, 192], sizes = [16, 32], strides = [1, 1]} : vector<16x384xbf16> to vector<16x32xbf16>
    %54 = vector.extract_strided_slice %15 {offsets = [0, 320], sizes = [16, 32], strides = [1, 1]} : vector<16x384xbf16> to vector<16x32xbf16>
    %cst_23 = arith.constant dense<0.000000e+00> : vector<16x16xf32>
    %55 = tpu.matmul %52, %53, %cst_23 {dimension_numbers = #tpu.dot_dimension_numbers<[1], [1], [0], [0], [0, 0, 1, 0], [], []>} : vector<16x32xbf16>, vector<16x32xbf16>, vector<16x16xf32> -> vector<16x16xf32>
    %56 = vector.broadcast %9 : vector<1x16xf32> to vector<16x16xf32>
    %57 = arith.addf %55, %56 : vector<16x16xf32>
    %cst_24 = arith.constant dense<0xFF800000> : vector<16xf32>
    %58 = vector.multi_reduction <maximumf>, %57, %cst_24 [1] : vector<16x16xf32> to vector<16xf32>
    %59 = vector.shape_cast %58 : vector<16xf32> to vector<16x1xf32>
    %60 = vector.broadcast %59 : vector<16x1xf32> to vector<16x16xf32>
    %61 = arith.subf %57, %60 : vector<16x16xf32>
    %62 = math.exp %61 : vector<16x16xf32>
    %cst_25 = arith.constant dense<0.000000e+00> : vector<16xf32>
    %63 = vector.multi_reduction <add>, %62, %cst_25 [1] : vector<16x16xf32> to vector<16xf32>
    %64 = vector.shape_cast %63 : vector<16xf32> to vector<16x1xf32>
    %65 = vector.broadcast %64 : vector<16x1xf32> to vector<16x16xf32>
    %66 = arith.divf %62, %65 : vector<16x16xf32>
    %67 = arith.truncf %66 : vector<16x16xf32> to vector<16x16xbf16>
    %cst_26 = arith.constant dense<0.000000e+00> : vector<16x32xf32>
    %68 = tpu.matmul %67, %54, %cst_26 {dimension_numbers = #tpu.dot_dimension_numbers<[1], [0], [0], [1], [0, 0, 1, 1], [], []>} : vector<16x16xbf16>, vector<16x32xbf16>, vector<16x32xf32> -> vector<16x32xf32>
    %c0_27 = arith.constant 0 : index
    %c64 = arith.constant 64 : index
    %69 = vector.load %arg18[%c0_27, %c64] : memref<16x128xf32, #tpu.memory_space<vmem>>, vector<16x32xf32>
    tpu.vector_store %arg18[%c0_27, %c64], %68 {strides = array<i32>} : memref<16x128xf32, #tpu.memory_space<vmem>>, vector<16x32xf32>,
    %70 = vector.extract_strided_slice %15 {offsets = [0, 96], sizes = [16, 32], strides = [1, 1]} : vector<16x384xbf16> to vector<16x32xbf16>
    %71 = vector.extract_strided_slice %15 {offsets = [0, 224], sizes = [16, 32], strides = [1, 1]} : vector<16x384xbf16> to vector<16x32xbf16>
    %72 = vector.extract_strided_slice %15 {offsets = [0, 352], sizes = [16, 32], strides = [1, 1]} : vector<16x384xbf16> to vector<16x32xbf16>
    %cst_28 = arith.constant dense<0.000000e+00> : vector<16x16xf32>
    %73 = tpu.matmul %70, %71, %cst_28 {dimension_numbers = #tpu.dot_dimension_numbers<[1], [1], [0], [0], [0, 0, 1, 0], [], []>} : vector<16x32xbf16>, vector<16x32xbf16>, vector<16x16xf32> -> vector<16x16xf32>
    %74 = vector.broadcast %9 : vector<1x16xf32> to vector<16x16xf32>
    %75 = arith.addf %73, %74 : vector<16x16xf32>
    %cst_29 = arith.constant dense<0xFF800000> : vector<16xf32>
    %76 = vector.multi_reduction <maximumf>, %75, %cst_29 [1] : vector<16x16xf32> to vector<16xf32>
    %77 = vector.shape_cast %76 : vector<16xf32> to vector<16x1xf32>
    %78 = vector.broadcast %77 : vector<16x1xf32> to vector<16x16xf32>
    %79 = arith.subf %75, %78 : vector<16x16xf32>
    %80 = math.exp %79 : vector<16x16xf32>
    %cst_30 = arith.constant dense<0.000000e+00> : vector<16xf32>
    %81 = vector.multi_reduction <add>, %80, %cst_30 [1] : vector<16x16xf32> to vector<16xf32>
    %82 = vector.shape_cast %81 : vector<16xf32> to vector<16x1xf32>
    %83 = vector.broadcast %82 : vector<16x1xf32> to vector<16x16xf32>
    %84 = arith.divf %80, %83 : vector<16x16xf32>
    %85 = arith.truncf %84 : vector<16x16xf32> to vector<16x16xbf16>
    %cst_31 = arith.constant dense<0.000000e+00> : vector<16x32xf32>
    %86 = tpu.matmul %85, %72, %cst_31 {dimension_numbers = #tpu.dot_dimension_numbers<[1], [0], [0], [1], [0, 0, 1, 1], [], []>} : vector<16x16xbf16>, vector<16x32xbf16>, vector<16x32xf32> -> vector<16x32xf32>
    %c0_32 = arith.constant 0 : index
    %c96 = arith.constant 96 : index
    %87 = vector.load %arg18[%c0_32, %c96] : memref<16x128xf32, #tpu.memory_space<vmem>>, vector<16x32xf32>
    tpu.vector_store %arg18[%c0_32, %c96], %86 {strides = array<i32>} : memref<16x128xf32, #tpu.memory_space<vmem>>, vector<16x32xf32>,
    %c0_33 = arith.constant 0 : index
    %c0_34 = arith.constant 0 : index
    %88 = vector.load %arg18[%c0_33, %c0_34] : memref<16x128xf32, #tpu.memory_space<vmem>>, vector<16x128xf32>
    %89 = arith.truncf %88 : vector<16x128xf32> to vector<16x128xbf16>
    %c0_35 = arith.constant 0 : index
    %c0_36 = arith.constant 0 : index
    %90 = vector.load %arg5[%c0_35, %c0_36] : memref<128x128xbf16, #tpu.memory_space<vmem>>, vector<128x128xbf16>
    %cst_37 = arith.constant dense<0.000000e+00> : vector<16x128xf32>
    %91 = tpu.matmul %89, %90, %cst_37 {dimension_numbers = #tpu.dot_dimension_numbers<[1], [0], [0], [1], [0, 0, 1, 1], [], []>} : vector<16x128xbf16>, vector<128x128xbf16>, vector<16x128xf32> -> vector<16x128xf32>
    %c0_38 = arith.constant 0 : index
    %c0_39 = arith.constant 0 : index
    %92 = vector.load %arg6[%c0_38, %c0_39] : memref<1x128xf32, #tpu.memory_space<vmem>>, vector<1x128xf32>
    %93 = vector.broadcast %92 : vector<1x128xf32> to vector<16x128xf32>
    %94 = arith.addf %91, %93 : vector<16x128xf32>
    %95 = arith.addf %1, %94 : vector<16x128xf32>
    %c0_40 = arith.constant 0 : index
    %c0_41 = arith.constant 0 : index
    %96 = vector.load %arg7[%c0_40, %c0_41] : memref<1x128xf32, #tpu.memory_space<vmem>>, vector<1x128xf32>
    %c0_42 = arith.constant 0 : index
    %c0_43 = arith.constant 0 : index
    %97 = vector.load %arg8[%c0_42, %c0_43] : memref<1x128xf32, #tpu.memory_space<vmem>>, vector<1x128xf32>
    %cst_44 = arith.constant dense<0.000000e+00> : vector<16xf32>
    %98 = vector.multi_reduction <add>, %95, %cst_44 [1] : vector<16x128xf32> to vector<16xf32>
    %99 = vector.shape_cast %98 : vector<16xf32> to vector<16x1xf32>
    %cst_45 = arith.constant 1.280000e+02 : f32
    %100 = vector.broadcast %cst_45 : f32 to vector<16x1xf32>
    %101 = arith.divf %99, %100 : vector<16x1xf32>
    %102 = vector.broadcast %101 : vector<16x1xf32> to vector<16x128xf32>
    %103 = arith.subf %95, %102 : vector<16x128xf32>
    %104 = arith.mulf %103, %103 : vector<16x128xf32>
    %cst_46 = arith.constant dense<0.000000e+00> : vector<16xf32>
    %105 = vector.multi_reduction <add>, %104, %cst_46 [1] : vector<16x128xf32> to vector<16xf32>
    %106 = vector.shape_cast %105 : vector<16xf32> to vector<16x1xf32>
    %cst_47 = arith.constant 1.280000e+02 : f32
    %107 = vector.broadcast %cst_47 : f32 to vector<16x1xf32>
    %108 = arith.divf %106, %107 : vector<16x1xf32>
    %109 = vector.broadcast %101 : vector<16x1xf32> to vector<16x128xf32>
    %110 = arith.subf %95, %109 : vector<16x128xf32>
    %cst_48 = arith.constant 9.99999974E-6 : f32
    %111 = vector.broadcast %cst_48 : f32 to vector<16x1xf32>
    %112 = arith.addf %108, %111 : vector<16x1xf32>
    %113 = math.rsqrt %112 : vector<16x1xf32>
    %114 = vector.broadcast %113 : vector<16x1xf32> to vector<16x128xf32>
    %115 = arith.mulf %110, %114 : vector<16x128xf32>
    %116 = vector.broadcast %96 : vector<1x128xf32> to vector<16x128xf32>
    %117 = arith.mulf %115, %116 : vector<16x128xf32>
    %118 = vector.broadcast %97 : vector<1x128xf32> to vector<16x128xf32>
    %119 = arith.addf %117, %118 : vector<16x128xf32>
    %120 = arith.truncf %119 : vector<16x128xf32> to vector<16x128xbf16>
    %c0_49 = arith.constant 0 : index
    %c0_50 = arith.constant 0 : index
    %121 = vector.load %arg9[%c0_49, %c0_50] : memref<128x256xbf16, #tpu.memory_space<vmem>>, vector<128x256xbf16>
    %cst_51 = arith.constant dense<0.000000e+00> : vector<16x256xf32>
    %122 = tpu.matmul %120, %121, %cst_51 {dimension_numbers = #tpu.dot_dimension_numbers<[1], [0], [0], [1], [0, 0, 1, 1], [], []>} : vector<16x128xbf16>, vector<128x256xbf16>, vector<16x256xf32> -> vector<16x256xf32>
    %c0_52 = arith.constant 0 : index
    %c0_53 = arith.constant 0 : index
    %123 = vector.load %arg10[%c0_52, %c0_53] : memref<1x256xf32, #tpu.memory_space<vmem>>, vector<1x256xf32>
    %124 = vector.broadcast %123 : vector<1x256xf32> to vector<16x256xf32>
    %125 = arith.addf %122, %124 : vector<16x256xf32>
    %cst_54 = arith.constant 0.000000e+00 : f32
    %126 = vector.broadcast %cst_54 : f32 to vector<16x256xf32>
    %127 = arith.maximumf %125, %126 : vector<16x256xf32>
    %128 = arith.truncf %127 : vector<16x256xf32> to vector<16x256xbf16>
    %c0_55 = arith.constant 0 : index
    %c0_56 = arith.constant 0 : index
    %129 = vector.load %arg11[%c0_55, %c0_56] : memref<256x128xbf16, #tpu.memory_space<vmem>>, vector<256x128xbf16>
    %cst_57 = arith.constant dense<0.000000e+00> : vector<16x128xf32>
    %130 = tpu.matmul %128, %129, %cst_57 {dimension_numbers = #tpu.dot_dimension_numbers<[1], [0], [0], [1], [0, 0, 1, 1], [], []>} : vector<16x256xbf16>, vector<256x128xbf16>, vector<16x128xf32> -> vector<16x128xf32>
    %c0_58 = arith.constant 0 : index
    %c0_59 = arith.constant 0 : index
    %131 = vector.load %arg12[%c0_58, %c0_59] : memref<1x128xf32, #tpu.memory_space<vmem>>, vector<1x128xf32>
    %132 = vector.broadcast %131 : vector<1x128xf32> to vector<16x128xf32>
    %133 = arith.addf %130, %132 : vector<16x128xf32>
    %134 = arith.addf %119, %133 : vector<16x128xf32>
    %c0_60 = arith.constant 0 : index
    %c0_61 = arith.constant 0 : index
    %135 = vector.load %arg13[%c0_60, %c0_61] : memref<1x128xf32, #tpu.memory_space<vmem>>, vector<1x128xf32>
    %c0_62 = arith.constant 0 : index
    %c0_63 = arith.constant 0 : index
    %136 = vector.load %arg14[%c0_62, %c0_63] : memref<1x128xf32, #tpu.memory_space<vmem>>, vector<1x128xf32>
    %cst_64 = arith.constant dense<0.000000e+00> : vector<16xf32>
    %137 = vector.multi_reduction <add>, %134, %cst_64 [1] : vector<16x128xf32> to vector<16xf32>
    %138 = vector.shape_cast %137 : vector<16xf32> to vector<16x1xf32>
    %cst_65 = arith.constant 1.280000e+02 : f32
    %139 = vector.broadcast %cst_65 : f32 to vector<16x1xf32>
    %140 = arith.divf %138, %139 : vector<16x1xf32>
    %141 = vector.broadcast %140 : vector<16x1xf32> to vector<16x128xf32>
    %142 = arith.subf %134, %141 : vector<16x128xf32>
    %143 = arith.mulf %142, %142 : vector<16x128xf32>
    %cst_66 = arith.constant dense<0.000000e+00> : vector<16xf32>
    %144 = vector.multi_reduction <add>, %143, %cst_66 [1] : vector<16x128xf32> to vector<16xf32>
    %145 = vector.shape_cast %144 : vector<16xf32> to vector<16x1xf32>
    %cst_67 = arith.constant 1.280000e+02 : f32
    %146 = vector.broadcast %cst_67 : f32 to vector<16x1xf32>
    %147 = arith.divf %145, %146 : vector<16x1xf32>
    %148 = vector.broadcast %140 : vector<16x1xf32> to vector<16x128xf32>
    %149 = arith.subf %134, %148 : vector<16x128xf32>
    %cst_68 = arith.constant 9.99999974E-6 : f32
    %150 = vector.broadcast %cst_68 : f32 to vector<16x1xf32>
    %151 = arith.addf %147, %150 : vector<16x1xf32>
    %152 = math.rsqrt %151 : vector<16x1xf32>
    %153 = vector.broadcast %152 : vector<16x1xf32> to vector<16x128xf32>
    %154 = arith.mulf %149, %153 : vector<16x128xf32>
    %155 = vector.broadcast %135 : vector<1x128xf32> to vector<16x128xf32>
    %156 = arith.mulf %154, %155 : vector<16x128xf32>
    %157 = vector.broadcast %136 : vector<1x128xf32> to vector<16x128xf32>
    %158 = arith.addf %156, %157 : vector<16x128xf32>
    %c0_69 = arith.constant 0 : index
    %c0_70 = arith.constant 0 : index
    %159 = vector.load %arg15[%c0_69, %c0_70] : memref<1x128xf32, #tpu.memory_space<vmem>>, vector<1x128xf32>
    %c0_71 = arith.constant 0 : index
    %c0_72 = arith.constant 0 : index
    %160 = vector.load %arg16[%c0_71, %c0_72] : memref<1x128xf32, #tpu.memory_space<vmem>>, vector<1x128xf32>
    %cst_73 = arith.constant dense<0.000000e+00> : vector<16xf32>
    %161 = vector.multi_reduction <add>, %158, %cst_73 [1] : vector<16x128xf32> to vector<16xf32>
    %162 = vector.shape_cast %161 : vector<16xf32> to vector<16x1xf32>
    %cst_74 = arith.constant 1.280000e+02 : f32
    %163 = vector.broadcast %cst_74 : f32 to vector<16x1xf32>
    %164 = arith.divf %162, %163 : vector<16x1xf32>
    %165 = vector.broadcast %164 : vector<16x1xf32> to vector<16x128xf32>
    %166 = arith.subf %158, %165 : vector<16x128xf32>
    %167 = arith.mulf %166, %166 : vector<16x128xf32>
    %cst_75 = arith.constant dense<0.000000e+00> : vector<16xf32>
    %168 = vector.multi_reduction <add>, %167, %cst_75 [1] : vector<16x128xf32> to vector<16xf32>
    %169 = vector.shape_cast %168 : vector<16xf32> to vector<16x1xf32>
    %cst_76 = arith.constant 1.280000e+02 : f32
    %170 = vector.broadcast %cst_76 : f32 to vector<16x1xf32>
    %171 = arith.divf %169, %170 : vector<16x1xf32>
    %172 = vector.broadcast %164 : vector<16x1xf32> to vector<16x128xf32>
    %173 = arith.subf %158, %172 : vector<16x128xf32>
    %cst_77 = arith.constant 9.99999974E-6 : f32
    %174 = vector.broadcast %cst_77 : f32 to vector<16x1xf32>
    %175 = arith.addf %171, %174 : vector<16x1xf32>
    %176 = math.rsqrt %175 : vector<16x1xf32>
    %177 = vector.broadcast %176 : vector<16x1xf32> to vector<16x128xf32>
    %178 = arith.mulf %173, %177 : vector<16x128xf32>
    %179 = vector.broadcast %159 : vector<1x128xf32> to vector<16x128xf32>
    %180 = arith.mulf %178, %179 : vector<16x128xf32>
    %181 = vector.broadcast %160 : vector<1x128xf32> to vector<16x128xf32>
    %182 = arith.addf %180, %181 : vector<16x128xf32>
    %c0_78 = arith.constant 0 : index
    %c0_79 = arith.constant 0 : index
    %c0_80 = arith.constant 0 : index
    %183 = vector.load %arg17[%c0_78, %c0_79, %c0_80] : memref<1x16x128xf32, #tpu.memory_space<vmem>>, vector<1x16x128xf32>
    %184 = vector.shape_cast %183 : vector<1x16x128xf32> to vector<16x128xf32>
    %185 = vector.shape_cast %182 : vector<16x128xf32> to vector<1x16x128xf32>
    tpu.vector_store %arg17[%c0_78, %c0_79, %c0_80], %185 {strides = array<i32>} : memref<1x16x128xf32, #tpu.memory_space<vmem>>, vector<1x16x128xf32>,
    return
  }
  func.func @transform_0(%arg0: i32) -> (i32, i32, i32) {
    %c0_i32 = arith.constant 0 : i32
    %c0_i32_0 = arith.constant 0 : i32
    %c0_i32_1 = arith.constant 0 : i32
    return %arg0, %c0_i32, %c0_i32_0 : i32, i32, i32
  }
  func.func @transform_1(%arg0: i32) -> (i32, i32, i32) {
    %c0_i32 = arith.constant 0 : i32
    %c0_i32_0 = arith.constant 0 : i32
    %c0_i32_1 = arith.constant 0 : i32
    return %arg0, %c0_i32, %c0_i32_0 : i32, i32, i32
  }
  func.func @transform_2(%arg0: i32) -> (i32, i32) {
    %c0_i32 = arith.constant 0 : i32
    %c0_i32_0 = arith.constant 0 : i32
    %c0_i32_1 = arith.constant 0 : i32
    return %c0_i32, %c0_i32_0 : i32, i32
  }
  func.func @transform_3(%arg0: i32) -> (i32, i32) {
    %c0_i32 = arith.constant 0 : i32
    %c0_i32_0 = arith.constant 0 : i32
    %c0_i32_1 = arith.constant 0 : i32
    return %c0_i32, %c0_i32_0 : i32, i32
  }
  func.func @transform_4(%arg0: i32) -> (i32, i32) {
    %c0_i32 = arith.constant 0 : i32
    %c0_i32_0 = arith.constant 0 : i32
    %c0_i32_1 = arith.constant 0 : i32
    return %c0_i32, %c0_i32_0 : i32, i32
  }
  func.func @transform_5(%arg0: i32) -> (i32, i32) {
    %c0_i32 = arith.constant 0 : i32
    %c0_i32_0 = arith.constant 0 : i32
    %c0_i32_1 = arith.constant 0 : i32
    return %c0_i32, %c0_i32_0 : i32, i32
  }
  func.func @transform_6(%arg0: i32) -> (i32, i32) {
    %c0_i32 = arith.constant 0 : i32
    %c0_i32_0 = arith.constant 0 : i32
    %c0_i32_1 = arith.constant 0 : i32
    return %c0_i32, %c0_i32_0 : i32, i32
  }
  func.func @transform_7(%arg0: i32) -> (i32, i32) {
    %c0_i32 = arith.constant 0 : i32
    %c0_i32_0 = arith.constant 0 : i32
    %c0_i32_1 = arith.constant 0 : i32
    return %c0_i32, %c0_i32_0 : i32, i32
  }
  func.func @transform_8(%arg0: i32) -> (i32, i32) {
    %c0_i32 = arith.constant 0 : i32
    %c0_i32_0 = arith.constant 0 : i32
    %c0_i32_1 = arith.constant 0 : i32
    return %c0_i32, %c0_i32_0 : i32, i32
  }
  func.func @transform_9(%arg0: i32) -> (i32, i32) {
    %c0_i32 = arith.constant 0 : i32
    %c0_i32_0 = arith.constant 0 : i32
    %c0_i32_1 = arith.constant 0 : i32
    return %c0_i32, %c0_i32_0 : i32, i32
  }
  func.func @transform_10(%arg0: i32) -> (i32, i32) {
    %c0_i32 = arith.constant 0 : i32
    %c0_i32_0 = arith.constant 0 : i32
    %c0_i32_1 = arith.constant 0 : i32
    return %c0_i32, %c0_i32_0 : i32, i32
  }
  func.func @transform_11(%arg0: i32) -> (i32, i32) {
    %c0_i32 = arith.constant 0 : i32
    %c0_i32_0 = arith.constant 0 : i32
    %c0_i32_1 = arith.constant 0 : i32
    return %c0_i32, %c0_i32_0 : i32, i32
  }
  func.func @transform_12(%arg0: i32) -> (i32, i32) {
    %c0_i32 = arith.constant 0 : i32
    %c0_i32_0 = arith.constant 0 : i32
    %c0_i32_1 = arith.constant 0 : i32
    return %c0_i32, %c0_i32_0 : i32, i32
  }
  func.func @transform_13(%arg0: i32) -> (i32, i32) {
    %c0_i32 = arith.constant 0 : i32
    %c0_i32_0 = arith.constant 0 : i32
    %c0_i32_1 = arith.constant 0 : i32
    return %c0_i32, %c0_i32_0 : i32, i32
  }
  func.func @transform_14(%arg0: i32) -> (i32, i32) {
    %c0_i32 = arith.constant 0 : i32
    %c0_i32_0 = arith.constant 0 : i32
    %c0_i32_1 = arith.constant 0 : i32
    return %c0_i32, %c0_i32_0 : i32, i32
  }
  func.func @transform_15(%arg0: i32) -> (i32, i32) {
    %c0_i32 = arith.constant 0 : i32
    %c0_i32_0 = arith.constant 0 : i32
    %c0_i32_1 = arith.constant 0 : i32
    return %c0_i32, %c0_i32_0 : i32, i32
  }
  func.func @transform_16(%arg0: i32) -> (i32, i32, i32) {
    %c0_i32 = arith.constant 0 : i32
    %c0_i32_0 = arith.constant 0 : i32
    %c0_i32_1 = arith.constant 0 : i32
    return %arg0, %c0_i32, %c0_i32_0 : i32, i32, i32
  }
}

module attributes {stable_mosaic.version = 11 : i64} {
  func.func @_encoder_block_kernel(%arg0: i32, %arg1: memref<1x16x128xf32, #tpu.memory_space<vmem>>, %arg2: memref<1x1x16xf32, #tpu.memory_space<vmem>>, %arg3: memref<128x384xbf16, #tpu.memory_space<vmem>>, %arg4: memref<1x384xf32, #tpu.memory_space<vmem>>, %arg5: memref<128x128xbf16, #tpu.memory_space<vmem>>, %arg6: memref<1x128xf32, #tpu.memory_space<vmem>>, %arg7: memref<1x128xf32, #tpu.memory_space<vmem>>, %arg8: memref<1x128xf32, #tpu.memory_space<vmem>>, %arg9: memref<128x256xbf16, #tpu.memory_space<vmem>>, %arg10: memref<1x256xf32, #tpu.memory_space<vmem>>, %arg11: memref<256x128xbf16, #tpu.memory_space<vmem>>, %arg12: memref<1x128xf32, #tpu.memory_space<vmem>>, %arg13: memref<1x128xf32, #tpu.memory_space<vmem>>, %arg14: memref<1x128xf32, #tpu.memory_space<vmem>>, %arg15: memref<1x128xf32, #tpu.memory_space<vmem>>, %arg16: memref<1x128xf32, #tpu.memory_space<vmem>>, %arg17: memref<1x16x128xf32, #tpu.memory_space<vmem>>, %arg18: memref<16x128xf32, #tpu.memory_space<vmem>>) attributes {dimension_semantics = [#tpu.dimension_semantics<parallel>], iteration_bounds = array<i64: 2>, scalar_prefetch = 0 : i64, scratch_operands = 1 : i64, tpu.core_type = #tpu.core_type<tc>, window_params = [{transform_indices = @transform_0, window_bounds = array<i64: 1, 16, 128>}, {transform_indices = @transform_1, window_bounds = array<i64: 1, 1, 16>}, {pipeline_mode = #tpu.pipeline_mode<synchronous>, transform_indices = @transform_2, window_bounds = array<i64: 128, 384>}, {pipeline_mode = #tpu.pipeline_mode<synchronous>, transform_indices = @transform_3, window_bounds = array<i64: 1, 384>}, {pipeline_mode = #tpu.pipeline_mode<synchronous>, transform_indices = @transform_4, window_bounds = array<i64: 128, 128>}, {pipeline_mode = #tpu.pipeline_mode<synchronous>, transform_indices = @transform_5, window_bounds = array<i64: 1, 128>}, {pipeline_mode = #tpu.pipeline_mode<synchronous>, transform_indices = @transform_6, window_bounds = array<i64: 1, 128>}, {pipeline_mode = #tpu.pipeline_mode<synchronous>, transform_indices = @transform_7, window_bounds = array<i64: 1, 128>}, {pipeline_mode = #tpu.pipeline_mode<synchronous>, transform_indices = @transform_8, window_bounds = array<i64: 128, 256>}, {pipeline_mode = #tpu.pipeline_mode<synchronous>, transform_indices = @transform_9, window_bounds = array<i64: 1, 256>}, {pipeline_mode = #tpu.pipeline_mode<synchronous>, transform_indices = @transform_10, window_bounds = array<i64: 256, 128>}, {pipeline_mode = #tpu.pipeline_mode<synchronous>, transform_indices = @transform_11, window_bounds = array<i64: 1, 128>}, {pipeline_mode = #tpu.pipeline_mode<synchronous>, transform_indices = @transform_12, window_bounds = array<i64: 1, 128>}, {pipeline_mode = #tpu.pipeline_mode<synchronous>, transform_indices = @transform_13, window_bounds = array<i64: 1, 128>}, {pipeline_mode = #tpu.pipeline_mode<synchronous>, transform_indices = @transform_14, window_bounds = array<i64: 1, 128>}, {pipeline_mode = #tpu.pipeline_mode<synchronous>, transform_indices = @transform_15, window_bounds = array<i64: 1, 128>}, {transform_indices = @transform_16, window_bounds = array<i64: 1, 16, 128>}]} {
    %c0 = arith.constant 0 : index
    %c0_0 = arith.constant 0 : index
    %c0_1 = arith.constant 0 : index
    %0 = vector.load %arg1[%c0, %c0_0, %c0_1] : memref<1x16x128xf32, #tpu.memory_space<vmem>>, vector<1x16x128xf32>
    %1 = vector.shape_cast %0 : vector<1x16x128xf32> to vector<16x128xf32>
    %2 = arith.truncf %1 : vector<16x128xf32> to vector<16x128xbf16>
    %c0_2 = arith.constant 0 : index
    %c0_3 = arith.constant 0 : index
    %c0_4 = arith.constant 0 : index
    %3 = vector.load %arg2[%c0_2, %c0_3, %c0_4] : memref<1x1x16xf32, #tpu.memory_space<vmem>>, vector<1x1x16xf32>
    %4 = vector.shape_cast %3 : vector<1x1x16xf32> to vector<1x16xf32>
    %cst = arith.constant 5.000000e-01 : f32
    %5 = vector.broadcast %cst : f32 to vector<1x16xf32>
    %6 = arith.cmpf ogt, %4, %5 : vector<1x16xf32>
    %cst_5 = arith.constant 0.000000e+00 : f32
    %cst_6 = arith.constant -1.000000e+09 : f32
    %7 = vector.broadcast %cst_5 : f32 to vector<1x16xf32>
    %8 = vector.broadcast %cst_6 : f32 to vector<1x16xf32>
    %9 = arith.select %6, %7, %8 : vector<1x16xi1>, vector<1x16xf32>
    %c0_7 = arith.constant 0 : index
    %c0_8 = arith.constant 0 : index
    %10 = vector.load %arg3[%c0_7, %c0_8] : memref<128x384xbf16, #tpu.memory_space<vmem>>, vector<128x384xbf16>
    %cst_9 = arith.constant dense<0.000000e+00> : vector<16x384xf32>
    %11 = tpu.matmul %2, %10, %cst_9 {dimension_numbers = #tpu.dot_dimension_numbers<[1], [0], [0], [1], [0, 0, 1, 1], [], []>} : vector<16x128xbf16>, vector<128x384xbf16>, vector<16x384xf32> -> vector<16x384xf32>
    %c0_10 = arith.constant 0 : index
    %c0_11 = arith.constant 0 : index
    %12 = vector.load %arg4[%c0_10, %c0_11] : memref<1x384xf32, #tpu.memory_space<vmem>>, vector<1x384xf32>
    %13 = vector.broadcast %12 : vector<1x384xf32> to vector<16x384xf32>
    %14 = arith.addf %11, %13 : vector<16x384xf32>
    %15 = arith.truncf %14 : vector<16x384xf32> to vector<16x384xbf16>
    %16 = vector.extract_strided_slice %15 {offsets = [0, 0], sizes = [16, 32], strides = [1, 1]} : vector<16x384xbf16> to vector<16x32xbf16>
    %17 = vector.extract_strided_slice %15 {offsets = [0, 128], sizes = [16, 32], strides = [1, 1]} : vector<16x384xbf16> to vector<16x32xbf16>
    %18 = vector.extract_strided_slice %15 {offsets = [0, 256], sizes = [16, 32], strides = [1, 1]} : vector<16x384xbf16> to vector<16x32xbf16>
    %cst_12 = arith.constant dense<0.000000e+00> : vector<16x16xf32>
    %19 = tpu.matmul %16, %17, %cst_12 {dimension_numbers = #tpu.dot_dimension_numbers<[1], [1], [0], [0], [0, 0, 1, 0], [], []>} : vector<16x32xbf16>, vector<16x32xbf16>, vector<16x16xf32> -> vector<16x16xf32>
    %20 = vector.broadcast %9 : vector<1x16xf32> to vector<16x16xf32>
    %21 = arith.addf %19, %20 : vector<16x16xf32>
    %cst_13 = arith.constant dense<0xFF800000> : vector<16xf32>
    %22 = vector.multi_reduction <maximumf>, %21, %cst_13 [1] : vector<16x16xf32> to vector<16xf32>
    %23 = vector.shape_cast %22 : vector<16xf32> to vector<16x1xf32>
    %24 = vector.broadcast %23 : vector<16x1xf32> to vector<16x16xf32>
    %25 = arith.subf %21, %24 : vector<16x16xf32>
    %26 = math.exp %25 : vector<16x16xf32>
    %cst_14 = arith.constant dense<0.000000e+00> : vector<16xf32>
    %27 = vector.multi_reduction <add>, %26, %cst_14 [1] : vector<16x16xf32> to vector<16xf32>
    %28 = vector.shape_cast %27 : vector<16xf32> to vector<16x1xf32>
    %29 = vector.broadcast %28 : vector<16x1xf32> to vector<16x16xf32>
    %30 = arith.divf %26, %29 : vector<16x16xf32>
    %31 = arith.truncf %30 : vector<16x16xf32> to vector<16x16xbf16>
    %cst_15 = arith.constant dense<0.000000e+00> : vector<16x32xf32>
    %32 = tpu.matmul %31, %18, %cst_15 {dimension_numbers = #tpu.dot_dimension_numbers<[1], [0], [0], [1], [0, 0, 1, 1], [], []>} : vector<16x16xbf16>, vector<16x32xbf16>, vector<16x32xf32> -> vector<16x32xf32>
    %c0_16 = arith.constant 0 : index
    %c0_17 = arith.constant 0 : index
    %33 = vector.load %arg18[%c0_16, %c0_17] : memref<16x128xf32, #tpu.memory_space<vmem>>, vector<16x32xf32>
    tpu.vector_store %arg18[%c0_16, %c0_17], %32 {strides = array<i32>} : memref<16x128xf32, #tpu.memory_space<vmem>>, vector<16x32xf32>,
    %34 = vector.extract_strided_slice %15 {offsets = [0, 32], sizes = [16, 32], strides = [1, 1]} : vector<16x384xbf16> to vector<16x32xbf16>
    %35 = vector.extract_strided_slice %15 {offsets = [0, 160], sizes = [16, 32], strides = [1, 1]} : vector<16x384xbf16> to vector<16x32xbf16>
    %36 = vector.extract_strided_slice %15 {offsets = [0, 288], sizes = [16, 32], strides = [1, 1]} : vector<16x384xbf16> to vector<16x32xbf16>
    %cst_18 = arith.constant dense<0.000000e+00> : vector<16x16xf32>
    %37 = tpu.matmul %34, %35, %cst_18 {dimension_numbers = #tpu.dot_dimension_numbers<[1], [1], [0], [0], [0, 0, 1, 0], [], []>} : vector<16x32xbf16>, vector<16x32xbf16>, vector<16x16xf32> -> vector<16x16xf32>
    %38 = vector.broadcast %9 : vector<1x16xf32> to vector<16x16xf32>
    %39 = arith.addf %37, %38 : vector<16x16xf32>
    %cst_19 = arith.constant dense<0xFF800000> : vector<16xf32>
    %40 = vector.multi_reduction <maximumf>, %39, %cst_19 [1] : vector<16x16xf32> to vector<16xf32>
    %41 = vector.shape_cast %40 : vector<16xf32> to vector<16x1xf32>
    %42 = vector.broadcast %41 : vector<16x1xf32> to vector<16x16xf32>
    %43 = arith.subf %39, %42 : vector<16x16xf32>
    %44 = math.exp %43 : vector<16x16xf32>
    %cst_20 = arith.constant dense<0.000000e+00> : vector<16xf32>
    %45 = vector.multi_reduction <add>, %44, %cst_20 [1] : vector<16x16xf32> to vector<16xf32>
    %46 = vector.shape_cast %45 : vector<16xf32> to vector<16x1xf32>
    %47 = vector.broadcast %46 : vector<16x1xf32> to vector<16x16xf32>
    %48 = arith.divf %44, %47 : vector<16x16xf32>
    %49 = arith.truncf %48 : vector<16x16xf32> to vector<16x16xbf16>
    %cst_21 = arith.constant dense<0.000000e+00> : vector<16x32xf32>
    %50 = tpu.matmul %49, %36, %cst_21 {dimension_numbers = #tpu.dot_dimension_numbers<[1], [0], [0], [1], [0, 0, 1, 1], [], []>} : vector<16x16xbf16>, vector<16x32xbf16>, vector<16x32xf32> -> vector<16x32xf32>
    %c0_22 = arith.constant 0 : index
    %c32 = arith.constant 32 : index
    %51 = vector.load %arg18[%c0_22, %c32] : memref<16x128xf32, #tpu.memory_space<vmem>>, vector<16x32xf32>
    tpu.vector_store %arg18[%c0_22, %c32], %50 {strides = array<i32>} : memref<16x128xf32, #tpu.memory_space<vmem>>, vector<16x32xf32>,
    %52 = vector.extract_strided_slice %15 {offsets = [0, 64], sizes = [16, 32], strides = [1, 1]} : vector<16x384xbf16> to vector<16x32xbf16>
    %53 = vector.extract_strided_slice %15 {offsets = [0, 192], sizes = [16, 32], strides = [1, 1]} : vector<16x384xbf16> to vector<16x32xbf16>
    %54 = vector.extract_strided_slice %15 {offsets = [0, 320], sizes = [16, 32], strides = [1, 1]} : vector<16x384xbf16> to vector<16x32xbf16>
    %cst_23 = arith.constant dense<0.000000e+00> : vector<16x16xf32>
    %55 = tpu.matmul %52, %53, %cst_23 {dimension_numbers = #tpu.dot_dimension_numbers<[1], [1], [0], [0], [0, 0, 1, 0], [], []>} : vector<16x32xbf16>, vector<16x32xbf16>, vector<16x16xf32> -> vector<16x16xf32>
    %56 = vector.broadcast %9 : vector<1x16xf32> to vector<16x16xf32>
    %57 = arith.addf %55, %56 : vector<16x16xf32>
    %cst_24 = arith.constant dense<0xFF800000> : vector<16xf32>
    %58 = vector.multi_reduction <maximumf>, %57, %cst_24 [1] : vector<16x16xf32> to vector<16xf32>
    %59 = vector.shape_cast %58 : vector<16xf32> to vector<16x1xf32>
    %60 = vector.broadcast %59 : vector<16x1xf32> to vector<16x16xf32>
    %61 = arith.subf %57, %60 : vector<16x16xf32>
    %62 = math.exp %61 : vector<16x16xf32>
    %cst_25 = arith.constant dense<0.000000e+00> : vector<16xf32>
    %63 = vector.multi_reduction <add>, %62, %cst_25 [1] : vector<16x16xf32> to vector<16xf32>
    %64 = vector.shape_cast %63 : vector<16xf32> to vector<16x1xf32>
    %65 = vector.broadcast %64 : vector<16x1xf32> to vector<16x16xf32>
    %66 = arith.divf %62, %65 : vector<16x16xf32>
    %67 = arith.truncf %66 : vector<16x16xf32> to vector<16x16xbf16>
    %cst_26 = arith.constant dense<0.000000e+00> : vector<16x32xf32>
    %68 = tpu.matmul %67, %54, %cst_26 {dimension_numbers = #tpu.dot_dimension_numbers<[1], [0], [0], [1], [0, 0, 1, 1], [], []>} : vector<16x16xbf16>, vector<16x32xbf16>, vector<16x32xf32> -> vector<16x32xf32>
    %c0_27 = arith.constant 0 : index
    %c64 = arith.constant 64 : index
    %69 = vector.load %arg18[%c0_27, %c64] : memref<16x128xf32, #tpu.memory_space<vmem>>, vector<16x32xf32>
    tpu.vector_store %arg18[%c0_27, %c64], %68 {strides = array<i32>} : memref<16x128xf32, #tpu.memory_space<vmem>>, vector<16x32xf32>,
    %70 = vector.extract_strided_slice %15 {offsets = [0, 96], sizes = [16, 32], strides = [1, 1]} : vector<16x384xbf16> to vector<16x32xbf16>
    %71 = vector.extract_strided_slice %15 {offsets = [0, 224], sizes = [16, 32], strides = [1, 1]} : vector<16x384xbf16> to vector<16x32xbf16>
    %72 = vector.extract_strided_slice %15 {offsets = [0, 352], sizes = [16, 32], strides = [1, 1]} : vector<16x384xbf16> to vector<16x32xbf16>
    %cst_28 = arith.constant dense<0.000000e+00> : vector<16x16xf32>
    %73 = tpu.matmul %70, %71, %cst_28 {dimension_numbers = #tpu.dot_dimension_numbers<[1], [1], [0], [0], [0, 0, 1, 0], [], []>} : vector<16x32xbf16>, vector<16x32xbf16>, vector<16x16xf32> -> vector<16x16xf32>
    %74 = vector.broadcast %9 : vector<1x16xf32> to vector<16x16xf32>
    %75 = arith.addf %73, %74 : vector<16x16xf32>
    %cst_29 = arith.constant dense<0xFF800000> : vector<16xf32>
    %76 = vector.multi_reduction <maximumf>, %75, %cst_29 [1] : vector<16x16xf32> to vector<16xf32>
    %77 = vector.shape_cast %76 : vector<16xf32> to vector<16x1xf32>
    %78 = vector.broadcast %77 : vector<16x1xf32> to vector<16x16xf32>
    %79 = arith.subf %75, %78 : vector<16x16xf32>
    %80 = math.exp %79 : vector<16x16xf32>
    %cst_30 = arith.constant dense<0.000000e+00> : vector<16xf32>
    %81 = vector.multi_reduction <add>, %80, %cst_30 [1] : vector<16x16xf32> to vector<16xf32>
    %82 = vector.shape_cast %81 : vector<16xf32> to vector<16x1xf32>
    %83 = vector.broadcast %82 : vector<16x1xf32> to vector<16x16xf32>
    %84 = arith.divf %80, %83 : vector<16x16xf32>
    %85 = arith.truncf %84 : vector<16x16xf32> to vector<16x16xbf16>
    %cst_31 = arith.constant dense<0.000000e+00> : vector<16x32xf32>
    %86 = tpu.matmul %85, %72, %cst_31 {dimension_numbers = #tpu.dot_dimension_numbers<[1], [0], [0], [1], [0, 0, 1, 1], [], []>} : vector<16x16xbf16>, vector<16x32xbf16>, vector<16x32xf32> -> vector<16x32xf32>
    %c0_32 = arith.constant 0 : index
    %c96 = arith.constant 96 : index
    %87 = vector.load %arg18[%c0_32, %c96] : memref<16x128xf32, #tpu.memory_space<vmem>>, vector<16x32xf32>
    tpu.vector_store %arg18[%c0_32, %c96], %86 {strides = array<i32>} : memref<16x128xf32, #tpu.memory_space<vmem>>, vector<16x32xf32>,
    %c0_33 = arith.constant 0 : index
    %c0_34 = arith.constant 0 : index
    %88 = vector.load %arg18[%c0_33, %c0_34] : memref<16x128xf32, #tpu.memory_space<vmem>>, vector<16x128xf32>
    %89 = arith.truncf %88 : vector<16x128xf32> to vector<16x128xbf16>
    %c0_35 = arith.constant 0 : index
    %c0_36 = arith.constant 0 : index
    %90 = vector.load %arg5[%c0_35, %c0_36] : memref<128x128xbf16, #tpu.memory_space<vmem>>, vector<128x128xbf16>
    %cst_37 = arith.constant dense<0.000000e+00> : vector<16x128xf32>
    %91 = tpu.matmul %89, %90, %cst_37 {dimension_numbers = #tpu.dot_dimension_numbers<[1], [0], [0], [1], [0, 0, 1, 1], [], []>} : vector<16x128xbf16>, vector<128x128xbf16>, vector<16x128xf32> -> vector<16x128xf32>
    %c0_38 = arith.constant 0 : index
    %c0_39 = arith.constant 0 : index
    %92 = vector.load %arg6[%c0_38, %c0_39] : memref<1x128xf32, #tpu.memory_space<vmem>>, vector<1x128xf32>
    %93 = vector.broadcast %92 : vector<1x128xf32> to vector<16x128xf32>
    %94 = arith.addf %91, %93 : vector<16x128xf32>
    %95 = arith.addf %1, %94 : vector<16x128xf32>
    %c0_40 = arith.constant 0 : index
    %c0_41 = arith.constant 0 : index
    %96 = vector.load %arg7[%c0_40, %c0_41] : memref<1x128xf32, #tpu.memory_space<vmem>>, vector<1x128xf32>
    %c0_42 = arith.constant 0 : index
    %c0_43 = arith.constant 0 : index
    %97 = vector.load %arg8[%c0_42, %c0_43] : memref<1x128xf32, #tpu.memory_space<vmem>>, vector<1x128xf32>
    %cst_44 = arith.constant dense<0.000000e+00> : vector<16xf32>
    %98 = vector.multi_reduction <add>, %95, %cst_44 [1] : vector<16x128xf32> to vector<16xf32>
    %99 = vector.shape_cast %98 : vector<16xf32> to vector<16x1xf32>
    %cst_45 = arith.constant 1.280000e+02 : f32
    %100 = vector.broadcast %cst_45 : f32 to vector<16x1xf32>
    %101 = arith.divf %99, %100 : vector<16x1xf32>
    %102 = vector.broadcast %101 : vector<16x1xf32> to vector<16x128xf32>
    %103 = arith.subf %95, %102 : vector<16x128xf32>
    %104 = arith.mulf %103, %103 : vector<16x128xf32>
    %cst_46 = arith.constant dense<0.000000e+00> : vector<16xf32>
    %105 = vector.multi_reduction <add>, %104, %cst_46 [1] : vector<16x128xf32> to vector<16xf32>
    %106 = vector.shape_cast %105 : vector<16xf32> to vector<16x1xf32>
    %cst_47 = arith.constant 1.280000e+02 : f32
    %107 = vector.broadcast %cst_47 : f32 to vector<16x1xf32>
    %108 = arith.divf %106, %107 : vector<16x1xf32>
    %109 = vector.broadcast %101 : vector<16x1xf32> to vector<16x128xf32>
    %110 = arith.subf %95, %109 : vector<16x128xf32>
    %cst_48 = arith.constant 9.99999974E-6 : f32
    %111 = vector.broadcast %cst_48 : f32 to vector<16x1xf32>
    %112 = arith.addf %108, %111 : vector<16x1xf32>
    %113 = math.rsqrt %112 : vector<16x1xf32>
    %114 = vector.broadcast %113 : vector<16x1xf32> to vector<16x128xf32>
    %115 = arith.mulf %110, %114 : vector<16x128xf32>
    %116 = vector.broadcast %96 : vector<1x128xf32> to vector<16x128xf32>
    %117 = arith.mulf %115, %116 : vector<16x128xf32>
    %118 = vector.broadcast %97 : vector<1x128xf32> to vector<16x128xf32>
    %119 = arith.addf %117, %118 : vector<16x128xf32>
    %120 = arith.truncf %119 : vector<16x128xf32> to vector<16x128xbf16>
    %c0_49 = arith.constant 0 : index
    %c0_50 = arith.constant 0 : index
    %121 = vector.load %arg9[%c0_49, %c0_50] : memref<128x256xbf16, #tpu.memory_space<vmem>>, vector<128x256xbf16>
    %cst_51 = arith.constant dense<0.000000e+00> : vector<16x256xf32>
    %122 = tpu.matmul %120, %121, %cst_51 {dimension_numbers = #tpu.dot_dimension_numbers<[1], [0], [0], [1], [0, 0, 1, 1], [], []>} : vector<16x128xbf16>, vector<128x256xbf16>, vector<16x256xf32> -> vector<16x256xf32>
    %c0_52 = arith.constant 0 : index
    %c0_53 = arith.constant 0 : index
    %123 = vector.load %arg10[%c0_52, %c0_53] : memref<1x256xf32, #tpu.memory_space<vmem>>, vector<1x256xf32>
    %124 = vector.broadcast %123 : vector<1x256xf32> to vector<16x256xf32>
    %125 = arith.addf %122, %124 : vector<16x256xf32>
    %cst_54 = arith.constant 0.000000e+00 : f32
    %126 = vector.broadcast %cst_54 : f32 to vector<16x256xf32>
    %127 = arith.maximumf %125, %126 : vector<16x256xf32>
    %128 = arith.truncf %127 : vector<16x256xf32> to vector<16x256xbf16>
    %c0_55 = arith.constant 0 : index
    %c0_56 = arith.constant 0 : index
    %129 = vector.load %arg11[%c0_55, %c0_56] : memref<256x128xbf16, #tpu.memory_space<vmem>>, vector<256x128xbf16>
    %cst_57 = arith.constant dense<0.000000e+00> : vector<16x128xf32>
    %130 = tpu.matmul %128, %129, %cst_57 {dimension_numbers = #tpu.dot_dimension_numbers<[1], [0], [0], [1], [0, 0, 1, 1], [], []>} : vector<16x256xbf16>, vector<256x128xbf16>, vector<16x128xf32> -> vector<16x128xf32>
    %c0_58 = arith.constant 0 : index
    %c0_59 = arith.constant 0 : index
    %131 = vector.load %arg12[%c0_58, %c0_59] : memref<1x128xf32, #tpu.memory_space<vmem>>, vector<1x128xf32>
    %132 = vector.broadcast %131 : vector<1x128xf32> to vector<16x128xf32>
    %133 = arith.addf %130, %132 : vector<16x128xf32>
    %134 = arith.addf %119, %133 : vector<16x128xf32>
    %c0_60 = arith.constant 0 : index
    %c0_61 = arith.constant 0 : index
    %135 = vector.load %arg13[%c0_60, %c0_61] : memref<1x128xf32, #tpu.memory_space<vmem>>, vector<1x128xf32>
    %c0_62 = arith.constant 0 : index
    %c0_63 = arith.constant 0 : index
    %136 = vector.load %arg14[%c0_62, %c0_63] : memref<1x128xf32, #tpu.memory_space<vmem>>, vector<1x128xf32>
    %cst_64 = arith.constant dense<0.000000e+00> : vector<16xf32>
    %137 = vector.multi_reduction <add>, %134, %cst_64 [1] : vector<16x128xf32> to vector<16xf32>
    %138 = vector.shape_cast %137 : vector<16xf32> to vector<16x1xf32>
    %cst_65 = arith.constant 1.280000e+02 : f32
    %139 = vector.broadcast %cst_65 : f32 to vector<16x1xf32>
    %140 = arith.divf %138, %139 : vector<16x1xf32>
    %141 = vector.broadcast %140 : vector<16x1xf32> to vector<16x128xf32>
    %142 = arith.subf %134, %141 : vector<16x128xf32>
    %143 = arith.mulf %142, %142 : vector<16x128xf32>
    %cst_66 = arith.constant dense<0.000000e+00> : vector<16xf32>
    %144 = vector.multi_reduction <add>, %143, %cst_66 [1] : vector<16x128xf32> to vector<16xf32>
    %145 = vector.shape_cast %144 : vector<16xf32> to vector<16x1xf32>
    %cst_67 = arith.constant 1.280000e+02 : f32
    %146 = vector.broadcast %cst_67 : f32 to vector<16x1xf32>
    %147 = arith.divf %145, %146 : vector<16x1xf32>
    %148 = vector.broadcast %140 : vector<16x1xf32> to vector<16x128xf32>
    %149 = arith.subf %134, %148 : vector<16x128xf32>
    %cst_68 = arith.constant 9.99999974E-6 : f32
    %150 = vector.broadcast %cst_68 : f32 to vector<16x1xf32>
    %151 = arith.addf %147, %150 : vector<16x1xf32>
    %152 = math.rsqrt %151 : vector<16x1xf32>
    %153 = vector.broadcast %152 : vector<16x1xf32> to vector<16x128xf32>
    %154 = arith.mulf %149, %153 : vector<16x128xf32>
    %155 = vector.broadcast %135 : vector<1x128xf32> to vector<16x128xf32>
    %156 = arith.mulf %154, %155 : vector<16x128xf32>
    %157 = vector.broadcast %136 : vector<1x128xf32> to vector<16x128xf32>
    %158 = arith.addf %156, %157 : vector<16x128xf32>
    %c0_69 = arith.constant 0 : index
    %c0_70 = arith.constant 0 : index
    %c0_71 = arith.constant 0 : index
    %159 = vector.load %arg17[%c0_69, %c0_70, %c0_71] : memref<1x16x128xf32, #tpu.memory_space<vmem>>, vector<1x16x128xf32>
    %160 = vector.shape_cast %159 : vector<1x16x128xf32> to vector<16x128xf32>
    %161 = vector.shape_cast %158 : vector<16x128xf32> to vector<1x16x128xf32>
    tpu.vector_store %arg17[%c0_69, %c0_70, %c0_71], %161 {strides = array<i32>} : memref<1x16x128xf32, #tpu.memory_space<vmem>>, vector<1x16x128xf32>,
    return
  }
  func.func @transform_0(%arg0: i32) -> (i32, i32, i32) {
    %c0_i32 = arith.constant 0 : i32
    %c0_i32_0 = arith.constant 0 : i32
    %c0_i32_1 = arith.constant 0 : i32
    return %arg0, %c0_i32, %c0_i32_0 : i32, i32, i32
  }
  func.func @transform_1(%arg0: i32) -> (i32, i32, i32) {
    %c0_i32 = arith.constant 0 : i32
    %c0_i32_0 = arith.constant 0 : i32
    %c0_i32_1 = arith.constant 0 : i32
    return %arg0, %c0_i32, %c0_i32_0 : i32, i32, i32
  }
  func.func @transform_2(%arg0: i32) -> (i32, i32) {
    %c0_i32 = arith.constant 0 : i32
    %c0_i32_0 = arith.constant 0 : i32
    %c0_i32_1 = arith.constant 0 : i32
    return %c0_i32, %c0_i32_0 : i32, i32
  }
  func.func @transform_3(%arg0: i32) -> (i32, i32) {
    %c0_i32 = arith.constant 0 : i32
    %c0_i32_0 = arith.constant 0 : i32
    %c0_i32_1 = arith.constant 0 : i32
    return %c0_i32, %c0_i32_0 : i32, i32
  }
  func.func @transform_4(%arg0: i32) -> (i32, i32) {
    %c0_i32 = arith.constant 0 : i32
    %c0_i32_0 = arith.constant 0 : i32
    %c0_i32_1 = arith.constant 0 : i32
    return %c0_i32, %c0_i32_0 : i32, i32
  }
  func.func @transform_5(%arg0: i32) -> (i32, i32) {
    %c0_i32 = arith.constant 0 : i32
    %c0_i32_0 = arith.constant 0 : i32
    %c0_i32_1 = arith.constant 0 : i32
    return %c0_i32, %c0_i32_0 : i32, i32
  }
  func.func @transform_6(%arg0: i32) -> (i32, i32) {
    %c0_i32 = arith.constant 0 : i32
    %c0_i32_0 = arith.constant 0 : i32
    %c0_i32_1 = arith.constant 0 : i32
    return %c0_i32, %c0_i32_0 : i32, i32
  }
  func.func @transform_7(%arg0: i32) -> (i32, i32) {
    %c0_i32 = arith.constant 0 : i32
    %c0_i32_0 = arith.constant 0 : i32
    %c0_i32_1 = arith.constant 0 : i32
    return %c0_i32, %c0_i32_0 : i32, i32
  }
  func.func @transform_8(%arg0: i32) -> (i32, i32) {
    %c0_i32 = arith.constant 0 : i32
    %c0_i32_0 = arith.constant 0 : i32
    %c0_i32_1 = arith.constant 0 : i32
    return %c0_i32, %c0_i32_0 : i32, i32
  }
  func.func @transform_9(%arg0: i32) -> (i32, i32) {
    %c0_i32 = arith.constant 0 : i32
    %c0_i32_0 = arith.constant 0 : i32
    %c0_i32_1 = arith.constant 0 : i32
    return %c0_i32, %c0_i32_0 : i32, i32
  }
  func.func @transform_10(%arg0: i32) -> (i32, i32) {
    %c0_i32 = arith.constant 0 : i32
    %c0_i32_0 = arith.constant 0 : i32
    %c0_i32_1 = arith.constant 0 : i32
    return %c0_i32, %c0_i32_0 : i32, i32
  }
  func.func @transform_11(%arg0: i32) -> (i32, i32) {
    %c0_i32 = arith.constant 0 : i32
    %c0_i32_0 = arith.constant 0 : i32
    %c0_i32_1 = arith.constant 0 : i32
    return %c0_i32, %c0_i32_0 : i32, i32
  }
  func.func @transform_12(%arg0: i32) -> (i32, i32) {
    %c0_i32 = arith.constant 0 : i32
    %c0_i32_0 = arith.constant 0 : i32
    %c0_i32_1 = arith.constant 0 : i32
    return %c0_i32, %c0_i32_0 : i32, i32
  }
  func.func @transform_13(%arg0: i32) -> (i32, i32) {
    %c0_i32 = arith.constant 0 : i32
    %c0_i32_0 = arith.constant 0 : i32
    %c0_i32_1 = arith.constant 0 : i32
    return %c0_i32, %c0_i32_0 : i32, i32
  }
  func.func @transform_14(%arg0: i32) -> (i32, i32) {
    %c0_i32 = arith.constant 0 : i32
    %c0_i32_0 = arith.constant 0 : i32
    %c0_i32_1 = arith.constant 0 : i32
    return %c0_i32, %c0_i32_0 : i32, i32
  }
  func.func @transform_15(%arg0: i32) -> (i32, i32) {
    %c0_i32 = arith.constant 0 : i32
    %c0_i32_0 = arith.constant 0 : i32
    %c0_i32_1 = arith.constant 0 : i32
    return %c0_i32, %c0_i32_0 : i32, i32
  }
  func.func @transform_16(%arg0: i32) -> (i32, i32, i32) {
    %c0_i32 = arith.constant 0 : i32
    %c0_i32_0 = arith.constant 0 : i32
    %c0_i32_1 = arith.constant 0 : i32
    return %arg0, %c0_i32, %c0_i32_0 : i32, i32, i32
  }
}

</mosaic_0001>

<bundles_post_ra>
// kernel: encoder_forward.3
= control target key start
LH: loop header
LB: loop body
LE: loop exit
PB: predicated region body
PF: predicated region fallthrough
CT: control target
= control target key end

     0   :  { %s3024_s0 = inlined_call_operand.vmem [shape: f32[2,16,128], index: 0, kind: input, shape index: {}]   ;;  %s3025_s1 = inlined_call_operand.vmem [shape: f32[2,1,16], index: 1, kind: input, shape index: {}]   ;;  %s3026_s2 = inlined_call_operand.vmem [shape: bf16[128,384], index: 2, kind: input, shape index: {}]   ;;  %s3027_s3 = inlined_call_operand.vmem [shape: f32[1,384], index: 3, kind: input, shape index: {}]   ;;  %s3028_s4 = inlined_call_operand.vmem [shape: bf16[128,128], index: 4, kind: input, shape index: {}]   ;;  %s3029_s5 = inlined_call_operand.vmem [shape: f32[1,128], index: 5, kind: input, shape index: {}]   ;;  %s3030_s6 = inlined_call_operand.vmem [shape: f32[1,128], index: 6, kind: input, shape index: {}]   ;;  %s3031_s7 = inlined_call_operand.vmem [shape: f32[1,128], index: 7, kind: input, shape index: {}]   ;;  %s3032_s8 = inlined_call_operand.vmem [shape: bf16[128,256], index: 8, kind: input, shape index: {}]   ;;  %s3033_s9 = inlined_call_operand.vmem [shape: f32[1,256], index: 9, kind: input, shape index: {}]   ;;  %s3034_s10 = inlined_call_operand.vmem [shape: bf16[256,128], index: 10, kind: input, shape index: {}]   ;;  %s3035_s11 = inlined_call_operand.vmem [shape: f32[1,128], index: 11, kind: input, shape index: {}]   ;;  %s3036_s12 = inlined_call_operand.vmem [shape: f32[1,128], index: 12, kind: input, shape index: {}]   ;;  %s3037_s13 = inlined_call_operand.vmem [shape: f32[1,128], index: 13, kind: input, shape index: {}]   ;;  %s3038_s14 = inlined_call_operand.vmem [shape: f32[1,128], index: 14, kind: input, shape index: {}]   ;;  %s3039_s15 = inlined_call_operand.vmem [shape: f32[1,128], index: 15, kind: input, shape index: {}]   ;;  %s3040_s16 = inlined_call_operand.hbm [shape: f32[2,16,128], index: 16, kind: output, shape index: {}]  }
   0x1   :  { %3048 = sst [smem:[#allocation12_spill]] %s3024_s0 }
   0x2   :  { %3049 = sst [smem:[#allocation13_spill]] %s3025_s1 }
   0x3   :  { %3050 = sst [smem:[#allocation14_spill]] %s3040_s16 }
   0x4   :  { %21 = vsyncpa [#allocation4], 0 }
   0x5   :  { %23 = vsyncpa [#allocation4 + $0x1], 0  ;;  %s2558_s21 = smov 0   ;;  %s2560_s22 = smov 0  }
   0x6   :  { %s2562_s23 = smov 0   ;;  %s2564_s24 = smov 0  }
   0x7 LB: > { %3051 = sst [smem:[#allocation6_spill]] %s2449_s21  ;;  %s2579_s25 = sadd.s32 4294967295, %s2461_s24   ;;  %s2461_s24 = sphi %s2564_s24, %s3066_s24   ;;  %s2457_s23 = sphi %s2562_s23, %s3068_s23   ;;  %s2453_s22 = sphi %s2560_s22, %s3070_s22   ;;  %s2449_s21 = sphi %s2558_s21, %s3069_s21  }
   0x8   : > { %3052 = sst [smem:[#allocation7_spill]] %s2457_s23  ;;  %s1989_s26 = sadd.s32 4294967294, %s2461_s24  }
   0x9   : > { %3053 = sst [smem:[#allocation8_spill]] %s2461_s24  ;;  %s2583_s27 = sadd.s32 1, %s2461_s24  }
   0xa   : > { %3054 = sst [smem:[#allocation9_spill]] %s2583_s27  ;;  %s382_s28 = sadd.s32 1, %s2457_s23 }
   0xb   : > { %s379_s29 = ssub.s32 %s2461_s24, %s2583_s27  ;;  %p392_p0 = scmp.ne.s32.totalorder %s2457_s23, %s2453_s22 }
   0xc   : > { %p380_p1 = scmp.eq.s32.totalorder %s379_s29, 0  ;;  %p393_p2 = scmp.eq.s32.totalorder %s2579_s25, 1 }
   0xd   : > { %p398_p3 = scmp.ne.s32.totalorder %s2453_s22, %s2449_s21  ;;  %p399_p4 = scmp.eq.s32.totalorder %s1989_s26, 1 }
   0xe   : > { %s2594_s30 = scalar_select %p380_p1, %s2457_s23, %s382_s28  }
   0xf   : > { %p2596_p5 = por %p393_p2, %p392_p0  ;;  %p2600_p6 = por %p399_p4, %p398_p3 }
  0x10   : > { %3055 = sst [smem:[#allocation10_spill]] %s2594_s30  ;;  %p1992_p7 = scmp.ge.s32.totalorder %s2461_s24, 1 }
  0x11   : > { %s3057_s17 = scalar_select %p2600_p6, 1, 0 }
  0x12   : > { %p473_p8 = scmp.lt.s32.totalorder %s2461_s24, 3 }
  0x13   : > { %3058 = sst [smem:[#allocation11_spill]] %s3057_s17 }
  0x14   : > { %p474_p9 = pnand %p1992_p7, %p473_p8 }
  0x15   : > { %v2275_v0 = vld [vmem:[%s3026_s2 + $0x4] ss:$12 sps:$4 sm:$0xff] (!%p474_p9)   ;;  %v2277_v1 = vld [vmem:[%s3026_s2] ss:$12 sps:$4 sm:$0xff] (!%p474_p9)   ;;  %v2463_v2 = vmov (!%p474_p9), 0   ;;  %v2464_v6 = vmov (!%p474_p9), 0.0   ;;  %v575_v29 = vlaneseq (!%p474_p9) }
  0x16   : > { %477 = sbr.rel (%p474_p9) target bundleno = 3338 (0xd0a), region = 84  ;;  %750 = vmatprep.mubr.bf16.mxu0 (!%p474_p9), %v2463_v2  ;;  %718 = vmatprep.subr.bf16.mxu0 (!%p474_p9), %v2275_v0  ;;  %v2278_v3 = vld [vmem:[%s3026_s2 + $0x1c] ss:$12 sps:$4 sm:$0xff] (!%p474_p9)   ;;  %v2280_v4 = vld [vmem:[%s3026_s2 + $0x18] ss:$12 sps:$4 sm:$0xff] (!%p474_p9)   ;;  %p526_p10 = scmp.lt.s32.totalorder (!%p474_p9), %s2579_s25, 1 }
  0x17   : > { %719 = vmatpush1.bf16.msra.mxu0 (!%p474_p9), %v2277_v1  ;;  %v2281_v5 = vld [vmem:[%s3026_s2 + $0x34] ss:$12 sps:$4 sm:$0xff] (!%p474_p9)   ;;  %2139 = vmatprep.subr.bf16.mxu1 (!%p474_p9), %v2464_v6  ;;  %v2283_v7 = vld [vmem:[%s3026_s2 + $0x30] ss:$12 sps:$4 sm:$0xff] (!%p474_p9)   ;;  %v2284_v8 = vld [vmem:[%s3026_s2 + $0x4c] ss:$12 sps:$4 sm:$0xff] (!%p474_p9)  }
  0x18   : > { %720 = vmatprep.subr.bf16.mxu0 (!%p474_p9), %v2278_v3  ;;  %v2286_v9 = vld [vmem:[%s3026_s2 + $0x48] ss:$12 sps:$4 sm:$0xff] (!%p474_p9)   ;;  %v2287_v10 = vld [vmem:[%s3026_s2 + $0x64] ss:$12 sps:$4 sm:$0xff] (!%p474_p9)   ;;  %v2300_v12 = vld [vmem:[%s3026_s2 + $0x20] ss:$12 sps:$4 sm:$0xff] (!%p474_p9)  }
  0x19   : > { %v2299_v11 = vld [vmem:[%s3026_s2 + $0x8] ss:$12 sps:$4 sm:$0xff] (!%p474_p9)   ;;  %v2289_v13 = vld [vmem:[%s3026_s2 + $0x60] ss:$12 sps:$4 sm:$0xff] (!%p474_p9)   ;;  %v2301_v15 = vld [vmem:[%s3026_s2 + $0x38] ss:$12 sps:$4 sm:$0xff] (!%p474_p9)  }
  0x1a   : > { %2140 = vmatpush3.bf16.msra.mxu1 (!%p474_p9), %v2299_v11  ;;  %v2290_v14 = vld [vmem:[%s3026_s2 + $0x7c] ss:$12 sps:$4 sm:$0xff] (!%p474_p9)   ;;  %v2292_v16 = vld [vmem:[%s3026_s2 + $0x78] ss:$12 sps:$4 sm:$0xff] (!%p474_p9)   ;;  %v2293_v17 = vld [vmem:[%s3026_s2 + $0x94] ss:$12 sps:$4 sm:$0xff] (!%p474_p9)  }
  0x1b   : > { %721 = vmatpush1.bf16.msra.mxu0 (!%p474_p9), %v2280_v4  ;;  %2141 = vmatprep.subr.bf16.mxu1 (!%p474_p9), %v2464_v6  ;;  %v2302_v18 = vld [vmem:[%s3026_s2 + $0x50] ss:$12 sps:$4 sm:$0xff] (!%p474_p9)   ;;  %v2296_v20 = vld [vmem:[%s3026_s2 + $0xac] ss:$12 sps:$4 sm:$0xff] (!%p474_p9)   ;;  %s3059_s16 = sld [smem:[#allocation12_spill]] (!%p474_p9)  ;;  %vm2465_vm0 = vmmov (!%p474_p9), 0  }
  0x1c   : > { %722 = vmatprep.subr.bf16.mxu0 (!%p474_p9), %v2281_v5  ;;  %v2295_v19 = vld [vmem:[%s3026_s2 + $0x90] ss:$12 sps:$4 sm:$0xff] (!%p474_p9)   ;;  %v2303_v21 = vld [vmem:[%s3026_s2 + $0x68] ss:$12 sps:$4 sm:$0xff] (!%p474_p9)   ;;  %v2304_v25 = vld [vmem:[%s3026_s2 + $0x80] ss:$12 sps:$4 sm:$0xff] (!%p474_p9)   ;;  %2155 = vmatprep.mubr.msk.bf16.mxu1 (!%p474_p9), %vm2465_vm0, %v2464_v6 }
  0x1d   : > { %s2640_s20 = scalar_select %p526_p10, %s2579_s25, 1  ;;  %v2298_v22 = vld [vmem:[%s3026_s2 + $0xa8] ss:$12 sps:$4 sm:$0xff]   ;;  %v2305_v27 = vld [vmem:[%s3026_s2 + $0x98] ss:$12 sps:$4 sm:$0xff]   ;;  %v2709_v30 = vshrl.u32 %v575_v29, 7 }
  0x1e   : > { %2142 = vmatpush3.bf16.msra.mxu1 %v2300_v12  ;;  %v2306_v28 = vld [vmem:[%s3026_s2 + $0xb0] ss:$12 sps:$4 sm:$0xff]   ;;  %v573_v32 = vld [vmem:[%s3027_s3] sm:$0x7]  ;;  %vm811_vm1 = vcmask 261120   ;;  %s3060_s1 = sld [smem:[#allocation13_spill]] }
  0x1f   : > { %723 = vmatpush1.bf16.msra.mxu0 %v2283_v7  ;;  %s2081_s27 = sshll.u32 %s2640_s20, 4  ;;  %2143 = vmatprep.subr.bf16.mxu1 %v2464_v6  ;;  %v2712_v31 = vsub.s32 0, %v2709_v30  ;;  %v581_v33 = vsub.s32 1, %v2709_v30  ;;  %v585_v47 = vsub.s32 2, %v2709_v30  ;;  %v2466_v57 = vmov -1e+09  }
  0x20   : > { %724 = vmatprep.subr.bf16.mxu0 %v2284_v8  ;;  %vm859_vm3 = vcmask 130048   ;;  %s2468_s21 = smov 32   ;;  %vm1061_vm4 = vcmask 523520   ;;  %vm1193_vm5 = vcmask 785920   ;;  %vm1325_vm6 = vcmask 1048320  }
  0x21   : > { %s530_s29 = scalar_lea.vmem %s3059_s16, %s2081_s27  ;;  %v578_v34 = vrot.slane %v573_v32, %v2712_v31  ;;  %v582_v36 = vrot.slane %v573_v32, %v581_v33  ;;  %v586_v48 = vrot.slane %v573_v32, %v585_v47  ;;  %s2469_s16 = smov 64   ;;  %v2055_v30 = vld [vmem:[%s3035_s11] ss:$0 sm:$0xff] }
  0x22   : > { %2144 = vmatpush3.bf16.msra.mxu1 %v2301_v15  ;;  %v2682_v23 = vld [vmem:[%s530_s29] sm:$0xff]  ;;  %v2684_v24 = vld [vmem:[%s530_s29 + $0x8] sm:$0xff] }
  0x23   : > { %725 = vmatpush1.bf16.msra.mxu0 %v2286_v9  ;;  %2145 = vmatprep.subr.bf16.mxu1 %v2464_v6  ;;  %v537_v26 = vpack.c.bf16 %v2684_v24, %v2682_v23 }
  0x24   : > { %726 = vmatprep.subr.bf16.mxu0 %v2287_v10  ;;  %s533_s18 = scalar_lea.vmem %s3060_s1, %s2640_s20  ;;  %s2467_s20 = smov 96  }
  0x25   : > { %v538_v56 = vld [vmem:[%s533_s18] sm:$0x1]  ;;  %s2082_s18 = sshll.u32 %s2579_s25, 8 }
  0x26   : > { %2146 = vmatpush3.bf16.msra.mxu1 %v2302_v18  ;;  %vm539_vm2 = vcmp.gt.f32.partialorder %v538_v56, 0.5 }
  0x27   : > { %727 = vmatpush1.bf16.msra.mxu0 %v2289_v13  ;;  %2147 = vmatprep.subr.bf16.mxu1 %v2464_v6  ;;  %v540_v58 = vsel %vm539_vm2, 0.0, %v2466_v57 }
  0x28   : > { %728 = vmatprep.subr.bf16.mxu0 %v2290_v14  ;;  %v2736_v59 = vrot.slane %v540_v58, %v2712_v31 }
  0x2a   : > { %2148 = vmatpush3.bf16.msra.mxu1 %v2303_v21 }
  0x2b   : > { %729 = vmatpush1.bf16.msra.mxu0 %v2292_v16  ;;  %2149 = vmatprep.subr.bf16.mxu1 %v2464_v6 }
  0x2c   : > { %730 = vmatprep.subr.bf16.mxu0 %v2293_v17 }
  0x2e   : > { %2150 = vmatpush3.bf16.msra.mxu1 %v2304_v25 }
  0x2f   : > { %731 = vmatpush1.bf16.msra.mxu0 %v2295_v19  ;;  %2151 = vmatprep.subr.bf16.mxu1 %v2464_v6 }
  0x30   : > { %732 = vmatprep.subr.bf16.mxu0 %v2296_v20 }
  0x32   : > { %2152 = vmatpush3.bf16.msra.mxu1 %v2305_v27 }
  0x33   : > { %733 = vmatpush1.bf16.msra.mxu0 %v2298_v22  ;;  %2153 = vmatprep.subr.bf16.mxu1 %v2464_v6 }
  0x34   : > { %2183 = vmatprep.subr.bf16.mxu0 %v2464_v6 }
  0x36   : > { %751 = vmatmul.mubr.bf16.vlgmr.msra.gmra.mrb[0].mxu0 %v537_v26  ;;  %2154 = vmatpush3.bf16.msra.mxu1 %v2306_v28 }
  0x37   : > { %2159 = vmatprep.subr.bf16.mxu1 %v2464_v6  ;;  %2185 = vmatprep.mubr.msk.bf16.mxu0 %vm2465_vm0, %v2464_v6 }
  0x39   : > { %2156 = vmatmul.mubr.bf16.vlgmr.msra.gmra.mrb[0].mxu1 %v537_v26 }
  0x3a   : > { %2161 = vmatprep.mubr.msk.bf16.mxu1 %vm2465_vm0, %v2464_v6 }
 0x109   : > { %v752_v35 = vpop.f32.mrb[0].mxu0 }
 0x10a   : > { %v754_v37 = vpop.f32.mrb[1].mxu0  ;;  %v753_v39 = vadd.f32 %v752_v35, %v578_v34 }
 0x10b   : > { %v756_v38 = vpop.f32.mrb[2].mxu0  ;;  %v755_v42 = vadd.f32 %v754_v37, %v582_v36 }
 0x10c   : > { %v757_v40 = vadd.f32 %v756_v38, %v578_v34  ;;  %v758_v41 = vpop.f32.mrb[3].mxu0  ;;  %v795_v49 = vpop.f32.mrb[0].mxu1 }
 0x10d   : > { %v759_v43 = vadd.f32 %v758_v41, %v582_v36  ;;  %v796_v50 = vadd.f32 %v795_v49, %v586_v48  ;;  %v2157_v51 = vpop.f32.mrb[1].mxu1 }
 0x10e   : > { %v802_v44 = vpack.c.bf16 %v757_v40, %v753_v39  ;;  %v798_v52 = vpop.f32.mrb[2].mxu1 }
 0x10f   : > { %v803_v45 = vpack.c.bf16 %v759_v43, %v755_v42  ;;  %v799_v53 = vadd.f32 %v798_v52, %v586_v48  ;;  %v2158_v54 = vpop.f32.mrb[3].mxu1 }
 0x111   : > { %v816_v46 = vsel %vm811_vm1, %v803_v45, 0  ;;  %v2727_v55 = vpack.c.bf16 %v799_v53, %v796_v50 }
 0x112   : > { %2160 = vmatpush3.bf16.xpose.msra.mxu1 %v816_v46 }
 0x113   : > { %2165 = vmatprep.subr.bf16.mxu1 %v2464_v6 }
 0x119   : > { %2162 = vmatmul.mubr.msk.bf16.vlgmr.msra.gmra.mrb[4].mxu1 %vm811_vm1, %v802_v44 }
 0x11a   : > { %2167 = vmatprep.mubr.msk.bf16.mxu1 %vm2465_vm0, %v2464_v6  ;;  %2166 = vmatpush3.bf16.msra.mxu1 %v2727_v55 }
 0x11b   : > { %2171 = vmatprep.subr.bf16.mxu1 %v2464_v6 }
 0x1ec   : > { %v852_v60 = vpop.f32.mrb[4].mxu1 }
 0x1ed   : > { %v853_v61 = vadd.f32 %v852_v60, %v2736_v59  ;;  %v2163_v62 = vpop.f32.mrb[5].mxu1 }
 0x1ee   : > { %v855_v63 = vpop.f32.mrb[6].mxu1 }
 0x1ef   : > { %v856_v0 = vadd.f32 %v855_v63, %v2736_v59  ;;  %v2164_v1 = vpop.f32.mrb[7].mxu1  ;;  %v860_v3 = vsel %vm859_vm3, %v853_v61, -inf }
 0x1f0   : > { %861 = vmax.xlane.f32.xlu0 %v860_v3 }
 0x1f1   : > { %v863_v4 = vsel %vm859_vm3, %v856_v0, -inf }
 0x1f4   : > { %864 = vmax.xlane.f32.xlu0 %v863_v4 }
 0x20a   : > { %933 = vrot.lane.b32.xlu0 %v803_v45, %s2467_s20 }
 0x20e   : > { %1198 = vrot.lane.b32.xlu0 %v803_v45, %s2468_s21 }
 0x27d   : > { %v862_v5 = vpop.xlane.xlu0 %861 }
 0x27e   : > { %v866_v7 = vsub.f32 %v853_v61, %v862_v5 }
 0x280   : > { %v868_v8 = vmul.f32 1.442695, %v866_v7 }
 0x281   : > { %v865_v9 = vpop.xlane.xlu0 %864 }
 0x282   : > { %2355 = vpow2.f32 %v868_v8  ;;  %v867_v10 = vsub.f32 %v856_v0, %v865_v9 }
 0x284   : > { %v870_v11 = vmul.f32 1.442695, %v867_v10 }
 0x285   : > { %v934_v19 = vpop.permute.xlu0 %933 }
 0x286   : > { %2357 = vpow2.f32 %v870_v11  ;;  %v939_v32 = vsel %vm811_vm1, %v934_v19, 0 }
 0x289   : > { %v1199_v28 = vpop.permute.xlu0 %1198 }
 0x28a   : > { %v1204_v35 = vsel %vm811_vm1, %v1199_v28, 0 }
 0x28c   : > { %v2356_v12 = vpop.eup %2355 }
 0x28d   : > { %v872_v13 = vsel %vm859_vm3, %v2356_v12, 0.0 }
 0x28e   : > { %873 = vadd.xlane.f32.xlu1 %v872_v13 }
 0x290   : > { %v2358_v14 = vpop.eup %2357 }
 0x291   : > { %v875_v15 = vsel %vm859_vm3, %v2358_v14, 0.0 }
 0x292   : > { %876 = vadd.xlane.f32.xlu1 %v875_v15 }
 0x2a3   : > { %930 = vrot.lane.b32.xlu1 %v802_v44, %s2467_s20 }
 0x2a7   : > { %1066 = vrot.lane.b32.xlu1 %v803_v45, %s2469_s16 }
 0x2ab   : > { %1064 = vrot.lane.b32.xlu1 %v802_v44, %s2469_s16 }
 0x2af   : > { %1196 = vrot.lane.b32.xlu1 %v802_v44, %s2468_s21 }
 0x31b   : > { %v874_v16 = vpop.xlane.xlu1 %873 }
 0x31c   : > { %2359 = vrcp.f32 %v874_v16 }
 0x31f   : > { %v877_v17 = vpop.xlane.xlu1 %876 }
 0x320   : > { %2361 = vrcp.f32 %v877_v17 }
 0x323   : > { %v931_v18 = vpop.permute.xlu1 %930 }
 0x326   : > { %v2360_v21 = vpop.eup %2359 }
 0x327   : > { %v1067_v20 = vpop.permute.xlu1 %1066  ;;  %v879_v26 = vmul.f32 %v2360_v21, %v2356_v12 }
 0x328   : > { %v1072_v22 = vsel %vm811_vm1, %v1067_v20, 0 }
 0x329   : > { %2184 = vmatpush3.bf16.xpose.msra.mxu0 %v1072_v22 }
 0x32a   : > { %v2362_v25 = vpop.eup %2361  ;;  %2195 = vmatprep.subr.bf16.mxu0 %v2464_v6 }
 0x32b   : > { %v881_v27 = vmul.f32 %v2362_v25, %v2358_v14  ;;  %v1065_v34 = vpop.permute.xlu1 %1064 }
 0x32d   : > { %v882_v29 = vpack.c.bf16 %v881_v27, %v879_v26 }
 0x32f   : > { %2168 = vmatmul.mubr.msk.bf16.vlgmr.msra.gmra.mrb[8].mxu1 %vm859_vm3, %v882_v29  ;;  %v1197_v36 = vpop.permute.xlu1 %1196 }
 0x330   : > { %2172 = vmatpush3.bf16.xpose.msra.mxu1 %v939_v32  ;;  %2186 = vmatmul.mubr.msk.bf16.vlgmr.msra.gmra.mrb[4].mxu0 %vm811_vm1, %v1065_v34 }
 0x331   : > { %2196 = vmatpush3.bf16.xpose.msra.mxu0 %v1204_v35  ;;  %2173 = vmatprep.mubr.msk.bf16.mxu1 %vm2465_vm0, %v2464_v6 }
 0x332   : > { %2197 = vmatprep.mubr.msk.bf16.mxu0 %vm2465_vm0, %v2464_v6  ;;  %2177 = vmatprep.subr.bf16.mxu1 %v2464_v6 }
 0x333   : > { %2207 = vmatprep.subr.bf16.mxu0 %v2464_v6 }
 0x337   : > { %2174 = vmatmul.mubr.msk.bf16.vlgmr.msra.gmra.mrb[12].mxu1 %vm811_vm1, %v931_v18 }
 0x338   : > { %2198 = vmatmul.mubr.msk.bf16.vlgmr.msra.gmra.mrb[8].mxu0 %vm811_vm1, %v1197_v36  ;;  %2179 = vmatprep.mubr.msk.bf16.mxu1 %vm2465_vm0, %v2464_v6 }
 0x339   : > { %2223 = vmatprep.mubr.msk.bf16.mxu0 %vm2465_vm0, %v2464_v6 }
 0x402   : > { %v920_v37 = vpop.f32.mrb[8].mxu1 }
 0x403   : > { %927 = vst.msk [vmem:[#allocation2] sm:$0xff] %vm811_vm1, %v920_v37  ;;  %v2169_v38 = vpop.f32.mrb[9].mxu1  ;;  %v1108_v39 = vpop.f32.mrb[4].mxu0 }
 0x404   : > { %v923_v40 = vpop.f32.mrb[10].mxu1  ;;  %v2187_v41 = vpop.f32.mrb[5].mxu0  ;;  %v1109_v51 = vadd.f32 %v1108_v39, %v2736_v59 }
 0x405   : > { %928 = vst.msk [vmem:[#allocation2 + $0x8] sm:$0xff] %vm811_vm1, %v923_v40  ;;  %v2170_v42 = vpop.f32.mrb[11].mxu1  ;;  %v1111_v43 = vpop.f32.mrb[6].mxu0 }
 0x406   : > { %v2188_v44 = vpop.f32.mrb[7].mxu0  ;;  %v1112_v61 = vadd.f32 %v1111_v43, %v2736_v59  ;;  %v1115_v62 = vsel %vm859_vm3, %v1109_v51, -inf }
 0x408   : > { %v1118_v1 = vsel %vm859_vm3, %v1112_v61, -inf }
 0x40a   : > { %v975_v45 = vpop.f32.mrb[12].mxu1 }
 0x40b   : > { %v976_v46 = vadd.f32 %v975_v45, %v2736_v59  ;;  %v2175_v47 = vpop.f32.mrb[13].mxu1  ;;  %v1240_v48 = vpop.f32.mrb[8].mxu0 }
 0x40c   : > { %v978_v49 = vpop.f32.mrb[14].mxu1  ;;  %v2199_v50 = vpop.f32.mrb[9].mxu0  ;;  %v1241_v0 = vadd.f32 %v1240_v48, %v2736_v59 }
 0x40d   : > { %v979_v52 = vadd.f32 %v978_v49, %v2736_v59  ;;  %v2176_v53 = vpop.f32.mrb[15].mxu1  ;;  %v1243_v54 = vpop.f32.mrb[10].mxu0  ;;  %v982_v56 = vsel %vm859_vm3, %v976_v46, -inf }
 0x40e   : > { %v2200_v57 = vpop.f32.mrb[11].mxu0  ;;  %983 = vmax.xlane.f32.xlu0 %v982_v56  ;;  %v1244_v58 = vadd.f32 %v1243_v54, %v2736_v59  ;;  %v1247_v3 = vsel %vm859_vm3, %v1241_v0, -inf }
 0x40f   : > { %v985_v60 = vsel %vm859_vm3, %v979_v52, -inf }
 0x410   : > { %986 = vmax.xlane.f32.xlu1 %v985_v60  ;;  %v1250_v63 = vsel %vm859_vm3, %v1244_v58, -inf }
 0x412   : > { %1116 = vmax.xlane.f32.xlu0 %v1115_v62 }
 0x414   : > { %1251 = vmax.xlane.f32.xlu1 %v1250_v63 }
 0x416   : > { %1119 = vmax.xlane.f32.xlu0 %v1118_v1  ;;  %v2308_v1 = vld [vmem:[%s3028_s4 + $0x8] sm:$0xff]  }
 0x41a   : > { %1248 = vmax.xlane.f32.xlu0 %v1247_v3  ;;  %v2309_v3 = vld [vmem:[%s3028_s4 + $0x10] sm:$0xff]  }
 0x49b   : > { %v984_v4 = vpop.xlane.xlu0 %983 }
 0x49c   : > { %v988_v14 = vsub.f32 %v976_v46, %v984_v4  ;;  %v2311_v4 = vld [vmem:[%s3028_s4 + $0x20] sm:$0xff]  }
 0x49d   : > { %v987_v5 = vpop.xlane.xlu1 %986 }
 0x49e   : > { %v989_v15 = vsub.f32 %v979_v52, %v987_v5  ;;  %v990_v19 = vmul.f32 1.442695, %v988_v14 }
 0x49f   : > { %v1117_v7 = vpop.xlane.xlu0 %1116 }
 0x4a0   : > { %v1121_v8 = vsub.f32 %v1109_v51, %v1117_v7  ;;  %v992_v20 = vmul.f32 1.442695, %v989_v15  ;;  %v2314_v15 = vld [vmem:[%s3028_s4 + $0x38] sm:$0xff]  }
 0x4a1   : > { %v1252_v9 = vpop.xlane.xlu1 %1251 }
 0x4a2   : > { %v1123_v10 = vmul.f32 1.442695, %v1121_v8  ;;  %v1254_v11 = vsub.f32 %v1244_v58, %v1252_v9 }
 0x4a3   : > { %v1120_v12 = vpop.xlane.xlu0 %1119 }
 0x4a4   : > { %2363 = vpow2.f32 %v1123_v10  ;;  %v1122_v13 = vsub.f32 %v1112_v61, %v1120_v12  ;;  %v1257_v16 = vmul.f32 1.442695, %v1254_v11  ;;  %v2312_v10 = vld [vmem:[%s3028_s4 + $0x28] sm:$0xff]   ;;  %v2313_v11 = vld [vmem:[%s3028_s4 + $0x30] sm:$0xff]  }
 0x4a6   : > { %v1125_v59 = vmul.f32 1.442695, %v1122_v13 }
 0x4a7   : > { %v1249_v17 = vpop.xlane.xlu0 %1248 }
 0x4a8   : > { %2365 = vpow2.f32 %v1125_v59  ;;  %v1253_v18 = vsub.f32 %v1241_v0, %v1249_v17  ;;  %v2307_v0 = vld [vmem:[%s3028_s4] sm:$0xff]  }
 0x4a9   : > { %2367 = vpow2.f32 %v1257_v16  ;;  %2208 = vmatpush3.bf16.msra.mxu0 %v2307_v0  ;;  %v2336_v0 = vld [vmem:[%s3032_s8 + $0x70] ss:$8 sps:$4 sm:$0xff]  }
 0x4aa   : > { %v1255_v21 = vmul.f32 1.442695, %v1253_v18  ;;  %2209 = vmatprep.subr.bf16.mxu0 %v2464_v6 }
 0x4ac   : > { %2369 = vpow2.f32 %v1255_v21 }
 0x4ad   : > { %2371 = vpow2.f32 %v990_v19  ;;  %2210 = vmatpush3.bf16.msra.mxu0 %v2308_v1  ;;  %v2339_v1 = vld [vmem:[%s3034_s10 + $0x40] sm:$0xff]  }
 0x4ae   : > { %v2364_v22 = vpop.eup %2363  ;;  %2373 = vpow2.f32 %v992_v20  ;;  %2211 = vmatprep.subr.bf16.mxu0 %v2464_v6 }
 0x4af   : > { %v1127_v25 = vsel %vm859_vm3, %v2364_v22, 0.0 }
 0x4b0   : > { %1128 = vadd.xlane.f32.xlu0 %v1127_v25 }
 0x4b1   : > { %2212 = vmatpush3.bf16.msra.mxu0 %v2309_v3  ;;  %v2340_v3 = vld [vmem:[%s3034_s10] sm:$0xff]  }
 0x4b2   : > { %v2366_v26 = vpop.eup %2365  ;;  %2213 = vmatprep.subr.bf16.mxu0 %v2464_v6 }
 0x4b3   : > { %v1130_v27 = vsel %vm859_vm3, %v2366_v26, 0.0  ;;  %v2368_v28 = vpop.eup %2367 }
 0x4b4   : > { %1131 = vadd.xlane.f32.xlu1 %v1130_v27  ;;  %v1262_v35 = vsel %vm859_vm3, %v2368_v28, 0.0 }
 0x4b6   : > { %v2370_v29 = vpop.eup %2369 }
 0x4b7   : > { %v2372_v32 = vpop.eup %2371  ;;  %v1259_v34 = vsel %vm859_vm3, %v2370_v29, 0.0 }
 0x4b8   : > { %v2374_v36 = vpop.eup %2373  ;;  %1260 = vadd.xlane.f32.xlu0 %v1259_v34  ;;  %1263 = vadd.xlane.f32.xlu1 %v1262_v35  ;;  %v994_v37 = vsel %vm859_vm3, %v2372_v32, 0.0 }
 0x4b9   : > { %v997_v38 = vsel %vm859_vm3, %v2374_v36, 0.0 }
 0x4bc   : > { %995 = vadd.xlane.f32.xlu0 %v994_v37  ;;  %998 = vadd.xlane.f32.xlu1 %v997_v38 }
 0x4cd   : > { %1138 = vrot.lane.b32.xlu1 %v2727_v55, %s2469_s16 }
 0x4d1   : > { %1270 = vrot.lane.b32.xlu1 %v2727_v55, %s2468_s21 }
 0x4d2   : > { %1006 = vrot.lane.b32.xlu0 %v2727_v55, %s2467_s20 }
 0x53d   : > { %v1129_v39 = vpop.xlane.xlu0 %1128 }
 0x541   : > { %v1132_v40 = vpop.xlane.xlu1 %1131 }
 0x545   : > { %v1261_v41 = vpop.xlane.xlu0 %1260  ;;  %v1264_v42 = vpop.xlane.xlu1 %1263 }
 0x549   : > { %v996_v43 = vpop.xlane.xlu0 %995  ;;  %v999_v44 = vpop.xlane.xlu1 %998 }
 0x54a   : > { %2375 = vrcp.f32 %v996_v43  ;;  %v2317_v43 = vld [vmem:[%s3032_s8 + $0x4] ss:$8 sps:$4 sm:$0xff]  }
 0x54b   : > { %2377 = vrcp.f32 %v999_v44  ;;  %v2320_v44 = vld [vmem:[%s3032_s8 + $0x14] ss:$8 sps:$4 sm:$0xff]  }
 0x54c   : > { %2379 = vrcp.f32 %v1132_v40 }
 0x54d   : > { %v1007_v45 = vpop.permute.xlu0 %1006  ;;  %2381 = vrcp.f32 %v1129_v39  ;;  %v1139_v51 = vpop.permute.xlu1 %1138 }
 0x54e   : > { %2178 = vmatpush3.bf16.msra.mxu1 %v1007_v45  ;;  %2383 = vrcp.f32 %v1261_v41 }
 0x54f   : > { %2189 = vmatprep.subr.bf16.mxu1 %v2464_v6  ;;  %2385 = vrcp.f32 %v1264_v42  ;;  %v2315_v42 = vld [vmem:[%s3032_s8] ss:$8 sps:$4 sm:$0xff]  }
 0x551   : > { %v1271_v60 = vpop.permute.xlu1 %1270 }
 0x554   : > { %v2376_v46 = vpop.eup %2375 }
 0x555   : > { %v2378_v47 = vpop.eup %2377  ;;  %v1001_v48 = vmul.f32 %v2376_v46, %v2372_v32  ;;  %v2028_v32 = vld [vmem:[%s3029_s5] ss:$0 sm:$0xff] }
 0x556   : > { %v1003_v49 = vmul.f32 %v2378_v47, %v2374_v36  ;;  %v2380_v50 = vpop.eup %2379 }
 0x557   : > { %v2382_v52 = vpop.eup %2381  ;;  %v1136_v53 = vmul.f32 %v2380_v50, %v2366_v26 }
 0x558   : > { %v1004_v55 = vpack.c.bf16 %v1003_v49, %v1001_v48  ;;  %v1134_v54 = vmul.f32 %v2382_v52, %v2364_v22  ;;  %v2384_v56 = vpop.eup %2383  ;;  %v2321_v52 = vld [vmem:[%s3032_s8 + $0x20] ss:$8 sps:$4 sm:$0xff]  }
 0x559   : > { %v2386_v58 = vpop.eup %2385  ;;  %v1266_v61 = vmul.f32 %v2384_v56, %v2370_v29  ;;  %v2329_v56 = vld [vmem:[%s3032_s8 + $0x44] ss:$8 sps:$4 sm:$0xff]  }
 0x55a   : > { %2180 = vmatmul.mubr.msk.bf16.vlgmr.msra.gmra.mrb[16].mxu1 %vm859_vm3, %v1004_v55  ;;  %v1137_v57 = vpack.c.bf16 %v1136_v53, %v1134_v54  ;;  %v1268_v62 = vmul.f32 %v2386_v58, %v2368_v28  ;;  %v2326_v53 = vld [vmem:[%s3032_s8 + $0x34] ss:$8 sps:$4 sm:$0xff]   ;;  %v2324_v54 = vld [vmem:[%s3032_s8 + $0x30] ss:$8 sps:$4 sm:$0xff]  }
 0x55b   : > { %2190 = vmatpush3.bf16.msra.mxu1 %v1139_v51  ;;  %2191 = vmatprep.mubr.msk.bf16.mxu1 %vm2465_vm0, %v2464_v6  ;;  %v2323_v51 = vld [vmem:[%s3032_s8 + $0x24] ss:$8 sps:$4 sm:$0xff]   ;;  %v2332_v58 = vld [vmem:[%s3032_s8 + $0x54] ss:$8 sps:$4 sm:$0xff]  }
 0x55c   : > { %2201 = vmatprep.subr.bf16.mxu1 %v2464_v6  ;;  %v1269_v63 = vpack.c.bf16 %v1268_v62, %v1266_v61  ;;  %v2335_v61 = vld [vmem:[%s3032_s8 + $0x64] ss:$8 sps:$4 sm:$0xff]   ;;  %v2333_v62 = vld [vmem:[%s3032_s8 + $0x60] ss:$8 sps:$4 sm:$0xff]  }
 0x562   : > { %2192 = vmatmul.mubr.msk.bf16.vlgmr.msra.gmra.mrb[20].mxu1 %vm859_vm3, %v1137_v57  ;;  %v2327_v57 = vld [vmem:[%s3032_s8 + $0x40] ss:$8 sps:$4 sm:$0xff]  }
 0x563   : > { %2202 = vmatpush3.bf16.msra.mxu1 %v1271_v60  ;;  %2203 = vmatprep.mubr.msk.bf16.mxu1 %vm2465_vm0, %v2464_v6  ;;  %v2330_v60 = vld [vmem:[%s3032_s8 + $0x50] ss:$8 sps:$4 sm:$0xff]  }
 0x564   : > { %1595 = vmatprep.subr.bf16.mxu1 %v2317_v43 }
 0x56a   : > { %2204 = vmatmul.mubr.msk.bf16.vlgmr.msra.gmra.mrb[24].mxu1 %vm859_vm3, %v1269_v63  ;;  %v2338_v63 = vld [vmem:[%s3032_s8 + $0x74] ss:$8 sps:$4 sm:$0xff]  }
 0x56b   : > { %1627 = vmatprep.mubr.bf16.mxu1 %v2463_v2  ;;  %v2310_v2 = vld [vmem:[%s3028_s4 + $0x18] sm:$0xff]   ;;  %1596 = vmatpush1.bf16.msra.mxu1 %v2315_v42 }
 0x56c   : > { %2214 = vmatpush3.bf16.msra.mxu0 %v2310_v2  ;;  %1597 = vmatprep.subr.bf16.mxu1 %v2320_v44  ;;  %v2341_v2 = vld [vmem:[%s3034_s10 + $0x48] sm:$0xff]  }
 0x56d   : > { %2215 = vmatprep.subr.bf16.mxu0 %v2464_v6 }
 0x570   : > { %2216 = vmatpush3.bf16.msra.mxu0 %v2311_v4  ;;  %v2342_v4 = vld [vmem:[%s3034_s10 + $0x8] sm:$0xff]  }
 0x571   : > { %2217 = vmatprep.subr.bf16.mxu0 %v2464_v6 }
 0x574   : > { %2218 = vmatpush3.bf16.msra.mxu0 %v2312_v10  ;;  %v2347_v10 = vld [vmem:[%s3034_s10 + $0x60] sm:$0xff]  }
 0x575   : > { %2219 = vmatprep.subr.bf16.mxu0 %v2464_v6 }
 0x578   : > { %2220 = vmatpush3.bf16.msra.mxu0 %v2313_v11  ;;  %v2348_v11 = vld [vmem:[%s3034_s10 + $0x20] sm:$0xff]  }
 0x579   : > { %2221 = vmatprep.subr.bf16.mxu0 %v2464_v6 }
 0x57c   : > { %2222 = vmatpush3.bf16.msra.mxu0 %v2314_v15 }
 0x57d   : > { %2117 = vmatprep.subr.bf16.mxu0 %v2339_v1 }
 0x62d   : > { %v1046_v5 = vpop.f32.mrb[16].mxu1 }
 0x62e   : > { %1055 = vrot.lane.b32.xlu1 %v1046_v5, %s2468_s21  ;;  %v2181_v7 = vpop.f32.mrb[17].mxu1  ;;  %v2343_v5 = vld [vmem:[%s3034_s10 + $0x50] sm:$0xff]  }
 0x62f   : > { %v1049_v8 = vpop.f32.mrb[18].mxu1  ;;  %v2344_v7 = vld [vmem:[%s3034_s10 + $0x10] sm:$0xff]  }
 0x630   : > { %1057 = vrot.lane.b32.xlu0 %v1049_v8, %s2468_s21  ;;  %v2182_v9 = vpop.f32.mrb[19].mxu1  ;;  %v2345_v8 = vld [vmem:[%s3034_s10 + $0x58] sm:$0xff]   ;;  %s3061_s21 = sld [smem:[#allocation14_spill]] }
 0x631   : > { %v2346_v9 = vld [vmem:[%s3034_s10 + $0x18] sm:$0xff]  }
 0x635   : > { %v1178_v12 = vpop.f32.mrb[20].mxu1 }
 0x636   : > { %1187 = vrot.lane.b32.xlu1 %v1178_v12, %s2469_s16  ;;  %v2193_v13 = vpop.f32.mrb[21].mxu1  ;;  %v2349_v12 = vld [vmem:[%s3034_s10 + $0x68] sm:$0xff]   ;;  %s3062_s26 = smov %s3061_s21  ;;  %s2979_s1 = scalar_lea.hbm %s3061_s21, %s2082_s18 }
 0x637   : > { %v1181_v14 = vpop.f32.mrb[22].mxu1 }
 0x638   : > { %1189 = vrot.lane.b32.xlu0 %v1181_v14, %s2469_s16  ;;  %v2194_v16 = vpop.f32.mrb[23].mxu1 }
 0x63d   : > { %v1310_v59 = vpop.f32.mrb[24].mxu1 }
 0x63e   : > { %1319 = vrot.lane.b32.xlu1 %v1310_v59, %s2467_s20  ;;  %v2205_v17 = vpop.f32.mrb[25].mxu1 }
 0x63f   : > { %v1313_v18 = vpop.f32.mrb[26].mxu1 }
 0x640   : > { %1321 = vrot.lane.b32.xlu0 %v1313_v18, %s2467_s20  ;;  %v2206_v19 = vpop.f32.mrb[27].mxu1  ;;  %s523_s20 = sand.u32 1, %s2453_s22  }
 0x641   : > { %s1993_s16 = sshll.u32 %s523_s20, 4  ;;  %s2983_s28 = scalar_lea.sflag [#allocation4], %s523_s20 }
 0x642   : > { %s525_s24 = scalar_lea.vmem [#allocation3], %s1993_s16  ;;  %s2470_s16 = smov [#allocation3]  }
 0x643   : > { %s1918_s27 = sshll.u32 %s525_s24, 4  ;;  %s2403_s29 = sshll.u32 %s2470_s16, 4  ;;  %s2981_s27 = int_to_ptr.vmem [resolvable:$true] %s1918_s27  ;;  %s2404_s29 = int_to_ptr.vmem [resolvable:$false] %s2403_s29 }
 0x644   : > { %s2399_s25 = scalar_lea.vmem %s2981_s27, 256  ;;  %s2405_s23 = scalar_lea.vmem %s2404_s29, 512 }
 0x645   : > { %p2400_p11 = scmp.ne.s32.totalorder %s2981_s27, %s2399_s25  ;;  %p2406_p0 = scmp.lt.s32.totalorder %s2981_s27, %s2404_s29 }
 0x646   : > { %p2407_p1 = scmp.lt.s32.totalorder %s2405_s23, %s2399_s25 }
 0x647   : > { %p2401_p12 = pnand %p2400_p11, %p2596_p5 }
 0x648   : > { %p2408_p2 = por %p2407_p1, %p2406_p0 }
 0x649   : > { %p2402_p13 = pneg %p2401_p12 }
 0x64b   : > { %p2409_p3 = pnand %p2408_p2, %p2402_p13 }
 0x6a0   : > { %v1056_v20 = vpop.permute.xlu1 %1055 }
 0x6a1   : > { %1062 = vst.msk [vmem:[#allocation2] sm:$0xff] %vm1061_vm4, %v1056_v20  ;;  %v2037_v20 = vld [vmem:[%s3030_s6] ss:$0 sm:$0xff] }
 0x6a2   : > { %v1058_v21 = vpop.permute.xlu0 %1057 }
 0x6a3   : > { %1063 = vst.msk [vmem:[#allocation2 + $0x8] sm:$0xff] %vm1061_vm4, %v1058_v21 }
 0x6a8   : > { %v1188_v22 = vpop.permute.xlu1 %1187 }
 0x6a9   : > { %1194 = vst.msk [vmem:[#allocation2] sm:$0xff] %vm1193_vm5, %v1188_v22 }
 0x6aa   : > { %v1190_v25 = vpop.permute.xlu0 %1189 }
 0x6ab   : > { %1195 = vst.msk [vmem:[#allocation2 + $0x8] sm:$0xff] %vm1193_vm5, %v1190_v25 }
 0x6b0   : > { %v1320_v6 = vpop.permute.xlu1 %1319 }
 0x6b1   : > { %1326 = vst.msk [vmem:[#allocation2] sm:$0xff] %vm1325_vm6, %v1320_v6  ;;  %v2038_v6 = vld [vmem:[%s3031_s7] ss:$0 sm:$0xff] }
 0x6b2   : > { %v1322_v26 = vpop.permute.xlu0 %1321 }
 0x6b3   : > { %1327 = vst.msk [vmem:[#allocation2 + $0x8] sm:$0xff] %vm1325_vm6, %v1322_v26 }
 0x6b8   : > { %v1328_v27 = vld [vmem:[#allocation2] sm:$0xff] }
 0x6ba   : > { %v1329_v28 = vld [vmem:[#allocation2 + $0x8] sm:$0xff] }
 0x6bb   : > { %v1330_v29 = vpack.c.bf16 %v1329_v28, %v1328_v27 }
 0x6bd   : > { %2224 = vmatmul.mubr.bf16.vlgmr.msra.gmra.mrb[12].mxu0 %v1330_v29 }
 0x6be   : > { %2118 = vmatpush3.bf16.msra.mxu0 %v2340_v3 }
 0x6bf   : > { %2119 = vmatprep.subr.bf16.mxu0 %v2341_v2 }
 0x6c2   : > { %2120 = vmatpush3.bf16.msra.mxu0 %v2342_v4 }
 0x6c3   : > { %2121 = vmatprep.subr.bf16.mxu0 %v2343_v5 }
 0x6c6   : > { %2122 = vmatpush3.bf16.msra.mxu0 %v2344_v7 }
 0x6c7   : > { %2123 = vmatprep.subr.bf16.mxu0 %v2345_v8 }
 0x6ca   : > { %2124 = vmatpush3.bf16.msra.mxu0 %v2346_v9 }
 0x6cb   : > { %2125 = vmatprep.subr.bf16.mxu0 %v2347_v10 }
 0x6ce   : > { %2126 = vmatpush3.bf16.msra.mxu0 %v2348_v11 }
 0x6cf   : > { %2127 = vmatprep.subr.bf16.mxu0 %v2349_v12 }
 0x790   : > { %v1436_v34 = vpop.f32.mrb[12].mxu0 }
 0x791   : > { %v1437_v35 = vadd.f32 %v2028_v32, %v1436_v34  ;;  %v2225_v36 = vpop.f32.mrb[13].mxu0  ;;  %v2351_v34 = vld [vmem:[%s3034_s10 + $0x70] sm:$0xff]  }
 0x792   : > { %v1439_v37 = vpop.f32.mrb[14].mxu0  ;;  %v2353_v36 = vld [vmem:[%s3034_s10 + $0x78] sm:$0xff]  }
 0x793   : > { %v1440_v38 = vadd.f32 %v2028_v32, %v1439_v37  ;;  %v2226_v39 = vpop.f32.mrb[15].mxu0  ;;  %v1443_v40 = vadd.f32 %v1437_v35, %v2682_v23  ;;  %v2318_v23 = vld [vmem:[%s3032_s8 + $0x10] ss:$8 sps:$4 sm:$0xff]   ;;  %v2350_v32 = vld [vmem:[%s3034_s10 + $0x28] sm:$0xff]  }
 0x794   : > { %1598 = vmatpush1.bf16.msra.mxu1 %v2318_v23  ;;  %2128 = vmatpush3.bf16.msra.mxu0 %v2350_v32  ;;  %v2352_v35 = vld [vmem:[%s3034_s10 + $0x30] sm:$0xff]   ;;  %v2354_v37 = vld [vmem:[%s3034_s10 + $0x38] sm:$0xff]  }
 0x795   : > { %1447 = vadd.xlane.f32.xlu1 %v1443_v40  ;;  %v1444_v41 = vadd.f32 %v1440_v38, %v2684_v24  ;;  %1599 = vmatprep.subr.bf16.mxu1 %v2323_v51  ;;  %v1503_v38 = vld [vmem:[%s3033_s9] sm:$0x3] }
 0x796   : > { %2129 = vmatprep.subr.bf16.mxu0 %v2351_v34  ;;  %v1508_v39 = vrot.slane %v1503_v38, %v2712_v31 }
 0x797   : > { %1449 = vadd.xlane.f32.xlu0 %v1444_v41 }
 0x798   : > { %1600 = vmatpush1.bf16.msra.mxu1 %v2321_v52  ;;  %2130 = vmatpush3.bf16.msra.mxu0 %v2352_v35 }
 0x799   : > { %1601 = vmatprep.subr.bf16.mxu1 %v2326_v53  ;;  %2131 = vmatprep.subr.bf16.mxu0 %v2353_v36 }
 0x79c   : > { %1602 = vmatpush1.bf16.msra.mxu1 %v2324_v54  ;;  %2132 = vmatpush3.bf16.msra.mxu0 %v2354_v37 }
 0x79d   : > { %1603 = vmatprep.subr.bf16.mxu1 %v2329_v56 }
 0x7a0   : > { %1604 = vmatpush1.bf16.msra.mxu1 %v2327_v57 }
 0x7a1   : > { %1605 = vmatprep.subr.bf16.mxu1 %v2332_v58 }
 0x7a4   : > { %1606 = vmatpush1.bf16.msra.mxu1 %v2330_v60 }
 0x7a5   : > { %1607 = vmatprep.subr.bf16.mxu1 %v2335_v61 }
 0x7a8   : > { %1608 = vmatpush1.bf16.msra.mxu1 %v2333_v62 }
 0x7a9   : > { %1609 = vmatprep.subr.bf16.mxu1 %v2338_v63 }
 0x7ac   : > { %1610 = vmatpush1.bf16.msra.mxu1 %v2336_v0 }
 0x822   : > { %v1448_v24 = vpop.xlane.xlu1 %1447 }
 0x823   : > { %v1452_v45 = vmul.f32 0.0078125, %v1448_v24 }
 0x824   : > { %v1450_v46 = vpop.xlane.xlu0 %1449 }
 0x825   : > { %v1454_v47 = vsub.f32 %v1443_v40, %v1452_v45  ;;  %v1453_v48 = vmul.f32 0.0078125, %v1450_v46  ;;  %v1512_v40 = vrot.slane %v1503_v38, %v581_v33 }
 0x827   : > { %v2858_v49 = vsub.f32 %v1444_v41, %v1453_v48  ;;  %v1456_v55 = vmul.f32 %v1454_v47, %v1454_v47 }
 0x829   : > { %1458 = vadd.xlane.f32.xlu0 %v1456_v55  ;;  %v1457_v50 = vmul.f32 %v2858_v49, %v2858_v49 }
 0x82d   : > { %1460 = vadd.xlane.f32.xlu0 %v1457_v50 }
 0x8b6   : > { %v1459_v13 = vpop.xlane.xlu0 %1458 }
 0x8b7   : > { %v1462_v14 = vmul.f32 0.0078125, %v1459_v13 }
 0x8b9   : > { %v1464_v15 = vadd.f32 1e-05, %v1462_v14  ;;  %v2072_v14 = vld [vmem:[%s3036_s12] ss:$0 sm:$0xff] }
 0x8ba   : > { %v1461_v16 = vpop.xlane.xlu0 %1460 }
 0x8bb   : > { %2387 = vrsqrt.f32 %v1464_v15  ;;  %v1463_v59 = vmul.f32 0.0078125, %v1461_v16 }
 0x8bd   : > { %v1465_v17 = vadd.f32 1e-05, %v1463_v59  ;;  %v2073_v59 = vld [vmem:[%s3037_s13] ss:$0 sm:$0xff] }
 0x8bf   : > { %2389 = vrsqrt.f32 %v1465_v17 }
 0x8c5   : > { %v2388_v18 = vpop.eup %2387 }
 0x8c6   : > { %v1468_v19 = vmul.f32 %v2388_v18, %v1454_v47 }
 0x8c8   : > { %v1476_v25 = vmul.f32 %v2037_v20, %v1468_v19 }
 0x8c9   : > { %v2390_v21 = vpop.eup %2389 }
 0x8ca   : > { %v1469_v22 = vmul.f32 %v2390_v21, %v2858_v49  ;;  %v1484_v27 = vadd.f32 %v2038_v6, %v1476_v25 }
 0x8cc   : > { %v1477_v26 = vmul.f32 %v2037_v20, %v1469_v22 }
 0x8ce   : > { %v1485_v28 = vadd.f32 %v2038_v6, %v1477_v26 }
 0x8d0   : > { %v1486_v29 = vpack.c.bf16 %v1485_v28, %v1484_v27 }
 0x8d2   : > { %1628 = vmatmul.mubr.bf16.vlgmr.msra.gmra.mrb[28].mxu1 %v1486_v29 }
 0x9a5   : > { %v1629_v41 = vpop.f32.mrb[28].mxu1 }
 0x9a6   : > { %v1630_v42 = vadd.f32 %v1629_v41, %v1508_v39  ;;  %v1631_v43 = vpop.f32.mrb[29].mxu1  ;;  %v2074_v41 = vld [vmem:[%s3038_s14] ss:$0 sm:$0xff] }
 0x9a7   : > { %v1632_v44 = vadd.f32 %v1631_v43, %v1512_v40  ;;  %v1633_v23 = vpop.f32.mrb[30].mxu1 }
 0x9a8   : > { %v1634_v24 = vadd.f32 %v1633_v23, %v1508_v39  ;;  %v1635_v45 = vpop.f32.mrb[31].mxu1  ;;  %v1638_v47 = vmax.f32 %v1630_v42, 0.0 }
 0x9a9   : > { %v1636_v46 = vadd.f32 %v1635_v45, %v1512_v40  ;;  %v1639_v49 = vmax.f32 %v1632_v44, 0.0  ;;  %v2075_v44 = vld [vmem:[%s3039_s15] ss:$0 sm:$0xff] }
 0x9aa   : > { %v1640_v48 = vmax.f32 %v1634_v24, 0.0 }
 0x9ab   : > { %v1641_v55 = vmax.f32 %v1636_v46, 0.0 }
 0x9ac   : > { %v1642_v50 = vpack.c.bf16 %v1640_v48, %v1638_v47 }
 0x9ad   : > { %v1643_v51 = vpack.c.bf16 %v1641_v55, %v1639_v49 }
 0x9af   : > { %1811 = vmatprep.mubr.bf16.mxu0 %v1643_v51 }
 0x9b0   : > { %1812 = vmatmul.mubr.bf16.vlgmr.msra.gmra.mrb[16].mxu0 %v1642_v50 }
 0xa83   : > { %v2133_v31 = vpop.f32.mrb[16].mxu0 }
 0xa84   : > { %v2134_v33 = vpop.f32.mrb[17].mxu0 }
 0xa85   : > { %v2135_v52 = vadd.f32 %v2134_v33, %v2133_v31  ;;  %v2136_v53 = vpop.f32.mrb[18].mxu0 }
 0xa86   : > { %v2137_v54 = vpop.f32.mrb[19].mxu0 }
 0xa87   : > { %v1814_v56 = vadd.f32 %v2135_v52, %v2055_v30  ;;  %v2138_v57 = vadd.f32 %v2137_v54, %v2136_v53 }
 0xa89   : > { %v1817_v58 = vadd.f32 %v2138_v57, %v2055_v30  ;;  %v1820_v60 = vadd.f32 %v1814_v56, %v1484_v27 }
 0xa8b   : > { %1824 = vadd.xlane.f32.xlu1 %v1820_v60  ;;  %v1821_v61 = vadd.f32 %v1817_v58, %v1485_v28 }
 0xa8d   : > { %1826 = vadd.xlane.f32.xlu0 %v1821_v61 }
 0xb18   : > { %v1825_v62 = vpop.xlane.xlu1 %1824 }
 0xb19   : > { %v1828_v63 = vmul.f32 0.0078125, %v1825_v62 }
 0xb1a   : > { %v1827_v0 = vpop.xlane.xlu0 %1826 }
 0xb1b   : > { %v1830_v1 = vsub.f32 %v1820_v60, %v1828_v63  ;;  %v1829_v3 = vmul.f32 0.0078125, %v1827_v0 }
 0xb1d   : > { %v1831_v2 = vsub.f32 %v1821_v61, %v1829_v3  ;;  %v1832_v4 = vmul.f32 %v1830_v1, %v1830_v1 }
 0xb1f   : > { %1834 = vadd.xlane.f32.xlu1 %v1832_v4  ;;  %v1833_v5 = vmul.f32 %v1831_v2, %v1831_v2 }
 0xb21   : > { %1836 = vadd.xlane.f32.xlu0 %v1833_v5 }
 0xbac   : > { %v1835_v7 = vpop.xlane.xlu1 %1834 }
 0xbad   : > { %v1838_v8 = vmul.f32 0.0078125, %v1835_v7 }
 0xbae   : > { %v1837_v9 = vpop.xlane.xlu0 %1836 }
 0xbaf   : > { %v1840_v10 = vadd.f32 1e-05, %v1838_v8  ;;  %v1839_v11 = vmul.f32 0.0078125, %v1837_v9 }
 0xbb1   : > { %2391 = vrsqrt.f32 %v1840_v10  ;;  %v1841_v12 = vadd.f32 1e-05, %v1839_v11 }
 0xbb3   : > { %2393 = vrsqrt.f32 %v1841_v12 }
 0xbbb   : > { %v2392_v13 = vpop.eup %2391 }
 0xbbc   : > { %v1844_v15 = vmul.f32 %v2392_v13, %v1830_v1 }
 0xbbd   : > { %v2394_v16 = vpop.eup %2393 }
 0xbbe   : > { %v1852_v17 = vmul.f32 %v2072_v14, %v1844_v15  ;;  %v1845_v18 = vmul.f32 %v2394_v16, %v1831_v2 }
 0xbc0   : > { %v1860_v19 = vadd.f32 %v2073_v59, %v1852_v17  ;;  %v1853_v20 = vmul.f32 %v2072_v14, %v1845_v18 }
 0xbc2   : > { %1864 = vadd.xlane.f32.xlu1 %v1860_v19  ;;  %v1861_v21 = vadd.f32 %v2073_v59, %v1853_v20 }
 0xbc4   : > { %1866 = vadd.xlane.f32.xlu0 %v1861_v21 }
 0xc4f   : > { %v1865_v22 = vpop.xlane.xlu1 %1864 }
 0xc50   : > { %v1868_v25 = vmul.f32 0.0078125, %v1865_v22 }
 0xc51   : > { %v1867_v6 = vpop.xlane.xlu0 %1866 }
 0xc52   : > { %v1870_v26 = vsub.f32 %v1860_v19, %v1868_v25  ;;  %v1869_v27 = vmul.f32 0.0078125, %v1867_v6 }
 0xc54   : > { %v1871_v28 = vsub.f32 %v1861_v21, %v1869_v27  ;;  %v1872_v29 = vmul.f32 %v1870_v26, %v1870_v26 }
 0xc56   : > { %1874 = vadd.xlane.f32.xlu1 %v1872_v29  ;;  %v1873_v32 = vmul.f32 %v1871_v28, %v1871_v28 }
 0xc58   : > { %1876 = vadd.xlane.f32.xlu0 %v1873_v32 }
 0xce3   : > { %v1875_v34 = vpop.xlane.xlu1 %1874 }
 0xce4   : > { %v1878_v35 = vmul.f32 0.0078125, %v1875_v34 }
 0xce5   : > { %v1877_v36 = vpop.xlane.xlu0 %1876 }
 0xce6   : > { %v1880_v37 = vadd.f32 1e-05, %v1878_v35  ;;  %v1879_v38 = vmul.f32 0.0078125, %v1877_v36 }
 0xce8   : > { %2395 = vrsqrt.f32 %v1880_v37  ;;  %v1881_v39 = vadd.f32 1e-05, %v1879_v38 }
 0xcea   : > { %2397 = vrsqrt.f32 %v1881_v39 }
 0xcf2   : > { %v2396_v40 = vpop.eup %2395 }
 0xcf3   : > { %v1884_v42 = vmul.f32 %v2396_v40, %v1870_v26 }
 0xcf4   : > { %v2398_v43 = vpop.eup %2397 }
 0xcf5   : > { %v1892_v23 = vmul.f32 %v2074_v41, %v1884_v42  ;;  %v1885_v24 = vmul.f32 %v2398_v43, %v1871_v28 }
 0xcf7   : > { %v1893_v45 = vmul.f32 %v2074_v41, %v1885_v24  ;;  %v1900_v46 = vadd.f32 %v2075_v44, %v1892_v23 }
 0xcf9   : > { %v1901_v47 = vadd.f32 %v2075_v44, %v1893_v45  ;;  %1902 = vst [vmem:[%s525_s24] sm:$0xff] %v1900_v46 }
 0xcfb   : > { %1903 = vst [vmem:[%s525_s24 + $0x8] sm:$0xff] %v1901_v47 }
 0xcfc   : > { %2412 = shalt.err (!%p2409_p3)
}
 0xcfd   : > { %s2413_s20 = scalar_lea.hbm %s2979_s1, 256  ;;  %s2417_s24 = scalar_lea.hbm %s3062_s26, 512 }
 0xcfe   : > { %p2414_p4 = scmp.ne.s32.totalorder %s2979_s1, %s2413_s20  ;;  %p2418_p9 = scmp.lt.u32.totalorder %s2979_s1, %s3062_s26 }
 0xcff   : > { %p2419_p10 = scmp.lt.u32.totalorder %s2417_s24, %s2413_s20  ;;  %p2421_p12 = scmp.lt.u32.totalorder %s2413_s20, %s2979_s1 }
 0xd00   : > { %p2415_p7 = pnand %p2414_p4, %p2596_p5 }
 0xd01   : > { %p2420_p11 = por %p2419_p10, %p2418_p9 }
 0xd02   : > { %p2416_p8 = pneg %p2415_p7 }
 0xd03   : > { %p2422_p13 = por %p2421_p12, %p2420_p11 }
 0xd05   : > { %p2423_p0 = pnand %p2422_p13, %p2416_p8 }
 0xd07   : > { %2426 = shalt.err (!%p2423_p0)
}
 0xd08   : > { %s2471_s21 = smov 128   ;;  %s2472_s25 = smov 8  }
 0xd09   : > { %2227 = dma.vmem_to_hbm [thread:$0]  (%p2596_p5), %s2981_s27, 256, %s2979_s1, %s2983_s28, %s2471_s21, %s2471_s21, %s2472_s25  }
 0xd0a PF: > { %s3063_s16 = sld [smem:[#allocation8_spill]]  ;;  %s3064_s29 = sld [smem:[#allocation6_spill]] }
 0xd10   : > { %p2233_p1 = scmp.ge.s32.totalorder %s3063_s16, 2  ;;  %s1933_s30 = sand.u32 1, %s3064_s29  }
 0xd11   : > { %s1934_s20 = scalar_lea.sflag [#allocation4], %s1933_s30 }
 0xd12   : > { %p2230_p2 = pnand %p2233_p1, %p2600_p6 }
 0xd14   : > { %2444 = dma.done.wait (!%p2230_p2), %s1934_s20, 256  }
 0xd15   : > { %2446 = vsyncadd (!%p2230_p2), %s1934_s20, 4294967040  ;;  %s3066_s24 = sld [smem:[#allocation9_spill]]  ;;  %s3067_s18 = sld [smem:[#allocation7_spill]] }
 0xd16   : > { %s3068_s23 = sld [smem:[#allocation10_spill]]  ;;  %s3069_s21 = smov %s2453_s22 }
 0xd1b   : > { %p26_p3 = scmp.ge.s32.totalorder %s3066_s24, 4   ;;  %s3070_s22 = smov %s3067_s18 }
 0xd1d   :  { %28 = sbr.rel (!%p26_p3) target bundleno = 7 (0x7), region = 122 }
 0xd24   :  { %1939 = vsyncpa [#allocation4], 1 }
 0xd25   :  { %1941 = vsyncpa [#allocation4 + $0x1], 1 }

// kernel: encoder_forward.2
= control target key start
LH: loop header
LB: loop body
LE: loop exit
PB: predicated region body
PF: predicated region fallthrough
CT: control target
= control target key end

     0   :  { %s3197_s0 = inlined_call_operand.hbm [shape: f32[2,16,128], index: 0, kind: input, shape index: {}]   ;;  %s3198_s1 = inlined_call_operand.vmem [shape: f32[2,1,16], index: 1, kind: input, shape index: {}]   ;;  %s3199_s2 = inlined_call_operand.hbm [shape: bf16[128,384], index: 2, kind: input, shape index: {}]   ;;  %s3200_s3 = inlined_call_operand.vmem [shape: f32[1,384], index: 3, kind: input, shape index: {}]   ;;  %s3201_s4 = inlined_call_operand.hbm [shape: bf16[128,128], index: 4, kind: input, shape index: {}]   ;;  %s3202_s5 = inlined_call_operand.vmem [shape: f32[1,128], index: 5, kind: input, shape index: {}]   ;;  %s3203_s6 = inlined_call_operand.vmem [shape: f32[1,128], index: 6, kind: input, shape index: {}]   ;;  %s3204_s7 = inlined_call_operand.vmem [shape: f32[1,128], index: 7, kind: input, shape index: {}]   ;;  %s3205_s8 = inlined_call_operand.hbm [shape: bf16[128,256], index: 8, kind: input, shape index: {}]   ;;  %s3206_s9 = inlined_call_operand.vmem [shape: f32[1,256], index: 9, kind: input, shape index: {}]   ;;  %s3207_s10 = inlined_call_operand.hbm [shape: bf16[256,128], index: 10, kind: input, shape index: {}]   ;;  %s3208_s11 = inlined_call_operand.vmem [shape: f32[1,128], index: 11, kind: input, shape index: {}]   ;;  %s3209_s12 = inlined_call_operand.vmem [shape: f32[1,128], index: 12, kind: input, shape index: {}]   ;;  %s3210_s13 = inlined_call_operand.vmem [shape: f32[1,128], index: 13, kind: input, shape index: {}]   ;;  %s3211_s14 = inlined_call_operand.vmem [shape: f32[1,128], index: 14, kind: input, shape index: {}]   ;;  %s3212_s15 = inlined_call_operand.vmem [shape: f32[1,128], index: 15, kind: input, shape index: {}]   ;;  %s3213_s16 = inlined_call_operand.vmem [shape: f32[2,16,128], index: 16, kind: output, shape index: {}]  }
   0x1   :  { %3220 = sst [smem:[#allocation14_spill]] %s3197_s0 }
   0x2   :  { %3221 = sst [smem:[#allocation15_spill]] %s3199_s2 }
   0x3   :  { %3222 = sst [smem:[#allocation16_spill]] %s3208_s11 }
   0x4   :  { %3223 = sst [smem:[#allocation17_spill]] %s3209_s12 }
   0x5   :  { %3224 = sst [smem:[#allocation18_spill]] %s3210_s13 }
   0x6   :  { %3225 = sst [smem:[#allocation19_spill]] %s3213_s16 }
   0x7   :  { %21 = vsyncpa [#allocation4], 0 }
   0x8   :  { %23 = vsyncpa [#allocation4 + $0x1], 0 }
   0x9   :  { %24 = vsyncpa [#allocation6], 0 }
   0xa   :  { %25 = vsyncpa [#allocation9], 0  ;;  %s2804_s21 = smov 0   ;;  %s2806_s22 = smov 0  }
   0xb   :  { %s2808_s23 = smov 0   ;;  %s2810_s24 = smov 0  }
   0xc LB: > { %s2823_s14 = sadd.s32 4294967295, %s2699_s24   ;;  %p51_p0 = scmp.ne.s32.totalorder %s2691_s22, %s2687_s21  ;;  %s2699_s24 = sphi %s2810_s24, %s3249_s24   ;;  %s2695_s23 = sphi %s2808_s23, %s3248_s23   ;;  %s2691_s22 = sphi %s2806_s22, %s3247_s22   ;;  %s2687_s21 = sphi %s2804_s21, %s3246_s21  }
   0xd   : > { %p3215_p1 = scmp.eq.s32.totalorder %s2823_s14, 0  ;;  %p2059_p2 = scmp.ge.s32.totalorder %s2699_s24, 1 }
   0xe   : > { %p408_p3 = scmp.lt.s32.totalorder %s2699_s24, 3  ;;  %s2701_s26 = smov [#allocation5]  }
   0xf   : > { %p2831_p4 = por %p3215_p1, %p51_p0  ;;  %s420_s27 = sshll.u32 %s2701_s26, 4  ;;  %s421_s27 = int_to_ptr.vmem [resolvable:$true] %s420_s27 }
  0x10   : > { %p2835_p5 = pnand %p2059_p2, %p408_p3  ;;  %s2702_s29 = smov [#allocation8]  }
  0x11   : > { %s3226_s15 = scalar_select %p2831_p4, 1, 0 }
  0x12   : > { %s3227_s25 = scalar_select %p2835_p5, 1, 0 }
  0x13   : > { %p2320_p6 = pneg %p2835_p5  ;;  %s458_s30 = sshll.u32 %s2702_s29, 4  ;;  %s2847_s30 = int_to_ptr.vmem [resolvable:$true] %s458_s30 }
  0x14   : > { %s3229_s2 = sld [smem:[#allocation15_spill]] }
  0x15   : > { %p2843_p7 = pnand %p2320_p6, %p3215_p1 }
  0x17   : > { %p2857_p9 = pneg %p2843_p7 }
  0x1a   : > { %s2515_s18 = scalar_lea.hbm %s3229_s2, 3072 }
  0x1b   : > { %p2516_p8 = scmp.ne.s32.totalorder %s3229_s2, %s2515_s18  ;;  %p2522_p12 = scmp.lt.u32.totalorder %s2515_s18, %s3229_s2 }
  0x1d   : > { %p2518_p10 = pnand %p2857_p9, %p2516_p8 }
  0x1f   : > { %p2519_p11 = pneg %p2518_p10 }
  0x21   : > { %p2524_p13 = pnand %p2522_p12, %p2519_p11 }
  0x23   : > { %2527 = shalt.err (!%p2524_p13)
}
  0x24   : > { %s2528_s0 = scalar_lea.vmem %s421_s27, 3072  ;;  %p2536_p6 = scmp.lt.s32.totalorder %s421_s27, %s421_s27 }
  0x25   : > { %p2529_p0 = scmp.ne.s32.totalorder %s421_s27, %s2528_s0  ;;  %p2537_p1 = scmp.lt.s32.totalorder %s2528_s0, %s2528_s0 }
  0x27   : > { %p2531_p2 = pnand %p2529_p0, %p2857_p9  ;;  %p2538_p4 = por %p2537_p1, %p2536_p6 }
  0x29   : > { %p2532_p3 = pneg %p2531_p2 }
  0x2b   : > { %p2539_p5 = pnand %p2538_p4, %p2532_p3 }
  0x2d   : > { %2542 = shalt.err (!%p2539_p5)
}
  0x2e   : > { %s2703_s17 = smov 192   ;;  %s2704_s19 = smov 12  }
  0x2f   : > { %2323 = dma.hbm_to_vmem [thread:$0]  (!%p2843_p7), %s3229_s2, 3072, %s421_s27, [#allocation6], %s2703_s17, %s2703_s17, %s2704_s19  }
  0x30   : > { %s2543_s16 = scalar_lea.hbm %s3205_s8, 2048 }
  0x31   : > { %p2544_p8 = scmp.ne.s32.totalorder %s3205_s8, %s2543_s16  ;;  %p2550_p5 = scmp.lt.u32.totalorder %s2543_s16, %s3205_s8 }
  0x33   : > { %p2546_p1 = pnand %p2544_p8, %p2857_p9 }
  0x35   : > { %p2547_p4 = pneg %p2546_p1 }
  0x37   : > { %p2552_p10 = pnand %p2550_p5, %p2547_p4 }
  0x39   : > { %2555 = shalt.err (!%p2552_p10)
}
  0x3a   : > { %s2556_s27 = scalar_lea.vmem %s2847_s30, 2048  ;;  %p2564_p0 = scmp.lt.s32.totalorder %s2847_s30, %s2847_s30 }
  0x3b   : > { %p2557_p11 = scmp.ne.s32.totalorder %s2847_s30, %s2556_s27  ;;  %p2565_p2 = scmp.lt.s32.totalorder %s2556_s27, %s2556_s27 }
  0x3d   : > { %p2559_p12 = pnand %p2557_p11, %p2857_p9  ;;  %p2566_p3 = por %p2565_p2, %p2564_p0 }
  0x3f   : > { %p2560_p13 = pneg %p2559_p12 }
  0x41   : > { %p2567_p6 = pnand %p2566_p3, %p2560_p13 }
  0x43   : > { %2570 = shalt.err (!%p2567_p6)
}
  0x44   : > { %s3218_s12 = smov 128   ;;  %s3219_s11 = smov 8  }
  0x45   : > { %2329 = dma.hbm_to_vmem [thread:$0]  (!%p2843_p7), %s3205_s8, 2048, %s2847_s30, [#allocation9], %s3218_s12, %s3218_s12, %s3219_s11  }
  0x46   : > { %s2707_s17 = smov [#allocation7]   ;;  %s2571_s26 = scalar_lea.hbm %s3201_s4, 1024 }
  0x47   : > { %s436_s19 = sshll.u32 %s2707_s17, 4  ;;  %p2572_p8 = scmp.ne.s32.totalorder %s3201_s4, %s2571_s26  ;;  %s437_s19 = int_to_ptr.vmem [resolvable:$true] %s436_s19 }
  0x48   : > { %p2578_p5 = scmp.lt.u32.totalorder %s2571_s26, %s3201_s4 }
  0x49   : > { %p2574_p1 = pnand %p2572_p8, %p2857_p9 }
  0x4b   : > { %p2575_p4 = pneg %p2574_p1 }
  0x4d   : > { %p2580_p10 = pnand %p2578_p5, %p2575_p4 }
  0x4f   : > { %2583 = shalt.err (!%p2580_p10)
}
  0x50   : > { %s2584_s30 = scalar_lea.vmem %s437_s19, 1024  ;;  %p2592_p0 = scmp.lt.s32.totalorder %s437_s19, %s437_s19 }
  0x51   : > { %p2585_p11 = scmp.ne.s32.totalorder %s437_s19, %s2584_s30  ;;  %p2593_p2 = scmp.lt.s32.totalorder %s2584_s30, %s2584_s30 }
  0x53   : > { %p2587_p12 = pnand %p2585_p11, %p2857_p9  ;;  %p2594_p3 = por %p2593_p2, %p2592_p0 }
  0x55   : > { %p2588_p13 = pneg %p2587_p12 }
  0x57   : > { %p2595_p6 = pnand %p2594_p3, %p2588_p13 }
  0x59   : > { %2598 = shalt.err (!%p2595_p6)
}
  0x5a   : > { %s2708_s13 = smov 64   ;;  %s2709_s16 = smov 4  }
  0x5b   : > { %2326 = dma.hbm_to_vmem [thread:$0]  (!%p2843_p7), %s3201_s4, 1024, %s437_s19, [#allocation6], %s2708_s13, %s2708_s13, %s2709_s16  }
  0x5c   : > { %s2710_s20 = smov [#allocation10]   ;;  %s2599_s0 = scalar_lea.hbm %s3207_s10, 2048 }
  0x5d   : > { %s474_s18 = sshll.u32 %s2710_s20, 4  ;;  %p2600_p8 = scmp.ne.s32.totalorder %s3207_s10, %s2599_s0  ;;  %s475_s18 = int_to_ptr.vmem [resolvable:$true] %s474_s18 }
  0x5e   : > { %p2606_p5 = scmp.lt.u32.totalorder %s2599_s0, %s3207_s10 }
  0x5f   : > { %p2602_p1 = pnand %p2600_p8, %p2857_p9 }
  0x61   : > { %p2603_p4 = pneg %p2602_p1 }
  0x63   : > { %p2608_p10 = pnand %p2606_p5, %p2603_p4 }
  0x65   : > { %2611 = shalt.err (!%p2608_p10)
}
  0x66   : > { %s2612_s19 = scalar_lea.vmem %s475_s18, 2048  ;;  %p2620_p0 = scmp.lt.s32.totalorder %s475_s18, %s475_s18 }
  0x67   : > { %p2613_p11 = scmp.ne.s32.totalorder %s475_s18, %s2612_s19  ;;  %p2621_p2 = scmp.lt.s32.totalorder %s2612_s19, %s2612_s19 }
  0x69   : > { %p2615_p12 = pnand %p2613_p11, %p2857_p9  ;;  %p2622_p3 = por %p2621_p2, %p2620_p0 }
  0x6b   : > { %p2616_p13 = pneg %p2615_p12 }
  0x6d   : > { %p2623_p6 = pnand %p2622_p3, %p2616_p13 }
  0x6f   : > { %2626 = shalt.err (!%p2623_p6)
}
  0x70   : > { %2332 = dma.hbm_to_vmem [thread:$0]  (!%p2843_p7), %s3207_s10, 2048, %s475_s18, [#allocation9], %s2708_s13, %s2708_s13, %s2709_s16  }
  0x71   : > { %s2936_s21 = sadd.s32 1, %s2699_s24   ;;  %s38_s12 = sadd.s32 1, %s2695_s23 }
  0x72   : > { %s35_s11 = ssub.s32 %s2699_s24, %s2936_s21  ;;  %p45_p9 = scmp.ne.s32.totalorder %s2695_s23, %s2691_s22 }
  0x73   : > { %p36_p8 = scmp.eq.s32.totalorder %s35_s11, 0  ;;  %p46_p1 = scmp.eq.s32.totalorder %s2699_s24, 0 }
  0x74   : > { %p2341_p4 = scmp.lt.s32.totalorder %s2699_s24, 2  ;;  %s503_s28 = sand.u32 1, %s2695_s23  }
  0x75   : > { %s2947_s20 = scalar_select %p36_p8, %s2695_s23, %s38_s12  }
  0x76   : > { %p47_p5 = por %p46_p1, %p45_p9  ;;  %s2065_s26 = sshll.u32 %s503_s28, 4 }
  0x77   : > { %s2156_s29 = sshll.u32 %s2699_s24, 8  ;;  %s3231_s30 = sld [smem:[#allocation14_spill]] }
  0x78   : > { %s507_s13 = scalar_lea.vmem [#allocation3], %s2065_s26  ;;  %p2955_p7 = pnand %p2341_p4, %p47_p5 }
  0x79   : > { %s514_s16 = sshll.u32 %s507_s13, 4  ;;  %s2961_s24 = scalar_lea.sflag [#allocation4], %s503_s28  ;;  %s2959_s16 = int_to_ptr.vmem [resolvable:$true] %s514_s16 }
  0x7a   : > { %p2629_p11 = pneg %p2955_p7 }
  0x7d   : > { %s2953_s19 = scalar_lea.hbm %s3231_s30, %s2156_s29  ;;  %s2632_s11 = scalar_lea.hbm %s3231_s30, 512 }
  0x7e   : > { %s2627_s2 = scalar_lea.hbm %s2953_s19, 256  ;;  %p2633_p0 = scmp.lt.u32.totalorder %s2953_s19, %s3231_s30 }
  0x7f   : > { %p2628_p10 = scmp.ne.s32.totalorder %s2953_s19, %s2627_s2  ;;  %p2634_p2 = scmp.lt.u32.totalorder %s2632_s11, %s2627_s2 }
  0x80   : > { %p2636_p6 = scmp.lt.u32.totalorder %s2627_s2, %s2953_s19 }
  0x81   : > { %p2630_p12 = pnand %p2629_p11, %p2628_p10  ;;  %p2635_p3 = por %p2634_p2, %p2633_p0 }
  0x83   : > { %p2631_p13 = pneg %p2630_p12  ;;  %p2637_p9 = por %p2636_p6, %p2635_p3 }
  0x85   : > { %p2638_p8 = pnand %p2637_p9, %p2631_p13 }
  0x87   : > { %2641 = shalt.err (!%p2638_p8)
}
  0x88   : > { %s2642_s28 = scalar_lea.vmem %s2959_s16, 256  ;;  %s2711_s0 = smov [#allocation3]  }
  0x89   : > { %p2643_p1 = scmp.ne.s32.totalorder %s2959_s16, %s2642_s28  ;;  %s2647_s27 = sshll.u32 %s2711_s0, 4  ;;  %s2648_s27 = int_to_ptr.vmem [resolvable:$false] %s2647_s27 }
  0x8a   : > { %s2649_s13 = scalar_lea.vmem %s2648_s27, 512  ;;  %p2650_p10 = scmp.lt.s32.totalorder %s2959_s16, %s2648_s27 }
  0x8b   : > { %p2645_p4 = pnand %p2643_p1, %p2629_p11  ;;  %p2651_p12 = scmp.lt.s32.totalorder %s2649_s13, %s2642_s28 }
  0x8d   : > { %p2646_p5 = pneg %p2645_p4  ;;  %p2652_p0 = por %p2651_p12, %p2650_p10 }
  0x8f   : > { %p2653_p2 = pnand %p2652_p0, %p2646_p5 }
  0x91   : > { %2656 = shalt.err (!%p2653_p2)
}
  0x92   : > { %s3233_s2 = smov 8   ;;  %s3234_s17 = smov 128  }
  0x93   : > { %2336 = dma.hbm_to_vmem [thread:$0]  (!%p2955_p7), %s2953_s19, 256, %s2959_s16, %s2961_s24, %s3234_s17, %s3234_s17, %s3233_s2  }
  0x94   : > { %p3235_p11 = scmp.ne.s32.totalorder %s3227_s25, 0 }
  0x95   : > { %s534_s12 = sand.u32 (!%p3235_p11), 1, %s2691_s22   ;;  %p3236_p13 = scmp.ne.s32.totalorder (!%p3235_p11), %s3226_s15, 0 }
  0x96   : > { %532 = sbr.rel (%p3235_p11) target bundleno = 3157 (0xc55), region = 84  ;;  %s2995_s11 = sshll.u32 (!%p3235_p11), %s534_s12, 4 }
  0x97   : > { %s535_s26 = scalar_lea.sflag (!%p3235_p11), [#allocation4], %s534_s12  ;;  %s538_s29 = scalar_lea.vmem (!%p3235_p11), [#allocation3], %s2995_s11 }
  0x9d   : > { %2674 = dma.done.wait (%p3236_p13), %s535_s26, 256  }
  0x9e   : > { %2676 = vsyncadd (%p3236_p13), %s535_s26, 4294967040  ;;  %p3237_p3 = scmp.eq.s32.totalorder %s2823_s14, 0 }
  0xa0   : > { %2678 = dma.done.wait (%p3237_p3), [#allocation6], 4096   ;;  %p3238_p7 = pmov %p3237_p3 }
  0xa1   : > { %p3239_p6 = pmov %p3237_p3 }
  0xa2   : > { %2680 = vsyncadd (%p3238_p7), [#allocation6], 4294963200 }
  0xa3   : > { %2682 = dma.done.wait (%p3239_p6), [#allocation9], 4096   ;;  %p3240_p9 = pmov %p3237_p3 }
  0xa4   : > { %v2712_v0 = vmov 0   ;;  %v2713_v1 = vmov 0.0   ;;  %v2395_v2 = vld [vmem:[#allocation5 + $0x4] ss:$12 sps:$4 sm:$0xff]   ;;  %v2397_v3 = vld [vmem:[#allocation5] ss:$12 sps:$4 sm:$0xff]   ;;  %v655_v29 = vlaneseq }
  0xa5   : > { %2684 = vsyncadd (%p3240_p9), [#allocation9], 4294963200  ;;  %830 = vmatprep.mubr.bf16.mxu0 %v2712_v0  ;;  %2214 = vmatprep.subr.bf16.mxu1 %v2713_v1  ;;  %v2398_v4 = vld [vmem:[#allocation5 + $0x1c] ss:$12 sps:$4 sm:$0xff]   ;;  %v2400_v5 = vld [vmem:[#allocation5 + $0x18] ss:$12 sps:$4 sm:$0xff]  }
  0xa6   : > { %798 = vmatprep.subr.bf16.mxu0 %v2395_v2  ;;  %v2401_v6 = vld [vmem:[#allocation5 + $0x34] ss:$12 sps:$4 sm:$0xff]   ;;  %v2403_v7 = vld [vmem:[#allocation5 + $0x30] ss:$12 sps:$4 sm:$0xff]   ;;  %v2404_v8 = vld [vmem:[#allocation5 + $0x4c] ss:$12 sps:$4 sm:$0xff]  }
  0xa7   : > { %799 = vmatpush1.bf16.msra.mxu0 %v2397_v3  ;;  %v2406_v9 = vld [vmem:[#allocation5 + $0x48] ss:$12 sps:$4 sm:$0xff]   ;;  %v2407_v10 = vld [vmem:[#allocation5 + $0x64] ss:$12 sps:$4 sm:$0xff]   ;;  %v2420_v12 = vld [vmem:[#allocation5 + $0x20] ss:$12 sps:$4 sm:$0xff]  }
  0xa8   : > { %800 = vmatprep.subr.bf16.mxu0 %v2398_v4  ;;  %v2419_v11 = vld [vmem:[#allocation5 + $0x8] ss:$12 sps:$4 sm:$0xff]   ;;  %v2409_v13 = vld [vmem:[#allocation5 + $0x60] ss:$12 sps:$4 sm:$0xff]   ;;  %v2412_v15 = vld [vmem:[#allocation5 + $0x78] ss:$12 sps:$4 sm:$0xff]  }
  0xa9   : > { %2215 = vmatpush3.bf16.msra.mxu1 %v2419_v11  ;;  %v2410_v14 = vld [vmem:[#allocation5 + $0x7c] ss:$12 sps:$4 sm:$0xff]   ;;  %v2413_v16 = vld [vmem:[#allocation5 + $0x94] ss:$12 sps:$4 sm:$0xff]   ;;  %v2421_v17 = vld [vmem:[#allocation5 + $0x38] ss:$12 sps:$4 sm:$0xff]  }
  0xaa   : > { %2216 = vmatprep.subr.bf16.mxu1 %v2713_v1  ;;  %v2422_v18 = vld [vmem:[#allocation5 + $0x50] ss:$12 sps:$4 sm:$0xff]   ;;  %v2416_v20 = vld [vmem:[#allocation5 + $0xac] ss:$12 sps:$4 sm:$0xff]   ;;  %v2423_v21 = vld [vmem:[#allocation5 + $0x68] ss:$12 sps:$4 sm:$0xff]  }
  0xab   : > { %801 = vmatpush1.bf16.msra.mxu0 %v2400_v5  ;;  %v2415_v19 = vld [vmem:[#allocation5 + $0x90] ss:$12 sps:$4 sm:$0xff]   ;;  %v2418_v22 = vld [vmem:[#allocation5 + $0xa8] ss:$12 sps:$4 sm:$0xff]   ;;  %v2424_v25 = vld [vmem:[#allocation5 + $0x80] ss:$12 sps:$4 sm:$0xff]  }
  0xac   : > { %802 = vmatprep.subr.bf16.mxu0 %v2401_v6  ;;  %v3017_v23 = vld [vmem:[%s538_s29] sm:$0xff]  ;;  %v3021_v24 = vld [vmem:[%s538_s29 + $0x8] sm:$0xff]  ;;  %vm2714_vm0 = vmmov 0   ;;  %v3037_v30 = vshrl.u32 %v655_v29, 7  ;;  %vm891_vm1 = vcmask 261120   ;;  %p606_p8 = scmp.lt.s32.totalorder %s2823_s14, 1 }
  0xad   : > { %2217 = vmatpush3.bf16.msra.mxu1 %v2420_v12  ;;  %v617_v26 = vpack.c.bf16 %v3021_v24, %v3017_v23  ;;  %v2425_v27 = vld [vmem:[#allocation5 + $0x98] ss:$12 sps:$4 sm:$0xff]   ;;  %v2426_v28 = vld [vmem:[#allocation5 + $0xb0] ss:$12 sps:$4 sm:$0xff]   ;;  %2230 = vmatprep.mubr.msk.bf16.mxu1 %vm2714_vm0, %v2713_v1  ;;  %v2715_v57 = vmov -1e+09  }
  0xae   : > { %2218 = vmatprep.subr.bf16.mxu1 %v2713_v1  ;;  %v3040_v31 = vsub.s32 0, %v3037_v30  ;;  %v653_v32 = vld [vmem:[%s3200_s3] sm:$0x7]  ;;  %v661_v33 = vsub.s32 1, %v3037_v30  ;;  %v665_v47 = vsub.s32 2, %v3037_v30  ;;  %s3251_s14 = smov (!%p606_p8, %s2823_s14), 1 }
  0xaf   : > { %803 = vmatpush1.bf16.msra.mxu0 %v2403_v7  ;;  %s608_s18 = scalar_lea.vmem %s3198_s1, %s3251_s14  ;;  %vm939_vm3 = vcmask 130048   ;;  %s2716_s24 = smov 96   ;;  %vm1141_vm4 = vcmask 523520   ;;  %vm1273_vm5 = vcmask 785920   ;;  %vm1405_vm6 = vcmask 1048320  }
  0xb0   : > { %804 = vmatprep.subr.bf16.mxu0 %v2404_v8  ;;  %v658_v34 = vrot.slane %v653_v32, %v3040_v31  ;;  %v662_v36 = vrot.slane %v653_v32, %v661_v33  ;;  %v666_v48 = vrot.slane %v653_v32, %v665_v47  ;;  %v618_v56 = vld [vmem:[%s608_s18] sm:$0x1]  ;;  %s2717_s28 = smov 32   ;;  %s2718_s0 = smov 64  }
  0xb1   : > { %2219 = vmatpush3.bf16.msra.mxu1 %v2421_v17  ;;  %vm619_vm2 = vcmp.gt.f32.partialorder %v618_v56, 0.5  ;;  %s3241_s19 = sld [smem:[#allocation16_spill]]  ;;  %s3243_s13 = sld [smem:[#allocation18_spill]] }
  0xb2   : > { %2220 = vmatprep.subr.bf16.mxu1 %v2713_v1  ;;  %v620_v58 = vsel %vm619_vm2, 0.0, %v2715_v57  ;;  %s3244_s12 = sld [smem:[#allocation19_spill]] }
  0xb3   : > { %805 = vmatpush1.bf16.msra.mxu0 %v2406_v9  ;;  %v3068_v59 = vrot.slane %v620_v58, %v3040_v31 }
  0xb4   : > { %806 = vmatprep.subr.bf16.mxu0 %v2407_v10 }
  0xb5   : > { %2221 = vmatpush3.bf16.msra.mxu1 %v2422_v18 }
  0xb6   : > { %2222 = vmatprep.subr.bf16.mxu1 %v2713_v1 }
  0xb7   : > { %807 = vmatpush1.bf16.msra.mxu0 %v2409_v13  ;;  %v2135_v30 = vld [vmem:[%s3241_s19] ss:$0 sm:$0xff] }
  0xb8   : > { %808 = vmatprep.subr.bf16.mxu0 %v2410_v14 }
  0xb9   : > { %2223 = vmatpush3.bf16.msra.mxu1 %v2423_v21 }
  0xba   : > { %2224 = vmatprep.subr.bf16.mxu1 %v2713_v1 }
  0xbb   : > { %809 = vmatpush1.bf16.msra.mxu0 %v2412_v15 }
  0xbc   : > { %810 = vmatprep.subr.bf16.mxu0 %v2413_v16 }
  0xbd   : > { %2225 = vmatpush3.bf16.msra.mxu1 %v2424_v25 }
  0xbe   : > { %2226 = vmatprep.subr.bf16.mxu1 %v2713_v1 }
  0xbf   : > { %811 = vmatpush1.bf16.msra.mxu0 %v2415_v19 }
  0xc0   : > { %812 = vmatprep.subr.bf16.mxu0 %v2416_v20 }
  0xc1   : > { %2227 = vmatpush3.bf16.msra.mxu1 %v2425_v27 }
  0xc2   : > { %2228 = vmatprep.subr.bf16.mxu1 %v2713_v1 }
  0xc3   : > { %813 = vmatpush1.bf16.msra.mxu0 %v2418_v22 }
  0xc4   : > { %2258 = vmatprep.subr.bf16.mxu0 %v2713_v1 }
  0xc5   : > { %2229 = vmatpush3.bf16.msra.mxu1 %v2426_v28 }
  0xc6   : > { %831 = vmatmul.mubr.bf16.vlgmr.msra.gmra.mrb[0].mxu0 %v617_v26  ;;  %2234 = vmatprep.subr.bf16.mxu1 %v2713_v1 }
  0xc7   : > { %2260 = vmatprep.mubr.msk.bf16.mxu0 %vm2714_vm0, %v2713_v1 }
  0xc8   : > { %2231 = vmatmul.mubr.bf16.vlgmr.msra.gmra.mrb[0].mxu1 %v617_v26 }
  0xc9   : > { %2236 = vmatprep.mubr.msk.bf16.mxu1 %vm2714_vm0, %v2713_v1 }
 0x199   : > { %v832_v35 = vpop.f32.mrb[0].mxu0 }
 0x19a   : > { %v834_v37 = vpop.f32.mrb[1].mxu0  ;;  %v833_v39 = vadd.f32 %v832_v35, %v658_v34 }
 0x19b   : > { %v836_v38 = vpop.f32.mrb[2].mxu0  ;;  %v835_v42 = vadd.f32 %v834_v37, %v662_v36  ;;  %v875_v49 = vpop.f32.mrb[0].mxu1 }
 0x19c   : > { %v837_v40 = vadd.f32 %v836_v38, %v658_v34  ;;  %v838_v41 = vpop.f32.mrb[3].mxu0  ;;  %v876_v50 = vadd.f32 %v875_v49, %v666_v48  ;;  %v2232_v51 = vpop.f32.mrb[1].mxu1 }
 0x19d   : > { %v839_v43 = vadd.f32 %v838_v41, %v662_v36  ;;  %v878_v52 = vpop.f32.mrb[2].mxu1 }
 0x19e   : > { %v882_v44 = vpack.c.bf16 %v837_v40, %v833_v39  ;;  %v879_v53 = vadd.f32 %v878_v52, %v666_v48  ;;  %v2233_v54 = vpop.f32.mrb[3].mxu1 }
 0x19f   : > { %v883_v45 = vpack.c.bf16 %v839_v43, %v835_v42 }
 0x1a0   : > { %v3055_v55 = vpack.c.bf16 %v879_v53, %v876_v50 }
 0x1a1   : > { %v896_v46 = vsel %vm891_vm1, %v883_v45, 0 }
 0x1a2   : > { %2235 = vmatpush3.bf16.xpose.msra.mxu1 %v896_v46 }
 0x1a3   : > { %2240 = vmatprep.subr.bf16.mxu1 %v2713_v1 }
 0x1a9   : > { %2237 = vmatmul.mubr.msk.bf16.vlgmr.msra.gmra.mrb[4].mxu1 %vm891_vm1, %v882_v44 }
 0x1aa   : > { %2242 = vmatprep.mubr.msk.bf16.mxu1 %vm2714_vm0, %v2713_v1  ;;  %2241 = vmatpush3.bf16.msra.mxu1 %v3055_v55 }
 0x1ab   : > { %2246 = vmatprep.subr.bf16.mxu1 %v2713_v1 }
 0x27c   : > { %v932_v60 = vpop.f32.mrb[4].mxu1 }
 0x27d   : > { %v933_v61 = vadd.f32 %v932_v60, %v3068_v59  ;;  %v2238_v62 = vpop.f32.mrb[5].mxu1 }
 0x27e   : > { %v935_v63 = vpop.f32.mrb[6].mxu1 }
 0x27f   : > { %v936_v2 = vadd.f32 %v935_v63, %v3068_v59  ;;  %v2239_v3 = vpop.f32.mrb[7].mxu1  ;;  %v940_v4 = vsel %vm939_vm3, %v933_v61, -inf }
 0x280   : > { %941 = vmax.xlane.f32.xlu0 %v940_v4 }
 0x281   : > { %v943_v5 = vsel %vm939_vm3, %v936_v2, -inf }
 0x284   : > { %944 = vmax.xlane.f32.xlu0 %v943_v5 }
 0x29a   : > { %1013 = vrot.lane.b32.xlu0 %v883_v45, %s2716_s24 }
 0x29e   : > { %1278 = vrot.lane.b32.xlu0 %v883_v45, %s2717_s28 }
 0x30d   : > { %v942_v6 = vpop.xlane.xlu0 %941 }
 0x30e   : > { %v946_v7 = vsub.f32 %v933_v61, %v942_v6 }
 0x310   : > { %v948_v8 = vmul.f32 1.442695, %v946_v7 }
 0x311   : > { %v945_v9 = vpop.xlane.xlu0 %944 }
 0x312   : > { %2475 = vpow2.f32 %v948_v8  ;;  %v947_v10 = vsub.f32 %v936_v2, %v945_v9 }
 0x314   : > { %v950_v11 = vmul.f32 1.442695, %v947_v10 }
 0x315   : > { %v1014_v19 = vpop.permute.xlu0 %1013 }
 0x316   : > { %2477 = vpow2.f32 %v950_v11  ;;  %v1019_v32 = vsel %vm891_vm1, %v1014_v19, 0 }
 0x319   : > { %v1279_v28 = vpop.permute.xlu0 %1278 }
 0x31a   : > { %v1284_v35 = vsel %vm891_vm1, %v1279_v28, 0 }
 0x31c   : > { %v2476_v12 = vpop.eup %2475 }
 0x31d   : > { %v952_v13 = vsel %vm939_vm3, %v2476_v12, 0.0 }
 0x31e   : > { %953 = vadd.xlane.f32.xlu1 %v952_v13 }
 0x320   : > { %v2478_v14 = vpop.eup %2477 }
 0x321   : > { %v955_v15 = vsel %vm939_vm3, %v2478_v14, 0.0 }
 0x322   : > { %956 = vadd.xlane.f32.xlu1 %v955_v15 }
 0x333   : > { %1010 = vrot.lane.b32.xlu1 %v882_v44, %s2716_s24 }
 0x337   : > { %1146 = vrot.lane.b32.xlu1 %v883_v45, %s2718_s0 }
 0x33b   : > { %1144 = vrot.lane.b32.xlu1 %v882_v44, %s2718_s0 }
 0x33f   : > { %1276 = vrot.lane.b32.xlu1 %v882_v44, %s2717_s28 }
 0x3ab   : > { %v954_v16 = vpop.xlane.xlu1 %953 }
 0x3ac   : > { %2479 = vrcp.f32 %v954_v16 }
 0x3af   : > { %v957_v17 = vpop.xlane.xlu1 %956 }
 0x3b0   : > { %2481 = vrcp.f32 %v957_v17 }
 0x3b3   : > { %v1011_v18 = vpop.permute.xlu1 %1010 }
 0x3b6   : > { %v2480_v21 = vpop.eup %2479 }
 0x3b7   : > { %v1147_v20 = vpop.permute.xlu1 %1146  ;;  %v959_v26 = vmul.f32 %v2480_v21, %v2476_v12 }
 0x3b8   : > { %v1152_v22 = vsel %vm891_vm1, %v1147_v20, 0 }
 0x3b9   : > { %2259 = vmatpush3.bf16.xpose.msra.mxu0 %v1152_v22 }
 0x3ba   : > { %v2482_v25 = vpop.eup %2481  ;;  %2270 = vmatprep.subr.bf16.mxu0 %v2713_v1 }
 0x3bb   : > { %v961_v27 = vmul.f32 %v2482_v25, %v2478_v14  ;;  %v1145_v34 = vpop.permute.xlu1 %1144 }
 0x3bd   : > { %v962_v29 = vpack.c.bf16 %v961_v27, %v959_v26 }
 0x3bf   : > { %2243 = vmatmul.mubr.msk.bf16.vlgmr.msra.gmra.mrb[8].mxu1 %vm939_vm3, %v962_v29  ;;  %v1277_v36 = vpop.permute.xlu1 %1276 }
 0x3c0   : > { %2247 = vmatpush3.bf16.xpose.msra.mxu1 %v1019_v32  ;;  %2261 = vmatmul.mubr.msk.bf16.vlgmr.msra.gmra.mrb[4].mxu0 %vm891_vm1, %v1145_v34 }
 0x3c1   : > { %2271 = vmatpush3.bf16.xpose.msra.mxu0 %v1284_v35  ;;  %2248 = vmatprep.mubr.msk.bf16.mxu1 %vm2714_vm0, %v2713_v1 }
 0x3c2   : > { %2272 = vmatprep.mubr.msk.bf16.mxu0 %vm2714_vm0, %v2713_v1  ;;  %2252 = vmatprep.subr.bf16.mxu1 %v2713_v1 }
 0x3c3   : > { %2282 = vmatprep.subr.bf16.mxu0 %v2713_v1 }
 0x3c7   : > { %2249 = vmatmul.mubr.msk.bf16.vlgmr.msra.gmra.mrb[12].mxu1 %vm891_vm1, %v1011_v18 }
 0x3c8   : > { %2273 = vmatmul.mubr.msk.bf16.vlgmr.msra.gmra.mrb[8].mxu0 %vm891_vm1, %v1277_v36  ;;  %2254 = vmatprep.mubr.msk.bf16.mxu1 %vm2714_vm0, %v2713_v1 }
 0x3c9   : > { %2298 = vmatprep.mubr.msk.bf16.mxu0 %vm2714_vm0, %v2713_v1 }
 0x492   : > { %v1000_v37 = vpop.f32.mrb[8].mxu1 }
 0x493   : > { %1007 = vst.msk [vmem:[#allocation2] sm:$0xff] %vm891_vm1, %v1000_v37  ;;  %v2244_v38 = vpop.f32.mrb[9].mxu1  ;;  %v1188_v39 = vpop.f32.mrb[4].mxu0 }
 0x494   : > { %v1003_v40 = vpop.f32.mrb[10].mxu1  ;;  %v2262_v41 = vpop.f32.mrb[5].mxu0  ;;  %v1189_v51 = vadd.f32 %v1188_v39, %v3068_v59 }
 0x495   : > { %1008 = vst.msk [vmem:[#allocation2 + $0x8] sm:$0xff] %vm891_vm1, %v1003_v40  ;;  %v2245_v42 = vpop.f32.mrb[11].mxu1  ;;  %v1191_v43 = vpop.f32.mrb[6].mxu0 }
 0x496   : > { %v2263_v44 = vpop.f32.mrb[7].mxu0  ;;  %v1192_v61 = vadd.f32 %v1191_v43, %v3068_v59  ;;  %v1195_v62 = vsel %vm939_vm3, %v1189_v51, -inf }
 0x498   : > { %v1198_v3 = vsel %vm939_vm3, %v1192_v61, -inf }
 0x49a   : > { %v1055_v45 = vpop.f32.mrb[12].mxu1 }
 0x49b   : > { %v1056_v46 = vadd.f32 %v1055_v45, %v3068_v59  ;;  %v2250_v47 = vpop.f32.mrb[13].mxu1  ;;  %v1320_v48 = vpop.f32.mrb[8].mxu0 }
 0x49c   : > { %v1058_v49 = vpop.f32.mrb[14].mxu1  ;;  %v2274_v50 = vpop.f32.mrb[9].mxu0  ;;  %v1321_v2 = vadd.f32 %v1320_v48, %v3068_v59 }
 0x49d   : > { %v1059_v52 = vadd.f32 %v1058_v49, %v3068_v59  ;;  %v2251_v53 = vpop.f32.mrb[15].mxu1  ;;  %v1323_v54 = vpop.f32.mrb[10].mxu0  ;;  %v1062_v56 = vsel %vm939_vm3, %v1056_v46, -inf }
 0x49e   : > { %v2275_v57 = vpop.f32.mrb[11].mxu0  ;;  %1063 = vmax.xlane.f32.xlu0 %v1062_v56  ;;  %v1324_v58 = vadd.f32 %v1323_v54, %v3068_v59  ;;  %v1327_v4 = vsel %vm939_vm3, %v1321_v2, -inf }
 0x49f   : > { %v1065_v60 = vsel %vm939_vm3, %v1059_v52, -inf }
 0x4a0   : > { %1066 = vmax.xlane.f32.xlu1 %v1065_v60  ;;  %v1330_v63 = vsel %vm939_vm3, %v1324_v58, -inf }
 0x4a2   : > { %1196 = vmax.xlane.f32.xlu0 %v1195_v62 }
 0x4a4   : > { %1331 = vmax.xlane.f32.xlu1 %v1330_v63 }
 0x4a6   : > { %1199 = vmax.xlane.f32.xlu0 %v1198_v3  ;;  %v2428_v3 = vld [vmem:[#allocation7 + $0x8] sm:$0xff]  }
 0x4aa   : > { %1328 = vmax.xlane.f32.xlu0 %v1327_v4  ;;  %v2429_v4 = vld [vmem:[#allocation7 + $0x10] sm:$0xff]  }
 0x52b   : > { %v1064_v5 = vpop.xlane.xlu0 %1063 }
 0x52c   : > { %v1068_v14 = vsub.f32 %v1056_v46, %v1064_v5  ;;  %v2430_v5 = vld [vmem:[#allocation7 + $0x18] sm:$0xff]  }
 0x52d   : > { %v1067_v6 = vpop.xlane.xlu1 %1066 }
 0x52e   : > { %v1069_v15 = vsub.f32 %v1059_v52, %v1067_v6  ;;  %v1070_v19 = vmul.f32 1.442695, %v1068_v14  ;;  %v2431_v6 = vld [vmem:[#allocation7 + $0x20] sm:$0xff]  }
 0x52f   : > { %v1197_v7 = vpop.xlane.xlu0 %1196 }
 0x530   : > { %v1201_v8 = vsub.f32 %v1189_v51, %v1197_v7  ;;  %v1072_v20 = vmul.f32 1.442695, %v1069_v15  ;;  %v2434_v15 = vld [vmem:[#allocation7 + $0x38] sm:$0xff]  }
 0x531   : > { %v1332_v9 = vpop.xlane.xlu1 %1331 }
 0x532   : > { %v1203_v10 = vmul.f32 1.442695, %v1201_v8  ;;  %v1334_v11 = vsub.f32 %v1324_v58, %v1332_v9 }
 0x533   : > { %v1200_v12 = vpop.xlane.xlu0 %1199 }
 0x534   : > { %2483 = vpow2.f32 %v1203_v10  ;;  %v1202_v13 = vsub.f32 %v1192_v61, %v1200_v12  ;;  %v1337_v16 = vmul.f32 1.442695, %v1334_v11  ;;  %v2432_v10 = vld [vmem:[#allocation7 + $0x28] sm:$0xff]   ;;  %v2433_v11 = vld [vmem:[#allocation7 + $0x30] sm:$0xff]  }
 0x536   : > { %v1205_v59 = vmul.f32 1.442695, %v1202_v13 }
 0x537   : > { %v1329_v17 = vpop.xlane.xlu0 %1328 }
 0x538   : > { %2485 = vpow2.f32 %v1205_v59  ;;  %v1333_v18 = vsub.f32 %v1321_v2, %v1329_v17  ;;  %v2427_v2 = vld [vmem:[#allocation7] sm:$0xff]  }
 0x539   : > { %2487 = vpow2.f32 %v1337_v16  ;;  %2283 = vmatpush3.bf16.msra.mxu0 %v2427_v2  ;;  %v2456_v2 = vld [vmem:[#allocation8 + $0x70] ss:$8 sps:$4 sm:$0xff]  }
 0x53a   : > { %v1335_v21 = vmul.f32 1.442695, %v1333_v18  ;;  %2284 = vmatprep.subr.bf16.mxu0 %v2713_v1 }
 0x53c   : > { %2489 = vpow2.f32 %v1335_v21 }
 0x53d   : > { %2491 = vpow2.f32 %v1070_v19  ;;  %2285 = vmatpush3.bf16.msra.mxu0 %v2428_v3  ;;  %v2459_v3 = vld [vmem:[#allocation10 + $0x40] sm:$0xff]  }
 0x53e   : > { %v2484_v22 = vpop.eup %2483  ;;  %2493 = vpow2.f32 %v1072_v20  ;;  %2286 = vmatprep.subr.bf16.mxu0 %v2713_v1 }
 0x53f   : > { %v1207_v25 = vsel %vm939_vm3, %v2484_v22, 0.0 }
 0x540   : > { %1208 = vadd.xlane.f32.xlu0 %v1207_v25 }
 0x541   : > { %2287 = vmatpush3.bf16.msra.mxu0 %v2429_v4  ;;  %v2460_v4 = vld [vmem:[#allocation10] sm:$0xff]  }
 0x542   : > { %v2486_v26 = vpop.eup %2485  ;;  %2288 = vmatprep.subr.bf16.mxu0 %v2713_v1 }
 0x543   : > { %v1210_v27 = vsel %vm939_vm3, %v2486_v26, 0.0  ;;  %v2488_v28 = vpop.eup %2487 }
 0x544   : > { %1211 = vadd.xlane.f32.xlu1 %v1210_v27  ;;  %v1342_v35 = vsel %vm939_vm3, %v2488_v28, 0.0 }
 0x545   : > { %2289 = vmatpush3.bf16.msra.mxu0 %v2430_v5  ;;  %v2461_v5 = vld [vmem:[#allocation10 + $0x48] sm:$0xff]  }
 0x546   : > { %v2490_v29 = vpop.eup %2489  ;;  %2290 = vmatprep.subr.bf16.mxu0 %v2713_v1 }
 0x547   : > { %v2492_v32 = vpop.eup %2491  ;;  %v1339_v34 = vsel %vm939_vm3, %v2490_v29, 0.0 }
 0x548   : > { %v2494_v36 = vpop.eup %2493  ;;  %1340 = vadd.xlane.f32.xlu0 %v1339_v34  ;;  %1343 = vadd.xlane.f32.xlu1 %v1342_v35  ;;  %v1074_v37 = vsel %vm939_vm3, %v2492_v32, 0.0 }
 0x549   : > { %v1077_v38 = vsel %vm939_vm3, %v2494_v36, 0.0  ;;  %2291 = vmatpush3.bf16.msra.mxu0 %v2431_v6  ;;  %v2462_v6 = vld [vmem:[#allocation10 + $0x8] sm:$0xff]  }
 0x54a   : > { %2292 = vmatprep.subr.bf16.mxu0 %v2713_v1 }
 0x54c   : > { %1075 = vadd.xlane.f32.xlu0 %v1074_v37  ;;  %1078 = vadd.xlane.f32.xlu1 %v1077_v38 }
 0x54d   : > { %2293 = vmatpush3.bf16.msra.mxu0 %v2432_v10  ;;  %v2467_v10 = vld [vmem:[#allocation10 + $0x60] sm:$0xff]  }
 0x54e   : > { %2294 = vmatprep.subr.bf16.mxu0 %v2713_v1 }
 0x551   : > { %2295 = vmatpush3.bf16.msra.mxu0 %v2433_v11  ;;  %v2468_v11 = vld [vmem:[#allocation10 + $0x20] sm:$0xff]  }
 0x552   : > { %2296 = vmatprep.subr.bf16.mxu0 %v2713_v1 }
 0x555   : > { %2297 = vmatpush3.bf16.msra.mxu0 %v2434_v15 }
 0x556   : > { %2192 = vmatprep.subr.bf16.mxu0 %v2459_v3 }
 0x55d   : > { %1218 = vrot.lane.b32.xlu1 %v3055_v55, %s2718_s0 }
 0x561   : > { %1350 = vrot.lane.b32.xlu1 %v3055_v55, %s2717_s28 }
 0x562   : > { %1086 = vrot.lane.b32.xlu0 %v3055_v55, %s2716_s24 }
 0x5cd   : > { %v1209_v39 = vpop.xlane.xlu0 %1208 }
 0x5d1   : > { %v1212_v40 = vpop.xlane.xlu1 %1211 }
 0x5d5   : > { %v1341_v41 = vpop.xlane.xlu0 %1340  ;;  %v1344_v42 = vpop.xlane.xlu1 %1343 }
 0x5d9   : > { %v1076_v43 = vpop.xlane.xlu0 %1075  ;;  %v1079_v44 = vpop.xlane.xlu1 %1078 }
 0x5da   : > { %2495 = vrcp.f32 %v1076_v43  ;;  %v2437_v43 = vld [vmem:[#allocation8 + $0x4] ss:$8 sps:$4 sm:$0xff]  }
 0x5db   : > { %2497 = vrcp.f32 %v1079_v44  ;;  %v2440_v44 = vld [vmem:[#allocation8 + $0x14] ss:$8 sps:$4 sm:$0xff]  }
 0x5dc   : > { %2499 = vrcp.f32 %v1212_v40 }
 0x5dd   : > { %v1087_v45 = vpop.permute.xlu0 %1086  ;;  %2501 = vrcp.f32 %v1209_v39  ;;  %v1219_v51 = vpop.permute.xlu1 %1218 }
 0x5de   : > { %2253 = vmatpush3.bf16.msra.mxu1 %v1087_v45  ;;  %2503 = vrcp.f32 %v1341_v41  ;;  %v2438_v45 = vld [vmem:[#allocation8 + $0x10] ss:$8 sps:$4 sm:$0xff]  }
 0x5df   : > { %2264 = vmatprep.subr.bf16.mxu1 %v2713_v1  ;;  %2505 = vrcp.f32 %v1344_v42  ;;  %v2435_v42 = vld [vmem:[#allocation8] ss:$8 sps:$4 sm:$0xff]  }
 0x5e1   : > { %v1351_v60 = vpop.permute.xlu1 %1350 }
 0x5e4   : > { %v2496_v46 = vpop.eup %2495 }
 0x5e5   : > { %v2498_v47 = vpop.eup %2497  ;;  %v1081_v48 = vmul.f32 %v2496_v46, %v2492_v32  ;;  %v2108_v32 = vld [vmem:[%s3202_s5] ss:$0 sm:$0xff] }
 0x5e6   : > { %v1083_v49 = vmul.f32 %v2498_v47, %v2494_v36  ;;  %v2500_v50 = vpop.eup %2499 }
 0x5e7   : > { %v2502_v52 = vpop.eup %2501  ;;  %v1216_v53 = vmul.f32 %v2500_v50, %v2486_v26 }
 0x5e8   : > { %v1084_v55 = vpack.c.bf16 %v1083_v49, %v1081_v48  ;;  %v1214_v54 = vmul.f32 %v2502_v52, %v2484_v22  ;;  %v2504_v56 = vpop.eup %2503  ;;  %v2441_v52 = vld [vmem:[#allocation8 + $0x20] ss:$8 sps:$4 sm:$0xff]  }
 0x5e9   : > { %v2506_v58 = vpop.eup %2505  ;;  %v1346_v61 = vmul.f32 %v2504_v56, %v2490_v29  ;;  %v2449_v56 = vld [vmem:[#allocation8 + $0x44] ss:$8 sps:$4 sm:$0xff]  }
 0x5ea   : > { %2255 = vmatmul.mubr.msk.bf16.vlgmr.msra.gmra.mrb[16].mxu1 %vm939_vm3, %v1084_v55  ;;  %v1217_v57 = vpack.c.bf16 %v1216_v53, %v1214_v54  ;;  %v1348_v62 = vmul.f32 %v2506_v58, %v2488_v28  ;;  %v2446_v53 = vld [vmem:[#allocation8 + $0x34] ss:$8 sps:$4 sm:$0xff]   ;;  %v2444_v54 = vld [vmem:[#allocation8 + $0x30] ss:$8 sps:$4 sm:$0xff]  }
 0x5eb   : > { %2265 = vmatpush3.bf16.msra.mxu1 %v1219_v51  ;;  %2266 = vmatprep.mubr.msk.bf16.mxu1 %vm2714_vm0, %v2713_v1  ;;  %v2443_v51 = vld [vmem:[#allocation8 + $0x24] ss:$8 sps:$4 sm:$0xff]   ;;  %v2452_v58 = vld [vmem:[#allocation8 + $0x54] ss:$8 sps:$4 sm:$0xff]  }
 0x5ec   : > { %2276 = vmatprep.subr.bf16.mxu1 %v2713_v1  ;;  %v1349_v63 = vpack.c.bf16 %v1348_v62, %v1346_v61  ;;  %v2455_v61 = vld [vmem:[#allocation8 + $0x64] ss:$8 sps:$4 sm:$0xff]   ;;  %v2453_v62 = vld [vmem:[#allocation8 + $0x60] ss:$8 sps:$4 sm:$0xff]  }
 0x5f2   : > { %2267 = vmatmul.mubr.msk.bf16.vlgmr.msra.gmra.mrb[20].mxu1 %vm939_vm3, %v1217_v57  ;;  %v2447_v57 = vld [vmem:[#allocation8 + $0x40] ss:$8 sps:$4 sm:$0xff]  }
 0x5f3   : > { %2277 = vmatpush3.bf16.msra.mxu1 %v1351_v60  ;;  %2278 = vmatprep.mubr.msk.bf16.mxu1 %vm2714_vm0, %v2713_v1  ;;  %v2450_v60 = vld [vmem:[#allocation8 + $0x50] ss:$8 sps:$4 sm:$0xff]  }
 0x5f4   : > { %1675 = vmatprep.subr.bf16.mxu1 %v2437_v43 }
 0x5fa   : > { %2279 = vmatmul.mubr.msk.bf16.vlgmr.msra.gmra.mrb[24].mxu1 %vm939_vm3, %v1349_v63  ;;  %v2458_v63 = vld [vmem:[#allocation8 + $0x74] ss:$8 sps:$4 sm:$0xff]  }
 0x5fb   : > { %1707 = vmatprep.mubr.bf16.mxu1 %v2712_v0  ;;  %1676 = vmatpush1.bf16.msra.mxu1 %v2435_v42 }
 0x5fc   : > { %1677 = vmatprep.subr.bf16.mxu1 %v2440_v44 }
 0x5ff   : > { %1678 = vmatpush1.bf16.msra.mxu1 %v2438_v45 }
 0x600   : > { %1679 = vmatprep.subr.bf16.mxu1 %v2443_v51 }
 0x603   : > { %1680 = vmatpush1.bf16.msra.mxu1 %v2441_v52 }
 0x604   : > { %1681 = vmatprep.subr.bf16.mxu1 %v2446_v53 }
 0x607   : > { %1682 = vmatpush1.bf16.msra.mxu1 %v2444_v54 }
 0x608   : > { %1683 = vmatprep.subr.bf16.mxu1 %v2449_v56 }
 0x60b   : > { %1684 = vmatpush1.bf16.msra.mxu1 %v2447_v57 }
 0x60c   : > { %1685 = vmatprep.subr.bf16.mxu1 %v2452_v58 }
 0x60f   : > { %1686 = vmatpush1.bf16.msra.mxu1 %v2450_v60 }
 0x610   : > { %1687 = vmatprep.subr.bf16.mxu1 %v2455_v61 }
 0x613   : > { %1688 = vmatpush1.bf16.msra.mxu1 %v2453_v62 }
 0x614   : > { %1689 = vmatprep.subr.bf16.mxu1 %v2458_v63 }
 0x617   : > { %1690 = vmatpush1.bf16.msra.mxu1 %v2456_v2 }
 0x6bd   : > { %v1126_v7 = vpop.f32.mrb[16].mxu1 }
 0x6be   : > { %1135 = vrot.lane.b32.xlu1 %v1126_v7, %s2717_s28  ;;  %v2256_v0 = vpop.f32.mrb[17].mxu1  ;;  %v2463_v7 = vld [vmem:[#allocation10 + $0x50] sm:$0xff]  }
 0x6bf   : > { %v1129_v8 = vpop.f32.mrb[18].mxu1  ;;  %v2464_v0 = vld [vmem:[#allocation10 + $0x10] sm:$0xff]  }
 0x6c0   : > { %1137 = vrot.lane.b32.xlu0 %v1129_v8, %s2717_s28  ;;  %v2257_v9 = vpop.f32.mrb[19].mxu1  ;;  %v2465_v8 = vld [vmem:[#allocation10 + $0x58] sm:$0xff]   ;;  %s2157_s28 = sshll.u32 %s3251_s14, 4 }
 0x6c1   : > { %v2466_v9 = vld [vmem:[#allocation10 + $0x18] sm:$0xff]   ;;  %s613_s11 = scalar_lea.vmem %s3244_s12, %s2157_s28 }
 0x6c5   : > { %v1258_v12 = vpop.f32.mrb[20].mxu1 }
 0x6c6   : > { %1267 = vrot.lane.b32.xlu1 %v1258_v12, %s2718_s0  ;;  %v2268_v13 = vpop.f32.mrb[21].mxu1  ;;  %v2469_v12 = vld [vmem:[#allocation10 + $0x68] sm:$0xff]  }
 0x6c7   : > { %v1261_v14 = vpop.f32.mrb[22].mxu1 }
 0x6c8   : > { %1269 = vrot.lane.b32.xlu0 %v1261_v14, %s2718_s0  ;;  %v2269_v16 = vpop.f32.mrb[23].mxu1 }
 0x6cd   : > { %v1390_v59 = vpop.f32.mrb[24].mxu1 }
 0x6ce   : > { %1399 = vrot.lane.b32.xlu1 %v1390_v59, %s2716_s24  ;;  %v2280_v17 = vpop.f32.mrb[25].mxu1 }
 0x6cf   : > { %v1393_v18 = vpop.f32.mrb[26].mxu1 }
 0x6d0   : > { %1401 = vrot.lane.b32.xlu0 %v1393_v18, %s2716_s24  ;;  %v2281_v19 = vpop.f32.mrb[27].mxu1  ;;  %s3242_s24 = sld [smem:[#allocation17_spill]] }
 0x730   : > { %v1136_v20 = vpop.permute.xlu1 %1135 }
 0x731   : > { %1142 = vst.msk [vmem:[#allocation2] sm:$0xff] %vm1141_vm4, %v1136_v20  ;;  %v2117_v20 = vld [vmem:[%s3203_s6] ss:$0 sm:$0xff] }
 0x732   : > { %v1138_v21 = vpop.permute.xlu0 %1137 }
 0x733   : > { %1143 = vst.msk [vmem:[#allocation2 + $0x8] sm:$0xff] %vm1141_vm4, %v1138_v21 }
 0x738   : > { %v1268_v22 = vpop.permute.xlu1 %1267 }
 0x739   : > { %1274 = vst.msk [vmem:[#allocation2] sm:$0xff] %vm1273_vm5, %v1268_v22 }
 0x73a   : > { %v1270_v25 = vpop.permute.xlu0 %1269 }
 0x73b   : > { %1275 = vst.msk [vmem:[#allocation2 + $0x8] sm:$0xff] %vm1273_vm5, %v1270_v25 }
 0x740   : > { %v1400_v1 = vpop.permute.xlu1 %1399 }
 0x741   : > { %1406 = vst.msk [vmem:[#allocation2] sm:$0xff] %vm1405_vm6, %v1400_v1  ;;  %v2118_v1 = vld [vmem:[%s3204_s7] ss:$0 sm:$0xff] }
 0x742   : > { %v1402_v26 = vpop.permute.xlu0 %1401 }
 0x743   : > { %1407 = vst.msk [vmem:[#allocation2 + $0x8] sm:$0xff] %vm1405_vm6, %v1402_v26 }
 0x748   : > { %v1408_v27 = vld [vmem:[#allocation2] sm:$0xff] }
 0x74a   : > { %v1409_v28 = vld [vmem:[#allocation2 + $0x8] sm:$0xff] }
 0x74b   : > { %v1410_v29 = vpack.c.bf16 %v1409_v28, %v1408_v27 }
 0x74d   : > { %2299 = vmatmul.mubr.bf16.vlgmr.msra.gmra.mrb[12].mxu0 %v1410_v29 }
 0x74e   : > { %2193 = vmatpush3.bf16.msra.mxu0 %v2460_v4 }
 0x74f   : > { %2194 = vmatprep.subr.bf16.mxu0 %v2461_v5 }
 0x752   : > { %2195 = vmatpush3.bf16.msra.mxu0 %v2462_v6 }
 0x753   : > { %2196 = vmatprep.subr.bf16.mxu0 %v2463_v7 }
 0x756   : > { %2197 = vmatpush3.bf16.msra.mxu0 %v2464_v0 }
 0x757   : > { %2198 = vmatprep.subr.bf16.mxu0 %v2465_v8 }
 0x75a   : > { %2199 = vmatpush3.bf16.msra.mxu0 %v2466_v9 }
 0x75b   : > { %2200 = vmatprep.subr.bf16.mxu0 %v2467_v10 }
 0x75e   : > { %2201 = vmatpush3.bf16.msra.mxu0 %v2468_v11 }
 0x75f   : > { %2202 = vmatprep.subr.bf16.mxu0 %v2469_v12 }
 0x820   : > { %v1516_v34 = vpop.f32.mrb[12].mxu0 }
 0x821   : > { %v1517_v35 = vadd.f32 %v2108_v32, %v1516_v34  ;;  %v2300_v36 = vpop.f32.mrb[13].mxu0  ;;  %v2471_v34 = vld [vmem:[#allocation10 + $0x70] sm:$0xff]  }
 0x822   : > { %v1519_v37 = vpop.f32.mrb[14].mxu0  ;;  %v2473_v36 = vld [vmem:[#allocation10 + $0x78] sm:$0xff]  }
 0x823   : > { %v1520_v38 = vadd.f32 %v2108_v32, %v1519_v37  ;;  %v2301_v39 = vpop.f32.mrb[15].mxu0  ;;  %v1523_v40 = vadd.f32 %v1517_v35, %v3017_v23  ;;  %v2470_v32 = vld [vmem:[#allocation10 + $0x28] sm:$0xff]   ;;  %v2472_v35 = vld [vmem:[#allocation10 + $0x30] sm:$0xff]   ;;  %v2474_v37 = vld [vmem:[#allocation10 + $0x38] sm:$0xff]  }
 0x824   : > { %2203 = vmatpush3.bf16.msra.mxu0 %v2470_v32 }
 0x825   : > { %1527 = vadd.xlane.f32.xlu1 %v1523_v40  ;;  %v1524_v41 = vadd.f32 %v1520_v38, %v3021_v24  ;;  %2204 = vmatprep.subr.bf16.mxu0 %v2471_v34  ;;  %v1583_v38 = vld [vmem:[%s3206_s9] sm:$0x3] }
 0x826   : > { %v1588_v39 = vrot.slane %v1583_v38, %v3040_v31 }
 0x827   : > { %1529 = vadd.xlane.f32.xlu0 %v1524_v41 }
 0x828   : > { %2205 = vmatpush3.bf16.msra.mxu0 %v2472_v35 }
 0x829   : > { %2206 = vmatprep.subr.bf16.mxu0 %v2473_v36 }
 0x82c   : > { %2207 = vmatpush3.bf16.msra.mxu0 %v2474_v37 }
 0x8b2   : > { %v1528_v46 = vpop.xlane.xlu1 %1527 }
 0x8b3   : > { %v1532_v47 = vmul.f32 0.0078125, %v1528_v46 }
 0x8b4   : > { %v1530_v48 = vpop.xlane.xlu0 %1529 }
 0x8b5   : > { %v1534_v49 = vsub.f32 %v1523_v40, %v1532_v47  ;;  %v1533_v55 = vmul.f32 0.0078125, %v1530_v48  ;;  %v1592_v40 = vrot.slane %v1583_v38, %v661_v33 }
 0x8b7   : > { %v3154_v50 = vsub.f32 %v1524_v41, %v1533_v55  ;;  %v1536_v23 = vmul.f32 %v1534_v49, %v1534_v49 }
 0x8b9   : > { %1538 = vadd.xlane.f32.xlu0 %v1536_v23  ;;  %v1537_v24 = vmul.f32 %v3154_v50, %v3154_v50 }
 0x8bd   : > { %1540 = vadd.xlane.f32.xlu0 %v1537_v24 }
 0x946   : > { %v1539_v13 = vpop.xlane.xlu0 %1538 }
 0x947   : > { %v1542_v14 = vmul.f32 0.0078125, %v1539_v13 }
 0x949   : > { %v1544_v15 = vadd.f32 1e-05, %v1542_v14  ;;  %v2152_v14 = vld [vmem:[%s3242_s24] ss:$0 sm:$0xff] }
 0x94a   : > { %v1541_v16 = vpop.xlane.xlu0 %1540 }
 0x94b   : > { %2507 = vrsqrt.f32 %v1544_v15  ;;  %v1543_v59 = vmul.f32 0.0078125, %v1541_v16 }
 0x94d   : > { %v1545_v17 = vadd.f32 1e-05, %v1543_v59  ;;  %v2153_v59 = vld [vmem:[%s3243_s13] ss:$0 sm:$0xff] }
 0x94f   : > { %2509 = vrsqrt.f32 %v1545_v17 }
 0x955   : > { %v2508_v18 = vpop.eup %2507 }
 0x956   : > { %v1548_v19 = vmul.f32 %v2508_v18, %v1534_v49 }
 0x958   : > { %v1556_v25 = vmul.f32 %v2117_v20, %v1548_v19 }
 0x959   : > { %v2510_v21 = vpop.eup %2509 }
 0x95a   : > { %v1549_v22 = vmul.f32 %v2510_v21, %v3154_v50  ;;  %v1564_v27 = vadd.f32 %v2118_v1, %v1556_v25 }
 0x95c   : > { %v1557_v26 = vmul.f32 %v2117_v20, %v1549_v22 }
 0x95e   : > { %v1565_v28 = vadd.f32 %v2118_v1, %v1557_v26 }
 0x960   : > { %v1566_v29 = vpack.c.bf16 %v1565_v28, %v1564_v27 }
 0x962   : > { %1708 = vmatmul.mubr.bf16.vlgmr.msra.gmra.mrb[28].mxu1 %v1566_v29 }
 0xa35   : > { %v1709_v41 = vpop.f32.mrb[28].mxu1 }
 0xa36   : > { %v1710_v42 = vadd.f32 %v1709_v41, %v1588_v39  ;;  %v1711_v43 = vpop.f32.mrb[29].mxu1 }
 0xa37   : > { %v1712_v44 = vadd.f32 %v1711_v43, %v1592_v40  ;;  %v1713_v45 = vpop.f32.mrb[30].mxu1 }
 0xa38   : > { %v1714_v46 = vadd.f32 %v1713_v45, %v1588_v39  ;;  %v1715_v47 = vpop.f32.mrb[31].mxu1  ;;  %v1718_v49 = vmax.f32 %v1710_v42, 0.0 }
 0xa39   : > { %v1716_v48 = vadd.f32 %v1715_v47, %v1592_v40  ;;  %v1719_v50 = vmax.f32 %v1712_v44, 0.0 }
 0xa3a   : > { %v1720_v55 = vmax.f32 %v1714_v46, 0.0 }
 0xa3b   : > { %v1721_v23 = vmax.f32 %v1716_v48, 0.0 }
 0xa3c   : > { %v1722_v24 = vpack.c.bf16 %v1720_v55, %v1718_v49 }
 0xa3d   : > { %v1723_v51 = vpack.c.bf16 %v1721_v23, %v1719_v50 }
 0xa3f   : > { %1891 = vmatprep.mubr.bf16.mxu0 %v1723_v51 }
 0xa40   : > { %1892 = vmatmul.mubr.bf16.vlgmr.msra.gmra.mrb[16].mxu0 %v1722_v24 }
 0xb13   : > { %v2208_v31 = vpop.f32.mrb[16].mxu0 }
 0xb14   : > { %v2209_v33 = vpop.f32.mrb[17].mxu0 }
 0xb15   : > { %v2210_v52 = vadd.f32 %v2209_v33, %v2208_v31  ;;  %v2211_v53 = vpop.f32.mrb[18].mxu0 }
 0xb16   : > { %v2212_v54 = vpop.f32.mrb[19].mxu0 }
 0xb17   : > { %v1894_v56 = vadd.f32 %v2210_v52, %v2135_v30  ;;  %v2213_v57 = vadd.f32 %v2212_v54, %v2211_v53 }
 0xb19   : > { %v1897_v58 = vadd.f32 %v2213_v57, %v2135_v30  ;;  %v1900_v60 = vadd.f32 %v1894_v56, %v1564_v27 }
 0xb1b   : > { %1904 = vadd.xlane.f32.xlu1 %v1900_v60  ;;  %v1901_v61 = vadd.f32 %v1897_v58, %v1565_v28 }
 0xb1d   : > { %1906 = vadd.xlane.f32.xlu0 %v1901_v61 }
 0xba8   : > { %v1905_v62 = vpop.xlane.xlu1 %1904 }
 0xba9   : > { %v1908_v63 = vmul.f32 0.0078125, %v1905_v62 }
 0xbaa   : > { %v1907_v2 = vpop.xlane.xlu0 %1906 }
 0xbab   : > { %v1910_v3 = vsub.f32 %v1900_v60, %v1908_v63  ;;  %v1909_v4 = vmul.f32 0.0078125, %v1907_v2 }
 0xbad   : > { %v1911_v5 = vsub.f32 %v1901_v61, %v1909_v4  ;;  %v1912_v6 = vmul.f32 %v1910_v3, %v1910_v3 }
 0xbaf   : > { %1914 = vadd.xlane.f32.xlu1 %v1912_v6  ;;  %v1913_v7 = vmul.f32 %v1911_v5, %v1911_v5 }
 0xbb1   : > { %1916 = vadd.xlane.f32.xlu0 %v1913_v7 }
 0xc3c   : > { %v1915_v0 = vpop.xlane.xlu1 %1914 }
 0xc3d   : > { %v1918_v8 = vmul.f32 0.0078125, %v1915_v0 }
 0xc3e   : > { %v1917_v9 = vpop.xlane.xlu0 %1916 }
 0xc3f   : > { %v1920_v10 = vadd.f32 1e-05, %v1918_v8  ;;  %v1919_v11 = vmul.f32 0.0078125, %v1917_v9 }
 0xc41   : > { %2511 = vrsqrt.f32 %v1920_v10  ;;  %v1921_v12 = vadd.f32 1e-05, %v1919_v11 }
 0xc43   : > { %2513 = vrsqrt.f32 %v1921_v12 }
 0xc4b   : > { %v2512_v13 = vpop.eup %2511 }
 0xc4c   : > { %v1924_v15 = vmul.f32 %v2512_v13, %v1910_v3 }
 0xc4d   : > { %v2514_v16 = vpop.eup %2513 }
 0xc4e   : > { %v1932_v17 = vmul.f32 %v2152_v14, %v1924_v15  ;;  %v1925_v18 = vmul.f32 %v2514_v16, %v1911_v5 }
 0xc50   : > { %v1940_v19 = vadd.f32 %v2153_v59, %v1932_v17  ;;  %v1933_v20 = vmul.f32 %v2152_v14, %v1925_v18 }
 0xc52   : > { %1942 = vst [vmem:[%s613_s11] sm:$0xff] %v1940_v19  ;;  %v1941_v21 = vadd.f32 %v2153_v59, %v1933_v20 }
 0xc54   : > { %1943 = vst [vmem:[%s613_s11 + $0x8] sm:$0xff] %v1941_v21 }
 0xc55 PF: > { %s3245_s14 = smov %s2936_s21  ;;  %p28_p1 = scmp.ge.s32.totalorder %s2936_s21, 4  }
 0xc56   : > { %s3246_s21 = smov %s2691_s22  ;;  %s3247_s22 = smov %s2695_s23 }
 0xc57   : > { %s3248_s23 = smov %s2947_s20  ;;  %s3249_s24 = smov %s3245_s14 }
 0xc58   :  { %30 = sbr.rel (!%p28_p1) target bundleno = 12 (0xc), region = 143 }
 0xc5f   :  { %1965 = vsyncpa [#allocation4], 1 }
 0xc60   :  { %1967 = vsyncpa [#allocation4 + $0x1], 1 }
 0xc61   :  { %1968 = vsyncpa [#allocation6], 1 }
 0xc62   :  { %1969 = vsyncpa [#allocation9], 1 }

</bundles_post_ra>
